<compile_context>
chip_gen: v5e
topology: v5e:2x2
jax: 0.10.0
libtpu: 0.0.40
codegen_flags: <defaults>
</compile_context>

<pallas_src>
import functools
import math

import jax
import jax.numpy as jnp
from jax.experimental import pallas as pl
from jax.experimental.pallas import tpu as pltpu

NEG_INF = -1e30               # additive-mask "minus infinity" (finite -> no inf-inf NaNs)
LN_EPS = 1e-5                 # torch.nn.LayerNorm default
MATMUL_DTYPE = jnp.bfloat16   # MXU operand / intermediate-activation dtype (f32 accumulate)
VMEM_LIMIT = 32 * 1024 * 1024        # explicit scoped-VMEM request (safe on v5e/v6e/v7x)
VMEM_TILE_BUDGET = 20 * 1024 * 1024  # budget for one grid step's buffers in the fused-LN linears


# ----------------------------------------------------------------------------
# helpers
# ----------------------------------------------------------------------------
def _pick_tile(dim, max_tile, gran):
    """Largest tile <= max_tile that divides `dim` and satisfies the (8,128) block rule.

    Callers pad dims to multiples of `gran` first, so the full-dim fallback only triggers
    for small dims (where a full block is legal and cheap).
    """
    if dim <= max_tile:
        return dim
    t = (max_tile // gran) * gran
    while t > gran and dim % t:
        t -= gran
    return t if (t >= gran and dim % t == 0) else dim


def _pad_axis(a, axis, mult):
    """Zero-pad `a` along `axis` up to a multiple of `mult` (no-op when already aligned)."""
    size = a.shape[axis]
    pad = (-size) % mult
    if pad == 0:
        return a
    widths = [(0, 0)] * a.ndim
    widths[axis] = (0, pad)
    return jnp.pad(a, widths)


# ----------------------------------------------------------------------------
# Linear kernels (tiled, f32 VMEM accumulator, reduction axis innermost)
# ----------------------------------------------------------------------------
def _linear_kernel(x_ref, w_ref, b_ref, o_ref, acc_ref, *, activation):
    # tiled y = x @ w + b (+ optional relu)
    @pl.when(pl.program_id(2) == 0)
    def _():
        acc_ref[...] = jnp.zeros_like(acc_ref)

    acc_ref[...] += jnp.dot(x_ref[...].astype(MATMUL_DTYPE),   # no-op cast when x is bf16
                            w_ref[...].astype(MATMUL_DTYPE),
                            preferred_element_type=jnp.float32)

    @pl.when(pl.program_id(2) == pl.num_programs(2) - 1)
    def _():
        y = acc_ref[...] + b_ref[...]
        if activation == "relu":
            y = jnp.maximum(y, 0.0)
        o_ref[...] = y.astype(o_ref.dtype)


def _linear_add_ln_kernel(x_ref, w_ref, b_ref, res_ref, g_ref, beta_ref, o_ref, acc_ref):
    # tiled y = LayerNorm(residual + x @ w + b) -- post-norm residual fused into the epilogue.
    @pl.when(pl.program_id(2) == 0)
    def _():
        acc_ref[...] = jnp.zeros_like(acc_ref)

    acc_ref[...] += jnp.dot(x_ref[...].astype(MATMUL_DTYPE),
                            w_ref[...].astype(MATMUL_DTYPE),
                            preferred_element_type=jnp.float32)

    @pl.when(pl.program_id(2) == pl.num_programs(2) - 1)
    def _():
        y = acc_ref[...] + b_ref[...] + res_ref[...]
        mu = jnp.mean(y, axis=-1, keepdims=True)
        d = y - mu
        var = jnp.mean(d * d, axis=-1, keepdims=True)
        o_ref[...] = (d * jax.lax.rsqrt(var + LN_EPS) * g_ref[...] + beta_ref[...]
                      ).astype(o_ref.dtype)


def pallas_linear(x, w, b, activation=None, residual=None, ln_g=None, ln_b=None,
                  out_dtype=jnp.float32, tm=512, tn=512, tk=512):
    """Tiled linear; optionally fuses residual-add + LayerNorm into the epilogue."""
    M, K = x.shape
    K2, N = w.shape
    assert K == K2
    fuse_ln = residual is not None

    # --- pad to HW granularity so tiles never silently blow up to huge full-dim blocks ---
    xp = _pad_axis(_pad_axis(x, 0, 8), 1, 128)
    wp = _pad_axis(w, 0, 128)
    bp = b
    if not fuse_ln:                       # LN reduces over the real feature dim -> keep N as-is
        wp = _pad_axis(wp, 1, 128)
        bp = _pad_axis(b, 0, 128)
    resp = _pad_axis(residual, 0, 8) if fuse_ln else None
    Mp, Kp = xp.shape
    Np = wp.shape[1]

    tk = _pick_tile(Kp, tk, 128)
    if fuse_ln:
        tn_eff = Np                        # full feature dim (legal block; LN needs it anyway)
        # VMEM-aware tm cap: f32 acc + double-buffered f32 out + f32 residual + bf16 x tile.
        # TODO(synk): on v7x the residual tile could be fetched only at the last k step
        # (manual async copy) to reclaim further headroom.
        per_row = Np * 4 * (1 + 2 + 2) + tk * 2 * 2
        fixed = 2 * tk * Np * 2 + 6 * Np * 4
        cap = max(8, ((VMEM_TILE_BUDGET - fixed) // max(per_row, 1)) // 8 * 8)
        tm = _pick_tile(Mp, min(tm, cap), 8)
    else:
        tn_eff = _pick_tile(Np, tn, 128)
        tm = _pick_tile(Mp, tm, 8)

    grid = (Mp // tm, Np // tn_eff, Kp // tk)

    x_spec = pl.BlockSpec((tm, tk), lambda i, j, k: (i, k))
    w_spec = pl.BlockSpec((tk, tn_eff), lambda i, j, k: (k, j))
    row_spec = pl.BlockSpec((1, tn_eff), lambda i, j, k: (0, j))
    out_spec = pl.BlockSpec((tm, tn_eff), lambda i, j, k: (i, j))

    common = dict(
        out_shape=jax.ShapeDtypeStruct((Mp, Np), jnp.float32 if fuse_ln else out_dtype),
        grid=grid,
        out_specs=out_spec,
        scratch_shapes=[pltpu.VMEM((tm, tn_eff), jnp.float32)],
        compiler_params=pltpu.CompilerParams(
            dimension_semantics=("parallel", "parallel", "arbitrary"),
            vmem_limit_bytes=VMEM_LIMIT),
    )

    b2 = bp.reshape(1, Np)
    if fuse_ln:
        out = pl.pallas_call(
            _linear_add_ln_kernel,
            in_specs=[x_spec, w_spec, row_spec, out_spec, row_spec, row_spec],
            **common,
        )(xp, wp, b2, resp, ln_g.reshape(1, Np), ln_b.reshape(1, Np))
    else:
        out = pl.pallas_call(
            functools.partial(_linear_kernel, activation=activation),
            in_specs=[x_spec, w_spec, row_spec],
            **common,
        )(xp, wp, b2)

    if (Mp, Np) != (M, N):
        out = out[:M, :N]
    return out


# ----------------------------------------------------------------------------
# Flash-style attention (tiled over query & key/value, online softmax)
# ----------------------------------------------------------------------------
def _flash_attn_kernel(*refs, nhead, has_mask):
    if has_mask:
        mask_ref, pad_ref, q_ref, k_ref, v_ref, o_ref, m_sc, l_sc, acc_sc = refs
    else:
        q_ref, k_ref, v_ref, o_ref, m_sc, l_sc, acc_sc = refs

    kv_step = pl.program_id(2)

    @pl.when(kv_step == 0)
    def _():
        m_sc[...] = jnp.full(m_sc.shape, NEG_INF, dtype=jnp.float32)
        l_sc[...] = jnp.zeros_like(l_sc)
        acc_sc[...] = jnp.zeros_like(acc_sc)

    E = q_ref.shape[2]
    Dh = E // nhead
    qt = q_ref[0]                      # (tq, E)  bf16; 1/sqrt(Dh) is folded into the q weights
    kt = k_ref[0]                      # (tkv, E) bf16
    vt = v_ref[0]                      # (tkv, E) bf16
    if has_mask:
        bias = mask_ref[...] + pad_ref[0]   # (tq,tkv) + (1,tkv) -> (tq,tkv), shared across heads

    for h in range(nhead):             # static unroll; per-head state lives in VMEM scratch
        sl = slice(h * Dh, (h + 1) * Dh)
        s = jax.lax.dot_general(qt[:, sl], kt[:, sl], (((1,), (1,)), ((), ())),
                                preferred_element_type=jnp.float32)
        if has_mask:
            s = s + bias
        m_prev = m_sc[h]                                          # (tq, 1)
        m_new = jnp.maximum(m_prev, jnp.max(s, axis=-1, keepdims=True))
        alpha = jnp.exp(m_prev - m_new)
        p = jnp.exp(s - m_new)
        l_sc[h] = alpha * l_sc[h] + jnp.sum(p, axis=-1, keepdims=True)
        acc_sc[:, sl] = alpha * acc_sc[:, sl] + jnp.dot(
            p.astype(MATMUL_DTYPE), vt[:, sl], preferred_element_type=jnp.float32)
        m_sc[h] = m_new

    @pl.when(kv_step == pl.num_programs(2) - 1)
    def _():
        parts = [acc_sc[:, h * Dh:(h + 1) * Dh] *
                 pl.reciprocal(l_sc[h], approx=True) for h in range(nhead)]
        o_ref[0] = jnp.concatenate(parts, axis=-1).astype(o_ref.dtype)   # lane-dense (tq, E)


def _flash_attention(q_arr, q_off, k_arr, k_off, v_arr, v_off, mask_bias, pad_bias,
                     nhead, E, out_dtype, tq=256, tkv=256):
    B, S = q_arr.shape[0], q_arr.shape[1]
    T = k_arr.shape[1]
    has_mask = mask_bias is not None

    tq = _pick_tile(S, tq, 8)
    tkv = _pick_tile(T, tkv, 128 if has_mask else 8)   # mask lane dim wants 128-multiples
    grid = (B, S // tq, T // tkv)

    in_specs = []
    args = []
    if has_mask:
        in_specs += [pl.BlockSpec((tq, tkv), lambda b, qi, ki: (qi, ki)),       # tgt_mask
                     pl.BlockSpec((1, 1, tkv), lambda b, qi, ki: (b, 0, ki))]   # key-padding bias
        args += [mask_bias, pad_bias]
    in_specs += [
        pl.BlockSpec((1, tq, E), lambda b, qi, ki: (b, qi, q_off)),
        pl.BlockSpec((1, tkv, E), lambda b, qi, ki: (b, ki, k_off)),
        pl.BlockSpec((1, tkv, E), lambda b, qi, ki: (b, ki, v_off)),
    ]
    args += [q_arr, k_arr, v_arr]

    return pl.pallas_call(
        functools.partial(_flash_attn_kernel, nhead=nhead, has_mask=has_mask),
        out_shape=jax.ShapeDtypeStruct((B, S, E), out_dtype),
        grid=grid,
        in_specs=in_specs,
        out_specs=pl.BlockSpec((1, tq, E), lambda b, qi, ki: (b, qi, 0)),
        scratch_shapes=[pltpu.VMEM((nhead, tq, 1), jnp.float32),   # running max  m
                        pltpu.VMEM((nhead, tq, 1), jnp.float32),   # running sum  l
                        pltpu.VMEM((tq, E), jnp.float32)],         # output accumulator
        compiler_params=pltpu.CompilerParams(
            dimension_semantics=("parallel", "parallel", "arbitrary"),
            vmem_limit_bytes=VMEM_LIMIT),
    )(*args)


def pallas_self_attention(qkv, mask_bias, pad_bias, nhead):
    B, S, E3 = qkv.shape
    E = E3 // 3
    if E % 128 == 0:
        # fused (B,S,3E) slab viewed three times with column-block offsets -> no HBM split copies
        q_arr, k_arr, v_arr = qkv, qkv, qkv
        offs = (0, 1, 2)
    else:
        q_arr, k_arr, v_arr = qkv[..., :E], qkv[..., E:2 * E], qkv[..., 2 * E:]
        offs = (0, 0, 0)
    return _flash_attention(q_arr, offs[0], k_arr, offs[1], v_arr, offs[2],
                            mask_bias, pad_bias, nhead, E, qkv.dtype)


def pallas_cross_attention(q, kv, nhead):
    B, S, E = q.shape
    if E % 128 == 0:
        k_arr, v_arr, k_off, v_off = kv, kv, 0, 1
    else:
        k_arr, v_arr, k_off, v_off = kv[..., :E], kv[..., E:], 0, 0
    return _flash_attention(q, 0, k_arr, k_off, v_arr, v_off, None, None, nhead, E, q.dtype)


# ----------------------------------------------------------------------------
# Pure-JAX references with matching numerics (bf16 intermediates, f32 accumulate)
# ----------------------------------------------------------------------------
def ref_linear(x, w, b, activation=None, residual=None, ln_g=None, ln_b=None,
               out_dtype=jnp.float32):
    y = jnp.dot(x.astype(MATMUL_DTYPE), w.astype(MATMUL_DTYPE),
                preferred_element_type=jnp.float32) + b[None, :]
    if activation == "relu":
        y = jnp.maximum(y, 0.0)
    if residual is not None:
        y = y + residual
        mu = y.mean(-1, keepdims=True)
        var = ((y - mu) ** 2).mean(-1, keepdims=True)
        return (y - mu) * jax.lax.rsqrt(var + LN_EPS) * ln_g[None, :] + ln_b[None, :]
    return y.astype(out_dtype)


def ref_self_attn(qkv, mask_bias, pad_bias, nhead):
    B, S, E3 = qkv.shape
    E = E3 // 3
    Dh = E // nhead
    q = qkv[..., :E].reshape(B, S, nhead, Dh)
    k = qkv[..., E:2 * E].reshape(B, S, nhead, Dh)
    v = qkv[..., 2 * E:].reshape(B, S, nhead, Dh)
    s = jnp.einsum("bqhd,bkhd->bhqk", q, k, preferred_element_type=jnp.float32)
    s = s + mask_bias[None, None] + pad_bias[:, :, None, :]
    p = jax.nn.softmax(s, axis=-1)
    o = jnp.einsum("bhqk,bkhd->bqhd", p.astype(MATMUL_DTYPE), v,
                   preferred_element_type=jnp.float32)
    return o.reshape(B, S, E).astype(qkv.dtype)


def ref_cross_attn(q, kv, nhead):
    B, S, E = q.shape
    T = kv.shape[1]
    Dh = E // nhead
    qh = q.reshape(B, S, nhead, Dh)
    kh = kv[..., :E].reshape(B, T, nhead, Dh)
    vh = kv[..., E:].reshape(B, T, nhead, Dh)
    s = jnp.einsum("bqhd,bkhd->bhqk", qh, kh, preferred_element_type=jnp.float32)
    p = jax.nn.softmax(s, axis=-1)
    o = jnp.einsum("bhqk,bkhd->bqhd", p.astype(MATMUL_DTYPE), vh,
                   preferred_element_type=jnp.float32)
    return o.reshape(B, S, E).astype(q.dtype)


PALLAS_OPS = dict(linear=pallas_linear, self_attn=pallas_self_attention,
                  cross_attn=pallas_cross_attention)
REF_OPS = dict(linear=ref_linear, self_attn=ref_self_attn, cross_attn=ref_cross_attn)


# ----------------------------------------------------------------------------
# Parameters (deterministic synthetic init — shapes follow the PyTorch module)
# sqrt(E) is folded into the embedding table; 1/sqrt(Dh) is folded into the q-projection
# weights/biases (mathematically identical to scaling the activations at runtime).
# ----------------------------------------------------------------------------
def make_pos_embedding(maxlen, emb):
    den = jnp.exp(-jnp.arange(0, emb, 2, dtype=jnp.float32) * math.log(10000.0) / emb)
    pos = jnp.arange(maxlen, dtype=jnp.float32).reshape(maxlen, 1)
    pe = jnp.zeros((maxlen, emb), jnp.float32)
    pe = pe.at[:, 0::2].set(jnp.sin(pos * den))
    pe = pe.at[:, 1::2].set(jnp.cos(pos * den))
    return pe


def init_params(key, vocab, emb, ff, num_layers, nhead):
    assert emb % nhead == 0
    q_scale = 1.0 / math.sqrt(emb // nhead)
    keys = jax.random.split(key, 2 + num_layers)

    def dense(k, shape):  # matmul weights stored in bf16 (halves HBM/VMEM traffic)
        return (jax.random.normal(k, shape, jnp.float32) * 0.02).astype(MATMUL_DTYPE)

    params = {
        "emb_table": jax.random.normal(keys[0], (vocab, emb), jnp.float32)
                     * 0.02 * math.sqrt(emb),                       # sqrt(E) folded in
        "gen_w": dense(keys[1], (emb, vocab)),
        "gen_b": jnp.zeros((vocab,), jnp.float32),
        "layers": [],
    }
    for l in range(num_layers):
        ks = jax.random.split(keys[2 + l], 7)
        sa_in_w = dense(ks[0], (emb, 3 * emb)).at[:, :emb].multiply(q_scale)  # q-scale folded
        sa_in_b = jnp.zeros((3 * emb,), jnp.float32).at[:emb].multiply(q_scale)
        ca_q_w = dense(ks[2], (emb, emb)) * q_scale
        ca_q_b = jnp.zeros((emb,), jnp.float32) * q_scale
        params["layers"].append(dict(
            sa_in_w=sa_in_w, sa_in_b=sa_in_b,
            sa_out_w=dense(ks[1], (emb, emb)),    sa_out_b=jnp.zeros((emb,), jnp.float32),
            ca_q_w=ca_q_w, ca_q_b=ca_q_b,
            ca_kv_w=dense(ks[3], (emb, 2 * emb)), ca_kv_b=jnp.zeros((2 * emb,), jnp.float32),
            ca_out_w=dense(ks[4], (emb, emb)),    ca_out_b=jnp.zeros((emb,), jnp.float32),
            ff1_w=dense(ks[5], (emb, ff)),        ff1_b=jnp.zeros((ff,), jnp.float32),
            ff2_w=dense(ks[6], (ff, emb)),        ff2_b=jnp.zeros((emb,), jnp.float32),
            ln1_g=jnp.ones((emb,), jnp.float32), ln1_b=jnp.zeros((emb,), jnp.float32),
            ln2_g=jnp.ones((emb,), jnp.float32), ln2_b=jnp.zeros((emb,), jnp.float32),
            ln3_g=jnp.ones((emb,), jnp.float32), ln3_b=jnp.zeros((emb,), jnp.float32),
        ))
    return params


# ----------------------------------------------------------------------------
# Full forward pass (op set is pluggable so Pallas / reference share structure)
# ----------------------------------------------------------------------------
def decoder_forward(trg, memory, params, pos_embedding, tgt_mask, tgt_key_padding_mask,
                    nhead, ops):
    B, S = trg.shape
    _, T, E = memory.shape
    V = params["gen_b"].shape[0]

    # --- TokenEmbedding * sqrt(E) + PositionalEncoding ---
    # sqrt(E) is folded into emb_table; the row gather + pos add is left to XLA (cheaper than a
    # dedicated kernel HBM round trip).
    # TODO(synk): dropout layers are eval-mode identities (no stochastic masking implemented).
    tok = jnp.take(params["emb_table"], trg.reshape(-1), axis=0).reshape(B, S, E)
    x = (tok + pos_embedding[:S][None]).astype(jnp.float32).reshape(B * S, E)

    # --- additive attention biases shared across heads (never tiled per-head in HBM) ---
    mask_bias = (tgt_mask.astype(jnp.float32) if tgt_mask is not None
                 else jnp.zeros((S, S), jnp.float32))
    if tgt_key_padding_mask is not None:
        pad_bias = jnp.where(tgt_key_padding_mask, NEG_INF, 0.0).astype(jnp.float32).reshape(B, 1, S)
    else:
        pad_bias = jnp.zeros((B, 1, S), jnp.float32)

    memf = memory.reshape(B * T, E)

    # --- num_decoder_layers x TransformerDecoderLayer (post-norm, relu, batch_first) ---
    for p in params["layers"]:
        # self-attention block (fused qkv projection; residual+LN fused into out-projection)
        qkv = ops["linear"](x, p["sa_in_w"], p["sa_in_b"], out_dtype=MATMUL_DTYPE)   # (B*S,3E) bf16
        ao = ops["self_attn"](qkv.reshape(B, S, 3 * E), mask_bias, pad_bias, nhead)
        x = ops["linear"](ao.reshape(B * S, E), p["sa_out_w"], p["sa_out_b"],
                          residual=x, ln_g=p["ln1_g"], ln_b=p["ln1_b"])

        # cross-attention block (queries from tgt, keys/values from memory)
        q2 = ops["linear"](x, p["ca_q_w"], p["ca_q_b"], out_dtype=MATMUL_DTYPE)
        kv2 = ops["linear"](memf, p["ca_kv_w"], p["ca_kv_b"], out_dtype=MATMUL_DTYPE)
        co = ops["cross_attn"](q2.reshape(B, S, E), kv2.reshape(B, T, 2 * E), nhead)
        x = ops["linear"](co.reshape(B * S, E), p["ca_out_w"], p["ca_out_b"],
                          residual=x, ln_g=p["ln2_g"], ln_b=p["ln2_b"])

        # feed-forward block (relu fused into ff1, residual+LN fused into ff2)
        h = ops["linear"](x, p["ff1_w"], p["ff1_b"], activation="relu", out_dtype=MATMUL_DTYPE)
        x = ops["linear"](h, p["ff2_w"], p["ff2_b"],
                          residual=x, ln_g=p["ln3_g"], ln_b=p["ln3_b"])

    # --- generator ---
    logits = ops["linear"](x, params["gen_w"], params["gen_b"])
    return logits.reshape(B, S, V)


# ----------------------------------------------------------------------------
# main
# ----------------------------------------------------------------------------
if __name__ == "__main__":
    # small, decoder-consistent shapes (S == tgt_max_len, required by the torch broadcast);
    # VOCAB intentionally not a multiple of 128 to exercise the padded generator path.
    B, S, T_MEM = 2, 8, 16
    EMB, NHEAD, FF, NLAYERS = 128, 4, 256, 2
    VOCAB = 250

    key = jax.random.PRNGKey(0)
    k_param, k_trg, k_mem = jax.random.split(key, 3)

    params = init_params(k_param, VOCAB, EMB, FF, NLAYERS, NHEAD)
    pos_embedding = make_pos_embedding(S, EMB)

    trg = jax.random.randint(k_trg, (B, S), 0, VOCAB, dtype=jnp.int32)
    memory = jax.random.normal(k_mem, (B, T_MEM, EMB), jnp.float32)

    # causal tgt_mask (additive) + a key-padding mask on the tail of batch element 1
    tgt_mask = jnp.where(jnp.triu(jnp.ones((S, S), bool), k=1), NEG_INF, 0.0).astype(jnp.float32)
    tgt_key_padding_mask = jnp.zeros((B, S), bool).at[1, S - 2:].set(True)

    pallas_fwd = jax.jit(functools.partial(decoder_forward, nhead=NHEAD, ops=PALLAS_OPS))
    ref_fwd = jax.jit(functools.partial(decoder_forward, nhead=NHEAD, ops=REF_OPS))

    out = jax.block_until_ready(
        pallas_fwd(trg, memory, params, pos_embedding, tgt_mask, tgt_key_padding_mask))
    ref = jax.block_until_ready(
        ref_fwd(trg, memory, params, pos_embedding, tgt_mask, tgt_key_padding_mask))

    assert out.shape == (B, S, VOCAB)
    assert bool(jnp.all(jnp.isfinite(out)))
    max_diff = float(jnp.max(jnp.abs(out - ref)))
    assert bool(jnp.allclose(out, ref, atol=2e-2, rtol=5e-2)), max_diff

    print("KERNEL_OK")
</pallas_src>

<mosaic_0001>
module attributes {stable_mosaic.version = 11 : i64} {
  func.func @_linear_kernel(%arg0: i32, %arg1: i32, %arg2: i32, %arg3: memref<16x128xf32, #tpu.memory_space<vmem>>, %arg4: memref<128x384xbf16, #tpu.memory_space<vmem>>, %arg5: memref<1x384xf32, #tpu.memory_space<vmem>>, %arg6: memref<16x384xbf16, #tpu.memory_space<vmem>>, %arg7: memref<16x384xf32, #tpu.memory_space<vmem>>) attributes {dimension_semantics = [#tpu.dimension_semantics<parallel>, #tpu.dimension_semantics<parallel>, #tpu.dimension_semantics<arbitrary>], iteration_bounds = array<i64: 1, 1, 1>, scalar_prefetch = 0 : i64, scratch_operands = 1 : i64, tpu.core_type = #tpu.core_type<tc>, window_params = [{transform_indices = @transform_0, window_bounds = array<i64: 16, 128>}, {transform_indices = @transform_1, window_bounds = array<i64: 128, 384>}, {transform_indices = @transform_2, window_bounds = array<i64: 1, 384>}, {transform_indices = @transform_3, window_bounds = array<i64: 16, 384>}]} {
    %c0_i32 = arith.constant 0 : i32
    %0 = arith.cmpi eq, %arg2, %c0_i32 : i32
    %1 = arith.extui %0 : i1 to i32
    %c0_i32_0 = arith.constant 0 : i32
    %2 = arith.cmpi ne, %1, %c0_i32_0 : i32
    scf.if %2 {
      %cst_10 = arith.constant 0.000000e+00 : f32
      %13 = vector.broadcast %cst_10 : f32 to vector<16x384xf32>
      %c0_11 = arith.constant 0 : index
      %c0_12 = arith.constant 0 : index
      %14 = vector.load %arg7[%c0_11, %c0_12] : memref<16x384xf32, #tpu.memory_space<vmem>>, vector<16x384xf32>
      tpu.vector_store %arg7[%c0_11, %c0_12], %13 {strides = array<i32>} : memref<16x384xf32, #tpu.memory_space<vmem>>, vector<16x384xf32>,
    } else {
    }
    %c0 = arith.constant 0 : index
    %c0_1 = arith.constant 0 : index
    %3 = vector.load %arg7[%c0, %c0_1] : memref<16x384xf32, #tpu.memory_space<vmem>>, vector<16x384xf32>
    %c0_2 = arith.constant 0 : index
    %c0_3 = arith.constant 0 : index
    %4 = vector.load %arg3[%c0_2, %c0_3] : memref<16x128xf32, #tpu.memory_space<vmem>>, vector<16x128xf32>
    %5 = arith.truncf %4 : vector<16x128xf32> to vector<16x128xbf16>
    %c0_4 = arith.constant 0 : index
    %c0_5 = arith.constant 0 : index
    %6 = vector.load %arg4[%c0_4, %c0_5] : memref<128x384xbf16, #tpu.memory_space<vmem>>, vector<128x384xbf16>
    %cst = arith.constant dense<0.000000e+00> : vector<16x384xf32>
    %7 = tpu.matmul %5, %6, %cst {dimension_numbers = #tpu.dot_dimension_numbers<[1], [0], [0], [1], [0, 0, 1, 1], [], []>} : vector<16x128xbf16>, vector<128x384xbf16>, vector<16x384xf32> -> vector<16x384xf32>
    %8 = arith.addf %3, %7 : vector<16x384xf32>
    %c0_6 = arith.constant 0 : index
    %c0_7 = arith.constant 0 : index
    %9 = vector.load %arg7[%c0_6, %c0_7] : memref<16x384xf32, #tpu.memory_space<vmem>>, vector<16x384xf32>
    tpu.vector_store %arg7[%c0_6, %c0_7], %8 {strides = array<i32>} : memref<16x384xf32, #tpu.memory_space<vmem>>, vector<16x384xf32>,
    %c0_i32_8 = arith.constant 0 : i32
    %10 = arith.cmpi eq, %arg2, %c0_i32_8 : i32
    %11 = arith.extui %10 : i1 to i32
    %c0_i32_9 = arith.constant 0 : i32
    %12 = arith.cmpi ne, %11, %c0_i32_9 : i32
    scf.if %12 {
      %c0_10 = arith.constant 0 : index
      %c0_11 = arith.constant 0 : index
      %13 = vector.load %arg7[%c0_10, %c0_11] : memref<16x384xf32, #tpu.memory_space<vmem>>, vector<16x384xf32>
      %c0_12 = arith.constant 0 : index
      %c0_13 = arith.constant 0 : index
      %14 = vector.load %arg5[%c0_12, %c0_13] : memref<1x384xf32, #tpu.memory_space<vmem>>, vector<1x384xf32>
      %15 = vector.broadcast %14 : vector<1x384xf32> to vector<16x384xf32>
      %16 = arith.addf %13, %15 : vector<16x384xf32>
      %17 = arith.truncf %16 : vector<16x384xf32> to vector<16x384xbf16>
      %c0_14 = arith.constant 0 : index
      %c0_15 = arith.constant 0 : index
      %18 = vector.load %arg6[%c0_14, %c0_15] : memref<16x384xbf16, #tpu.memory_space<vmem>>, vector<16x384xbf16>
      tpu.vector_store %arg6[%c0_14, %c0_15], %17 {strides = array<i32>} : memref<16x384xbf16, #tpu.memory_space<vmem>>, vector<16x384xbf16>,
    } else {
    }
    return
  }
  func.func @transform_0(%arg0: i32, %arg1: i32, %arg2: i32) -> (i32, i32) {
    %c0_i32 = arith.constant 0 : i32
    return %arg0, %arg2 : i32, i32
  }
  func.func @transform_1(%arg0: i32, %arg1: i32, %arg2: i32) -> (i32, i32) {
    %c0_i32 = arith.constant 0 : i32
    return %arg2, %arg1 : i32, i32
  }
  func.func @transform_2(%arg0: i32, %arg1: i32, %arg2: i32) -> (i32, i32) {
    %c0_i32 = arith.constant 0 : i32
    %c0_i32_0 = arith.constant 0 : i32
    return %c0_i32, %arg1 : i32, i32
  }
  func.func @transform_3(%arg0: i32, %arg1: i32, %arg2: i32) -> (i32, i32) {
    %c0_i32 = arith.constant 0 : i32
    return %arg0, %arg1 : i32, i32
  }
}

module attributes {stable_mosaic.version = 11 : i64} {
  func.func @_linear_add_ln_kernel(%arg0: i32, %arg1: i32, %arg2: i32, %arg3: memref<16x128xbf16, #tpu.memory_space<vmem>>, %arg4: memref<128x128xbf16, #tpu.memory_space<vmem>>, %arg5: memref<1x128xf32, #tpu.memory_space<vmem>>, %arg6: memref<16x128xf32, #tpu.memory_space<vmem>>, %arg7: memref<1x128xf32, #tpu.memory_space<vmem>>, %arg8: memref<1x128xf32, #tpu.memory_space<vmem>>, %arg9: memref<16x128xf32, #tpu.memory_space<vmem>>, %arg10: memref<16x128xf32, #tpu.memory_space<vmem>>) attributes {dimension_semantics = [#tpu.dimension_semantics<parallel>, #tpu.dimension_semantics<parallel>, #tpu.dimension_semantics<arbitrary>], iteration_bounds = array<i64: 1, 1, 1>, scalar_prefetch = 0 : i64, scratch_operands = 1 : i64, tpu.core_type = #tpu.core_type<tc>, window_params = [{transform_indices = @transform_0, window_bounds = array<i64: 16, 128>}, {transform_indices = @transform_1, window_bounds = array<i64: 128, 128>}, {transform_indices = @transform_2, window_bounds = array<i64: 1, 128>}, {transform_indices = @transform_3, window_bounds = array<i64: 16, 128>}, {transform_indices = @transform_4, window_bounds = array<i64: 1, 128>}, {transform_indices = @transform_5, window_bounds = array<i64: 1, 128>}, {transform_indices = @transform_6, window_bounds = array<i64: 16, 128>}]} {
    %c0_i32 = arith.constant 0 : i32
    %0 = arith.cmpi eq, %arg2, %c0_i32 : i32
    %1 = arith.extui %0 : i1 to i32
    %c0_i32_0 = arith.constant 0 : i32
    %2 = arith.cmpi ne, %1, %c0_i32_0 : i32
    scf.if %2 {
      %cst_10 = arith.constant 0.000000e+00 : f32
      %12 = vector.broadcast %cst_10 : f32 to vector<16x128xf32>
      %c0_11 = arith.constant 0 : index
      %c0_12 = arith.constant 0 : index
      %13 = vector.load %arg10[%c0_11, %c0_12] : memref<16x128xf32, #tpu.memory_space<vmem>>, vector<16x128xf32>
      tpu.vector_store %arg10[%c0_11, %c0_12], %12 {strides = array<i32>} : memref<16x128xf32, #tpu.memory_space<vmem>>, vector<16x128xf32>,
    } else {
    }
    %c0 = arith.constant 0 : index
    %c0_1 = arith.constant 0 : index
    %3 = vector.load %arg10[%c0, %c0_1] : memref<16x128xf32, #tpu.memory_space<vmem>>, vector<16x128xf32>
    %c0_2 = arith.constant 0 : index
    %c0_3 = arith.constant 0 : index
    %4 = vector.load %arg3[%c0_2, %c0_3] : memref<16x128xbf16, #tpu.memory_space<vmem>>, vector<16x128xbf16>
    %c0_4 = arith.constant 0 : index
    %c0_5 = arith.constant 0 : index
    %5 = vector.load %arg4[%c0_4, %c0_5] : memref<128x128xbf16, #tpu.memory_space<vmem>>, vector<128x128xbf16>
    %cst = arith.constant dense<0.000000e+00> : vector<16x128xf32>
    %6 = tpu.matmul %4, %5, %cst {dimension_numbers = #tpu.dot_dimension_numbers<[1], [0], [0], [1], [0, 0, 1, 1], [], []>} : vector<16x128xbf16>, vector<128x128xbf16>, vector<16x128xf32> -> vector<16x128xf32>
    %7 = arith.addf %3, %6 : vector<16x128xf32>
    %c0_6 = arith.constant 0 : index
    %c0_7 = arith.constant 0 : index
    %8 = vector.load %arg10[%c0_6, %c0_7] : memref<16x128xf32, #tpu.memory_space<vmem>>, vector<16x128xf32>
    tpu.vector_store %arg10[%c0_6, %c0_7], %7 {strides = array<i32>} : memref<16x128xf32, #tpu.memory_space<vmem>>, vector<16x128xf32>,
    %c0_i32_8 = arith.constant 0 : i32
    %9 = arith.cmpi eq, %arg2, %c0_i32_8 : i32
    %10 = arith.extui %9 : i1 to i32
    %c0_i32_9 = arith.constant 0 : i32
    %11 = arith.cmpi ne, %10, %c0_i32_9 : i32
    scf.if %11 {
      %c0_10 = arith.constant 0 : index
      %c0_11 = arith.constant 0 : index
      %12 = vector.load %arg10[%c0_10, %c0_11] : memref<16x128xf32, #tpu.memory_space<vmem>>, vector<16x128xf32>
      %c0_12 = arith.constant 0 : index
      %c0_13 = arith.constant 0 : index
      %13 = vector.load %arg5[%c0_12, %c0_13] : memref<1x128xf32, #tpu.memory_space<vmem>>, vector<1x128xf32>
      %14 = vector.broadcast %13 : vector<1x128xf32> to vector<16x128xf32>
      %15 = arith.addf %12, %14 : vector<16x128xf32>
      %c0_14 = arith.constant 0 : index
      %c0_15 = arith.constant 0 : index
      %16 = vector.load %arg6[%c0_14, %c0_15] : memref<16x128xf32, #tpu.memory_space<vmem>>, vector<16x128xf32>
      %17 = arith.addf %15, %16 : vector<16x128xf32>
      %cst_16 = arith.constant dense<0.000000e+00> : vector<16xf32>
      %18 = vector.multi_reduction <add>, %17, %cst_16 [1] : vector<16x128xf32> to vector<16xf32>
      %19 = vector.shape_cast %18 : vector<16xf32> to vector<16x1xf32>
      %cst_17 = arith.constant 1.280000e+02 : f32
      %20 = vector.broadcast %cst_17 : f32 to vector<16x1xf32>
      %21 = arith.divf %19, %20 : vector<16x1xf32>
      %22 = vector.broadcast %21 : vector<16x1xf32> to vector<16x128xf32>
      %23 = arith.subf %17, %22 : vector<16x128xf32>
      %24 = arith.mulf %23, %23 : vector<16x128xf32>
      %cst_18 = arith.constant dense<0.000000e+00> : vector<16xf32>
      %25 = vector.multi_reduction <add>, %24, %cst_18 [1] : vector<16x128xf32> to vector<16xf32>
      %26 = vector.shape_cast %25 : vector<16xf32> to vector<16x1xf32>
      %cst_19 = arith.constant 1.280000e+02 : f32
      %27 = vector.broadcast %cst_19 : f32 to vector<16x1xf32>
      %28 = arith.divf %26, %27 : vector<16x1xf32>
      %cst_20 = arith.constant 9.99999974E-6 : f32
      %29 = vector.broadcast %cst_20 : f32 to vector<16x1xf32>
      %30 = arith.addf %28, %29 : vector<16x1xf32>
      %31 = math.rsqrt %30 : vector<16x1xf32>
      %32 = vector.broadcast %31 : vector<16x1xf32> to vector<16x128xf32>
      %33 = arith.mulf %23, %32 : vector<16x128xf32>
      %c0_21 = arith.constant 0 : index
      %c0_22 = arith.constant 0 : index
      %34 = vector.load %arg7[%c0_21, %c0_22] : memref<1x128xf32, #tpu.memory_space<vmem>>, vector<1x128xf32>
      %35 = vector.broadcast %34 : vector<1x128xf32> to vector<16x128xf32>
      %36 = arith.mulf %33, %35 : vector<16x128xf32>
      %c0_23 = arith.constant 0 : index
      %c0_24 = arith.constant 0 : index
      %37 = vector.load %arg8[%c0_23, %c0_24] : memref<1x128xf32, #tpu.memory_space<vmem>>, vector<1x128xf32>
      %38 = vector.broadcast %37 : vector<1x128xf32> to vector<16x128xf32>
      %39 = arith.addf %36, %38 : vector<16x128xf32>
      %c0_25 = arith.constant 0 : index
      %c0_26 = arith.constant 0 : index
      %40 = vector.load %arg9[%c0_25, %c0_26] : memref<16x128xf32, #tpu.memory_space<vmem>>, vector<16x128xf32>
      tpu.vector_store %arg9[%c0_25, %c0_26], %39 {strides = array<i32>} : memref<16x128xf32, #tpu.memory_space<vmem>>, vector<16x128xf32>,
    } else {
    }
    return
  }
  func.func @transform_0(%arg0: i32, %arg1: i32, %arg2: i32) -> (i32, i32) {
    %c0_i32 = arith.constant 0 : i32
    return %arg0, %arg2 : i32, i32
  }
  func.func @transform_1(%arg0: i32, %arg1: i32, %arg2: i32) -> (i32, i32) {
    %c0_i32 = arith.constant 0 : i32
    return %arg2, %arg1 : i32, i32
  }
  func.func @transform_2(%arg0: i32, %arg1: i32, %arg2: i32) -> (i32, i32) {
    %c0_i32 = arith.constant 0 : i32
    %c0_i32_0 = arith.constant 0 : i32
    return %c0_i32, %arg1 : i32, i32
  }
  func.func @transform_3(%arg0: i32, %arg1: i32, %arg2: i32) -> (i32, i32) {
    %c0_i32 = arith.constant 0 : i32
    return %arg0, %arg1 : i32, i32
  }
  func.func @transform_4(%arg0: i32, %arg1: i32, %arg2: i32) -> (i32, i32) {
    %c0_i32 = arith.constant 0 : i32
    %c0_i32_0 = arith.constant 0 : i32
    return %c0_i32, %arg1 : i32, i32
  }
  func.func @transform_5(%arg0: i32, %arg1: i32, %arg2: i32) -> (i32, i32) {
    %c0_i32 = arith.constant 0 : i32
    %c0_i32_0 = arith.constant 0 : i32
    return %c0_i32, %arg1 : i32, i32
  }
  func.func @transform_6(%arg0: i32, %arg1: i32, %arg2: i32) -> (i32, i32) {
    %c0_i32 = arith.constant 0 : i32
    return %arg0, %arg1 : i32, i32
  }
}

module attributes {stable_mosaic.version = 11 : i64} {
  func.func @_flash_attn_kernel(%arg0: i32, %arg1: i32, %arg2: i32, %arg3: memref<8x8xf32, #tpu.memory_space<vmem>>, %arg4: memref<1x1x8xf32, #tpu.memory_space<vmem>>, %arg5: memref<1x8x128xbf16, #tpu.memory_space<vmem>>, %arg6: memref<1x8x128xbf16, #tpu.memory_space<vmem>>, %arg7: memref<1x8x128xbf16, #tpu.memory_space<vmem>>, %arg8: memref<1x8x128xbf16, #tpu.memory_space<vmem>>, %arg9: memref<4x8x1xf32, #tpu.memory_space<vmem>>, %arg10: memref<4x8x1xf32, #tpu.memory_space<vmem>>, %arg11: memref<8x128xf32, #tpu.memory_space<vmem>>) attributes {dimension_semantics = [#tpu.dimension_semantics<parallel>, #tpu.dimension_semantics<parallel>, #tpu.dimension_semantics<arbitrary>], iteration_bounds = array<i64: 2, 1, 1>, scalar_prefetch = 0 : i64, scratch_operands = 3 : i64, tpu.core_type = #tpu.core_type<tc>, window_params = [{transform_indices = @transform_0, window_bounds = array<i64: 8, 8>}, {transform_indices = @transform_1, window_bounds = array<i64: 1, 1, 8>}, {transform_indices = @transform_2, window_bounds = array<i64: 1, 8, 128>}, {transform_indices = @transform_3, window_bounds = array<i64: 1, 8, 128>}, {transform_indices = @transform_4, window_bounds = array<i64: 1, 8, 128>}, {transform_indices = @transform_5, window_bounds = array<i64: 1, 8, 128>}]} {
    %c0_i32 = arith.constant 0 : i32
    %0 = arith.cmpi eq, %arg2, %c0_i32 : i32
    %1 = arith.extui %0 : i1 to i32
    %c0_i32_0 = arith.constant 0 : i32
    %2 = arith.cmpi ne, %1, %c0_i32_0 : i32
    scf.if %2 {
      %cst_89 = arith.constant -1.000000e+30 : f32
      %153 = vector.broadcast %cst_89 : f32 to vector<4x8x1xf32>
      %c0_90 = arith.constant 0 : index
      %c0_91 = arith.constant 0 : index
      %c0_92 = arith.constant 0 : index
      %154 = vector.load %arg9[%c0_90, %c0_91, %c0_92] : memref<4x8x1xf32, #tpu.memory_space<vmem>>, vector<4x8x1xf32>
      tpu.vector_store %arg9[%c0_90, %c0_91, %c0_92], %153 {strides = array<i32>} : memref<4x8x1xf32, #tpu.memory_space<vmem>>, vector<4x8x1xf32>,
      %cst_93 = arith.constant 0.000000e+00 : f32
      %155 = vector.broadcast %cst_93 : f32 to vector<4x8x1xf32>
      %c0_94 = arith.constant 0 : index
      %c0_95 = arith.constant 0 : index
      %c0_96 = arith.constant 0 : index
      %156 = vector.load %arg10[%c0_94, %c0_95, %c0_96] : memref<4x8x1xf32, #tpu.memory_space<vmem>>, vector<4x8x1xf32>
      tpu.vector_store %arg10[%c0_94, %c0_95, %c0_96], %155 {strides = array<i32>} : memref<4x8x1xf32, #tpu.memory_space<vmem>>, vector<4x8x1xf32>,
      %cst_97 = arith.constant 0.000000e+00 : f32
      %157 = vector.broadcast %cst_97 : f32 to vector<8x128xf32>
      %c0_98 = arith.constant 0 : index
      %c0_99 = arith.constant 0 : index
      %158 = vector.load %arg11[%c0_98, %c0_99] : memref<8x128xf32, #tpu.memory_space<vmem>>, vector<8x128xf32>
      tpu.vector_store %arg11[%c0_98, %c0_99], %157 {strides = array<i32>} : memref<8x128xf32, #tpu.memory_space<vmem>>, vector<8x128xf32>,
    } else {
    }
    %c0 = arith.constant 0 : index
    %c0_1 = arith.constant 0 : index
    %c0_2 = arith.constant 0 : index
    %3 = vector.load %arg5[%c0, %c0_1, %c0_2] : memref<1x8x128xbf16, #tpu.memory_space<vmem>>, vector<1x8x128xbf16>
    %4 = vector.shape_cast %3 : vector<1x8x128xbf16> to vector<8x128xbf16>
    %c0_3 = arith.constant 0 : index
    %c0_4 = arith.constant 0 : index
    %c0_5 = arith.constant 0 : index
    %5 = vector.load %arg6[%c0_3, %c0_4, %c0_5] : memref<1x8x128xbf16, #tpu.memory_space<vmem>>, vector<1x8x128xbf16>
    %6 = vector.shape_cast %5 : vector<1x8x128xbf16> to vector<8x128xbf16>
    %c0_6 = arith.constant 0 : index
    %c0_7 = arith.constant 0 : index
    %c0_8 = arith.constant 0 : index
    %7 = vector.load %arg7[%c0_6, %c0_7, %c0_8] : memref<1x8x128xbf16, #tpu.memory_space<vmem>>, vector<1x8x128xbf16>
    %8 = vector.shape_cast %7 : vector<1x8x128xbf16> to vector<8x128xbf16>
    %c0_9 = arith.constant 0 : index
    %c0_10 = arith.constant 0 : index
    %9 = vector.load %arg3[%c0_9, %c0_10] : memref<8x8xf32, #tpu.memory_space<vmem>>, vector<8x8xf32>
    %c0_11 = arith.constant 0 : index
    %c0_12 = arith.constant 0 : index
    %c0_13 = arith.constant 0 : index
    %10 = vector.load %arg4[%c0_11, %c0_12, %c0_13] : memref<1x1x8xf32, #tpu.memory_space<vmem>>, vector<1x1x8xf32>
    %11 = vector.shape_cast %10 : vector<1x1x8xf32> to vector<1x8xf32>
    %12 = vector.broadcast %11 : vector<1x8xf32> to vector<8x8xf32>
    %13 = arith.addf %9, %12 : vector<8x8xf32>
    %14 = vector.extract_strided_slice %4 {offsets = [0, 0], sizes = [8, 32], strides = [1, 1]} : vector<8x128xbf16> to vector<8x32xbf16>
    %15 = vector.extract_strided_slice %6 {offsets = [0, 0], sizes = [8, 32], strides = [1, 1]} : vector<8x128xbf16> to vector<8x32xbf16>
    %cst = arith.constant dense<0.000000e+00> : vector<8x8xf32>
    %16 = tpu.matmul %14, %15, %cst {dimension_numbers = #tpu.dot_dimension_numbers<[1], [1], [0], [0], [0, 0, 1, 0], [], []>} : vector<8x32xbf16>, vector<8x32xbf16>, vector<8x8xf32> -> vector<8x8xf32>
    %17 = arith.addf %16, %13 : vector<8x8xf32>
    %c0_14 = arith.constant 0 : index
    %c0_15 = arith.constant 0 : index
    %c0_16 = arith.constant 0 : index
    %18 = vector.load %arg9[%c0_14, %c0_15, %c0_16] : memref<4x8x1xf32, #tpu.memory_space<vmem>>, vector<1x8x1xf32>
    %19 = vector.shape_cast %18 : vector<1x8x1xf32> to vector<8x1xf32>
    %cst_17 = arith.constant dense<0xFF800000> : vector<8xf32>
    %20 = vector.multi_reduction <maximumf>, %17, %cst_17 [1] : vector<8x8xf32> to vector<8xf32>
    %21 = vector.shape_cast %20 : vector<8xf32> to vector<8x1xf32>
    %22 = arith.maximumf %19, %21 : vector<8x1xf32>
    %23 = arith.subf %19, %22 : vector<8x1xf32>
    %24 = math.exp %23 : vector<8x1xf32>
    %25 = vector.broadcast %22 : vector<8x1xf32> to vector<8x8xf32>
    %26 = arith.subf %17, %25 : vector<8x8xf32>
    %27 = math.exp %26 : vector<8x8xf32>
    %c0_18 = arith.constant 0 : index
    %c0_19 = arith.constant 0 : index
    %c0_20 = arith.constant 0 : index
    %28 = vector.load %arg10[%c0_18, %c0_19, %c0_20] : memref<4x8x1xf32, #tpu.memory_space<vmem>>, vector<1x8x1xf32>
    %29 = vector.shape_cast %28 : vector<1x8x1xf32> to vector<8x1xf32>
    %30 = arith.mulf %24, %29 : vector<8x1xf32>
    %cst_21 = arith.constant dense<0.000000e+00> : vector<8xf32>
    %31 = vector.multi_reduction <add>, %27, %cst_21 [1] : vector<8x8xf32> to vector<8xf32>
    %32 = vector.shape_cast %31 : vector<8xf32> to vector<8x1xf32>
    %33 = arith.addf %30, %32 : vector<8x1xf32>
    %c0_22 = arith.constant 0 : index
    %c0_23 = arith.constant 0 : index
    %c0_24 = arith.constant 0 : index
    %34 = vector.load %arg10[%c0_22, %c0_23, %c0_24] : memref<4x8x1xf32, #tpu.memory_space<vmem>>, vector<1x8x1xf32>
    %35 = vector.shape_cast %34 : vector<1x8x1xf32> to vector<8x1xf32>
    %36 = vector.shape_cast %33 : vector<8x1xf32> to vector<1x8x1xf32>
    tpu.vector_store %arg10[%c0_22, %c0_23, %c0_24], %36 {strides = array<i32>} : memref<4x8x1xf32, #tpu.memory_space<vmem>>, vector<1x8x1xf32>,
    %c0_25 = arith.constant 0 : index
    %c0_26 = arith.constant 0 : index
    %37 = vector.load %arg11[%c0_25, %c0_26] : memref<8x128xf32, #tpu.memory_space<vmem>>, vector<8x32xf32>
    %38 = vector.broadcast %24 : vector<8x1xf32> to vector<8x32xf32>
    %39 = arith.mulf %38, %37 : vector<8x32xf32>
    %40 = arith.truncf %27 : vector<8x8xf32> to vector<8x8xbf16>
    %41 = vector.extract_strided_slice %8 {offsets = [0, 0], sizes = [8, 32], strides = [1, 1]} : vector<8x128xbf16> to vector<8x32xbf16>
    %cst_27 = arith.constant dense<0.000000e+00> : vector<8x32xf32>
    %42 = tpu.matmul %40, %41, %cst_27 {dimension_numbers = #tpu.dot_dimension_numbers<[1], [0], [0], [1], [0, 0, 1, 1], [], []>} : vector<8x8xbf16>, vector<8x32xbf16>, vector<8x32xf32> -> vector<8x32xf32>
    %43 = arith.addf %39, %42 : vector<8x32xf32>
    %c0_28 = arith.constant 0 : index
    %c0_29 = arith.constant 0 : index
    %44 = vector.load %arg11[%c0_28, %c0_29] : memref<8x128xf32, #tpu.memory_space<vmem>>, vector<8x32xf32>
    tpu.vector_store %arg11[%c0_28, %c0_29], %43 {strides = array<i32>} : memref<8x128xf32, #tpu.memory_space<vmem>>, vector<8x32xf32>,
    %c0_30 = arith.constant 0 : index
    %c0_31 = arith.constant 0 : index
    %c0_32 = arith.constant 0 : index
    %45 = vector.load %arg9[%c0_30, %c0_31, %c0_32] : memref<4x8x1xf32, #tpu.memory_space<vmem>>, vector<1x8x1xf32>
    %46 = vector.shape_cast %45 : vector<1x8x1xf32> to vector<8x1xf32>
    %47 = vector.shape_cast %22 : vector<8x1xf32> to vector<1x8x1xf32>
    tpu.vector_store %arg9[%c0_30, %c0_31, %c0_32], %47 {strides = array<i32>} : memref<4x8x1xf32, #tpu.memory_space<vmem>>, vector<1x8x1xf32>,
    %48 = vector.extract_strided_slice %4 {offsets = [0, 32], sizes = [8, 32], strides = [1, 1]} : vector<8x128xbf16> to vector<8x32xbf16>
    %49 = vector.extract_strided_slice %6 {offsets = [0, 32], sizes = [8, 32], strides = [1, 1]} : vector<8x128xbf16> to vector<8x32xbf16>
    %cst_33 = arith.constant dense<0.000000e+00> : vector<8x8xf32>
    %50 = tpu.matmul %48, %49, %cst_33 {dimension_numbers = #tpu.dot_dimension_numbers<[1], [1], [0], [0], [0, 0, 1, 0], [], []>} : vector<8x32xbf16>, vector<8x32xbf16>, vector<8x8xf32> -> vector<8x8xf32>
    %51 = arith.addf %50, %13 : vector<8x8xf32>
    %c1 = arith.constant 1 : index
    %c0_34 = arith.constant 0 : index
    %c0_35 = arith.constant 0 : index
    %52 = vector.load %arg9[%c1, %c0_34, %c0_35] : memref<4x8x1xf32, #tpu.memory_space<vmem>>, vector<1x8x1xf32>
    %53 = vector.shape_cast %52 : vector<1x8x1xf32> to vector<8x1xf32>
    %cst_36 = arith.constant dense<0xFF800000> : vector<8xf32>
    %54 = vector.multi_reduction <maximumf>, %51, %cst_36 [1] : vector<8x8xf32> to vector<8xf32>
    %55 = vector.shape_cast %54 : vector<8xf32> to vector<8x1xf32>
    %56 = arith.maximumf %53, %55 : vector<8x1xf32>
    %57 = arith.subf %53, %56 : vector<8x1xf32>
    %58 = math.exp %57 : vector<8x1xf32>
    %59 = vector.broadcast %56 : vector<8x1xf32> to vector<8x8xf32>
    %60 = arith.subf %51, %59 : vector<8x8xf32>
    %61 = math.exp %60 : vector<8x8xf32>
    %c1_37 = arith.constant 1 : index
    %c0_38 = arith.constant 0 : index
    %c0_39 = arith.constant 0 : index
    %62 = vector.load %arg10[%c1_37, %c0_38, %c0_39] : memref<4x8x1xf32, #tpu.memory_space<vmem>>, vector<1x8x1xf32>
    %63 = vector.shape_cast %62 : vector<1x8x1xf32> to vector<8x1xf32>
    %64 = arith.mulf %58, %63 : vector<8x1xf32>
    %cst_40 = arith.constant dense<0.000000e+00> : vector<8xf32>
    %65 = vector.multi_reduction <add>, %61, %cst_40 [1] : vector<8x8xf32> to vector<8xf32>
    %66 = vector.shape_cast %65 : vector<8xf32> to vector<8x1xf32>
    %67 = arith.addf %64, %66 : vector<8x1xf32>
    %c1_41 = arith.constant 1 : index
    %c0_42 = arith.constant 0 : index
    %c0_43 = arith.constant 0 : index
    %68 = vector.load %arg10[%c1_41, %c0_42, %c0_43] : memref<4x8x1xf32, #tpu.memory_space<vmem>>, vector<1x8x1xf32>
    %69 = vector.shape_cast %68 : vector<1x8x1xf32> to vector<8x1xf32>
    %70 = vector.shape_cast %67 : vector<8x1xf32> to vector<1x8x1xf32>
    tpu.vector_store %arg10[%c1_41, %c0_42, %c0_43], %70 {strides = array<i32>} : memref<4x8x1xf32, #tpu.memory_space<vmem>>, vector<1x8x1xf32>,
    %c0_44 = arith.constant 0 : index
    %c32 = arith.constant 32 : index
    %71 = vector.load %arg11[%c0_44, %c32] : memref<8x128xf32, #tpu.memory_space<vmem>>, vector<8x32xf32>
    %72 = vector.broadcast %58 : vector<8x1xf32> to vector<8x32xf32>
    %73 = arith.mulf %72, %71 : vector<8x32xf32>
    %74 = arith.truncf %61 : vector<8x8xf32> to vector<8x8xbf16>
    %75 = vector.extract_strided_slice %8 {offsets = [0, 32], sizes = [8, 32], strides = [1, 1]} : vector<8x128xbf16> to vector<8x32xbf16>
    %cst_45 = arith.constant dense<0.000000e+00> : vector<8x32xf32>
    %76 = tpu.matmul %74, %75, %cst_45 {dimension_numbers = #tpu.dot_dimension_numbers<[1], [0], [0], [1], [0, 0, 1, 1], [], []>} : vector<8x8xbf16>, vector<8x32xbf16>, vector<8x32xf32> -> vector<8x32xf32>
    %77 = arith.addf %73, %76 : vector<8x32xf32>
    %c0_46 = arith.constant 0 : index
    %c32_47 = arith.constant 32 : index
    %78 = vector.load %arg11[%c0_46, %c32_47] : memref<8x128xf32, #tpu.memory_space<vmem>>, vector<8x32xf32>
    tpu.vector_store %arg11[%c0_46, %c32_47], %77 {strides = array<i32>} : memref<8x128xf32, #tpu.memory_space<vmem>>, vector<8x32xf32>,
    %c1_48 = arith.constant 1 : index
    %c0_49 = arith.constant 0 : index
    %c0_50 = arith.constant 0 : index
    %79 = vector.load %arg9[%c1_48, %c0_49, %c0_50] : memref<4x8x1xf32, #tpu.memory_space<vmem>>, vector<1x8x1xf32>
    %80 = vector.shape_cast %79 : vector<1x8x1xf32> to vector<8x1xf32>
    %81 = vector.shape_cast %56 : vector<8x1xf32> to vector<1x8x1xf32>
    tpu.vector_store %arg9[%c1_48, %c0_49, %c0_50], %81 {strides = array<i32>} : memref<4x8x1xf32, #tpu.memory_space<vmem>>, vector<1x8x1xf32>,
    %82 = vector.extract_strided_slice %4 {offsets = [0, 64], sizes = [8, 32], strides = [1, 1]} : vector<8x128xbf16> to vector<8x32xbf16>
    %83 = vector.extract_strided_slice %6 {offsets = [0, 64], sizes = [8, 32], strides = [1, 1]} : vector<8x128xbf16> to vector<8x32xbf16>
    %cst_51 = arith.constant dense<0.000000e+00> : vector<8x8xf32>
    %84 = tpu.matmul %82, %83, %cst_51 {dimension_numbers = #tpu.dot_dimension_numbers<[1], [1], [0], [0], [0, 0, 1, 0], [], []>} : vector<8x32xbf16>, vector<8x32xbf16>, vector<8x8xf32> -> vector<8x8xf32>
    %85 = arith.addf %84, %13 : vector<8x8xf32>
    %c2 = arith.constant 2 : index
    %c0_52 = arith.constant 0 : index
    %c0_53 = arith.constant 0 : index
    %86 = vector.load %arg9[%c2, %c0_52, %c0_53] : memref<4x8x1xf32, #tpu.memory_space<vmem>>, vector<1x8x1xf32>
    %87 = vector.shape_cast %86 : vector<1x8x1xf32> to vector<8x1xf32>
    %cst_54 = arith.constant dense<0xFF800000> : vector<8xf32>
    %88 = vector.multi_reduction <maximumf>, %85, %cst_54 [1] : vector<8x8xf32> to vector<8xf32>
    %89 = vector.shape_cast %88 : vector<8xf32> to vector<8x1xf32>
    %90 = arith.maximumf %87, %89 : vector<8x1xf32>
    %91 = arith.subf %87, %90 : vector<8x1xf32>
    %92 = math.exp %91 : vector<8x1xf32>
    %93 = vector.broadcast %90 : vector<8x1xf32> to vector<8x8xf32>
    %94 = arith.subf %85, %93 : vector<8x8xf32>
    %95 = math.exp %94 : vector<8x8xf32>
    %c2_55 = arith.constant 2 : index
    %c0_56 = arith.constant 0 : index
    %c0_57 = arith.constant 0 : index
    %96 = vector.load %arg10[%c2_55, %c0_56, %c0_57] : memref<4x8x1xf32, #tpu.memory_space<vmem>>, vector<1x8x1xf32>
    %97 = vector.shape_cast %96 : vector<1x8x1xf32> to vector<8x1xf32>
    %98 = arith.mulf %92, %97 : vector<8x1xf32>
    %cst_58 = arith.constant dense<0.000000e+00> : vector<8xf32>
    %99 = vector.multi_reduction <add>, %95, %cst_58 [1] : vector<8x8xf32> to vector<8xf32>
    %100 = vector.shape_cast %99 : vector<8xf32> to vector<8x1xf32>
    %101 = arith.addf %98, %100 : vector<8x1xf32>
    %c2_59 = arith.constant 2 : index
    %c0_60 = arith.constant 0 : index
    %c0_61 = arith.constant 0 : index
    %102 = vector.load %arg10[%c2_59, %c0_60, %c0_61] : memref<4x8x1xf32, #tpu.memory_space<vmem>>, vector<1x8x1xf32>
    %103 = vector.shape_cast %102 : vector<1x8x1xf32> to vector<8x1xf32>
    %104 = vector.shape_cast %101 : vector<8x1xf32> to vector<1x8x1xf32>
    tpu.vector_store %arg10[%c2_59, %c0_60, %c0_61], %104 {strides = array<i32>} : memref<4x8x1xf32, #tpu.memory_space<vmem>>, vector<1x8x1xf32>,
    %c0_62 = arith.constant 0 : index
    %c64 = arith.constant 64 : index
    %105 = vector.load %arg11[%c0_62, %c64] : memref<8x128xf32, #tpu.memory_space<vmem>>, vector<8x32xf32>
    %106 = vector.broadcast %92 : vector<8x1xf32> to vector<8x32xf32>
    %107 = arith.mulf %106, %105 : vector<8x32xf32>
    %108 = arith.truncf %95 : vector<8x8xf32> to vector<8x8xbf16>
    %109 = vector.extract_strided_slice %8 {offsets = [0, 64], sizes = [8, 32], strides = [1, 1]} : vector<8x128xbf16> to vector<8x32xbf16>
    %cst_63 = arith.constant dense<0.000000e+00> : vector<8x32xf32>
    %110 = tpu.matmul %108, %109, %cst_63 {dimension_numbers = #tpu.dot_dimension_numbers<[1], [0], [0], [1], [0, 0, 1, 1], [], []>} : vector<8x8xbf16>, vector<8x32xbf16>, vector<8x32xf32> -> vector<8x32xf32>
    %111 = arith.addf %107, %110 : vector<8x32xf32>
    %c0_64 = arith.constant 0 : index
    %c64_65 = arith.constant 64 : index
    %112 = vector.load %arg11[%c0_64, %c64_65] : memref<8x128xf32, #tpu.memory_space<vmem>>, vector<8x32xf32>
    tpu.vector_store %arg11[%c0_64, %c64_65], %111 {strides = array<i32>} : memref<8x128xf32, #tpu.memory_space<vmem>>, vector<8x32xf32>,
    %c2_66 = arith.constant 2 : index
    %c0_67 = arith.constant 0 : index
    %c0_68 = arith.constant 0 : index
    %113 = vector.load %arg9[%c2_66, %c0_67, %c0_68] : memref<4x8x1xf32, #tpu.memory_space<vmem>>, vector<1x8x1xf32>
    %114 = vector.shape_cast %113 : vector<1x8x1xf32> to vector<8x1xf32>
    %115 = vector.shape_cast %90 : vector<8x1xf32> to vector<1x8x1xf32>
    tpu.vector_store %arg9[%c2_66, %c0_67, %c0_68], %115 {strides = array<i32>} : memref<4x8x1xf32, #tpu.memory_space<vmem>>, vector<1x8x1xf32>,
    %116 = vector.extract_strided_slice %4 {offsets = [0, 96], sizes = [8, 32], strides = [1, 1]} : vector<8x128xbf16> to vector<8x32xbf16>
    %117 = vector.extract_strided_slice %6 {offsets = [0, 96], sizes = [8, 32], strides = [1, 1]} : vector<8x128xbf16> to vector<8x32xbf16>
    %cst_69 = arith.constant dense<0.000000e+00> : vector<8x8xf32>
    %118 = tpu.matmul %116, %117, %cst_69 {dimension_numbers = #tpu.dot_dimension_numbers<[1], [1], [0], [0], [0, 0, 1, 0], [], []>} : vector<8x32xbf16>, vector<8x32xbf16>, vector<8x8xf32> -> vector<8x8xf32>
    %119 = arith.addf %118, %13 : vector<8x8xf32>
    %c3 = arith.constant 3 : index
    %c0_70 = arith.constant 0 : index
    %c0_71 = arith.constant 0 : index
    %120 = vector.load %arg9[%c3, %c0_70, %c0_71] : memref<4x8x1xf32, #tpu.memory_space<vmem>>, vector<1x8x1xf32>
    %121 = vector.shape_cast %120 : vector<1x8x1xf32> to vector<8x1xf32>
    %cst_72 = arith.constant dense<0xFF800000> : vector<8xf32>
    %122 = vector.multi_reduction <maximumf>, %119, %cst_72 [1] : vector<8x8xf32> to vector<8xf32>
    %123 = vector.shape_cast %122 : vector<8xf32> to vector<8x1xf32>
    %124 = arith.maximumf %121, %123 : vector<8x1xf32>
    %125 = arith.subf %121, %124 : vector<8x1xf32>
    %126 = math.exp %125 : vector<8x1xf32>
    %127 = vector.broadcast %124 : vector<8x1xf32> to vector<8x8xf32>
    %128 = arith.subf %119, %127 : vector<8x8xf32>
    %129 = math.exp %128 : vector<8x8xf32>
    %c3_73 = arith.constant 3 : index
    %c0_74 = arith.constant 0 : index
    %c0_75 = arith.constant 0 : index
    %130 = vector.load %arg10[%c3_73, %c0_74, %c0_75] : memref<4x8x1xf32, #tpu.memory_space<vmem>>, vector<1x8x1xf32>
    %131 = vector.shape_cast %130 : vector<1x8x1xf32> to vector<8x1xf32>
    %132 = arith.mulf %126, %131 : vector<8x1xf32>
    %cst_76 = arith.constant dense<0.000000e+00> : vector<8xf32>
    %133 = vector.multi_reduction <add>, %129, %cst_76 [1] : vector<8x8xf32> to vector<8xf32>
    %134 = vector.shape_cast %133 : vector<8xf32> to vector<8x1xf32>
    %135 = arith.addf %132, %134 : vector<8x1xf32>
    %c3_77 = arith.constant 3 : index
    %c0_78 = arith.constant 0 : index
    %c0_79 = arith.constant 0 : index
    %136 = vector.load %arg10[%c3_77, %c0_78, %c0_79] : memref<4x8x1xf32, #tpu.memory_space<vmem>>, vector<1x8x1xf32>
    %137 = vector.shape_cast %136 : vector<1x8x1xf32> to vector<8x1xf32>
    %138 = vector.shape_cast %135 : vector<8x1xf32> to vector<1x8x1xf32>
    tpu.vector_store %arg10[%c3_77, %c0_78, %c0_79], %138 {strides = array<i32>} : memref<4x8x1xf32, #tpu.memory_space<vmem>>, vector<1x8x1xf32>,
    %c0_80 = arith.constant 0 : index
    %c96 = arith.constant 96 : index
    %139 = vector.load %arg11[%c0_80, %c96] : memref<8x128xf32, #tpu.memory_space<vmem>>, vector<8x32xf32>
    %140 = vector.broadcast %126 : vector<8x1xf32> to vector<8x32xf32>
    %141 = arith.mulf %140, %139 : vector<8x32xf32>
    %142 = arith.truncf %129 : vector<8x8xf32> to vector<8x8xbf16>
    %143 = vector.extract_strided_slice %8 {offsets = [0, 96], sizes = [8, 32], strides = [1, 1]} : vector<8x128xbf16> to vector<8x32xbf16>
    %cst_81 = arith.constant dense<0.000000e+00> : vector<8x32xf32>
    %144 = tpu.matmul %142, %143, %cst_81 {dimension_numbers = #tpu.dot_dimension_numbers<[1], [0], [0], [1], [0, 0, 1, 1], [], []>} : vector<8x8xbf16>, vector<8x32xbf16>, vector<8x32xf32> -> vector<8x32xf32>
    %145 = arith.addf %141, %144 : vector<8x32xf32>
    %c0_82 = arith.constant 0 : index
    %c96_83 = arith.constant 96 : index
    %146 = vector.load %arg11[%c0_82, %c96_83] : memref<8x128xf32, #tpu.memory_space<vmem>>, vector<8x32xf32>
    tpu.vector_store %arg11[%c0_82, %c96_83], %145 {strides = array<i32>} : memref<8x128xf32, #tpu.memory_space<vmem>>, vector<8x32xf32>,
    %c3_84 = arith.constant 3 : index
    %c0_85 = arith.constant 0 : index
    %c0_86 = arith.constant 0 : index
    %147 = vector.load %arg9[%c3_84, %c0_85, %c0_86] : memref<4x8x1xf32, #tpu.memory_space<vmem>>, vector<1x8x1xf32>
    %148 = vector.shape_cast %147 : vector<1x8x1xf32> to vector<8x1xf32>
    %149 = vector.shape_cast %124 : vector<8x1xf32> to vector<1x8x1xf32>
    tpu.vector_store %arg9[%c3_84, %c0_85, %c0_86], %149 {strides = array<i32>} : memref<4x8x1xf32, #tpu.memory_space<vmem>>, vector<1x8x1xf32>,
    %c0_i32_87 = arith.constant 0 : i32
    %150 = arith.cmpi eq, %arg2, %c0_i32_87 : i32
    %151 = arith.extui %150 : i1 to i32
    %c0_i32_88 = arith.constant 0 : i32
    %152 = arith.cmpi ne, %151, %c0_i32_88 : i32
    scf.if %152 {
      %c0_89 = arith.constant 0 : index
      %c0_90 = arith.constant 0 : index
      %153 = vector.load %arg11[%c0_89, %c0_90] : memref<8x128xf32, #tpu.memory_space<vmem>>, vector<8x32xf32>
      %c0_91 = arith.constant 0 : index
      %c0_92 = arith.constant 0 : index
      %c0_93 = arith.constant 0 : index
      %154 = vector.load %arg10[%c0_91, %c0_92, %c0_93] : memref<4x8x1xf32, #tpu.memory_space<vmem>>, vector<1x8x1xf32>
      %155 = vector.shape_cast %154 : vector<1x8x1xf32> to vector<8x1xf32>
      %156 = tpu.reciprocal %155 {approx = true} : vector<8x1xf32> -> vector<8x1xf32>
      %157 = vector.broadcast %156 : vector<8x1xf32> to vector<8x32xf32>
      %158 = arith.mulf %153, %157 : vector<8x32xf32>
      %c0_94 = arith.constant 0 : index
      %c32_95 = arith.constant 32 : index
      %159 = vector.load %arg11[%c0_94, %c32_95] : memref<8x128xf32, #tpu.memory_space<vmem>>, vector<8x32xf32>
      %c1_96 = arith.constant 1 : index
      %c0_97 = arith.constant 0 : index
      %c0_98 = arith.constant 0 : index
      %160 = vector.load %arg10[%c1_96, %c0_97, %c0_98] : memref<4x8x1xf32, #tpu.memory_space<vmem>>, vector<1x8x1xf32>
      %161 = vector.shape_cast %160 : vector<1x8x1xf32> to vector<8x1xf32>
      %162 = tpu.reciprocal %161 {approx = true} : vector<8x1xf32> -> vector<8x1xf32>
      %163 = vector.broadcast %162 : vector<8x1xf32> to vector<8x32xf32>
      %164 = arith.mulf %159, %163 : vector<8x32xf32>
      %c0_99 = arith.constant 0 : index
      %c64_100 = arith.constant 64 : index
      %165 = vector.load %arg11[%c0_99, %c64_100] : memref<8x128xf32, #tpu.memory_space<vmem>>, vector<8x32xf32>
      %c2_101 = arith.constant 2 : index
      %c0_102 = arith.constant 0 : index
      %c0_103 = arith.constant 0 : index
      %166 = vector.load %arg10[%c2_101, %c0_102, %c0_103] : memref<4x8x1xf32, #tpu.memory_space<vmem>>, vector<1x8x1xf32>
      %167 = vector.shape_cast %166 : vector<1x8x1xf32> to vector<8x1xf32>
      %168 = tpu.reciprocal %167 {approx = true} : vector<8x1xf32> -> vector<8x1xf32>
      %169 = vector.broadcast %168 : vector<8x1xf32> to vector<8x32xf32>
      %170 = arith.mulf %165, %169 : vector<8x32xf32>
      %c0_104 = arith.constant 0 : index
      %c96_105 = arith.constant 96 : index
      %171 = vector.load %arg11[%c0_104, %c96_105] : memref<8x128xf32, #tpu.memory_space<vmem>>, vector<8x32xf32>
      %c3_106 = arith.constant 3 : index
      %c0_107 = arith.constant 0 : index
      %c0_108 = arith.constant 0 : index
      %172 = vector.load %arg10[%c3_106, %c0_107, %c0_108] : memref<4x8x1xf32, #tpu.memory_space<vmem>>, vector<1x8x1xf32>
      %173 = vector.shape_cast %172 : vector<1x8x1xf32> to vector<8x1xf32>
      %174 = tpu.reciprocal %173 {approx = true} : vector<8x1xf32> -> vector<8x1xf32>
      %175 = vector.broadcast %174 : vector<8x1xf32> to vector<8x32xf32>
      %176 = arith.mulf %171, %175 : vector<8x32xf32>
      %177 = tpu.concatenate %158, %164, %170, %176 in 1 : vector<8x32xf32>, vector<8x32xf32>, vector<8x32xf32>, vector<8x32xf32> -> vector<8x128xf32>
      %178 = arith.truncf %177 : vector<8x128xf32> to vector<8x128xbf16>
      %c0_109 = arith.constant 0 : index
      %c0_110 = arith.constant 0 : index
      %c0_111 = arith.constant 0 : index
      %179 = vector.load %arg8[%c0_109, %c0_110, %c0_111] : memref<1x8x128xbf16, #tpu.memory_space<vmem>>, vector<1x8x128xbf16>
      %180 = vector.shape_cast %179 : vector<1x8x128xbf16> to vector<8x128xbf16>
      %181 = vector.shape_cast %178 : vector<8x128xbf16> to vector<1x8x128xbf16>
      tpu.vector_store %arg8[%c0_109, %c0_110, %c0_111], %181 {strides = array<i32>} : memref<1x8x128xbf16, #tpu.memory_space<vmem>>, vector<1x8x128xbf16>,
    } else {
    }
    return
  }
  func.func @transform_0(%arg0: i32, %arg1: i32, %arg2: i32) -> (i32, i32) {
    %c0_i32 = arith.constant 0 : i32
    return %arg1, %arg2 : i32, i32
  }
  func.func @transform_1(%arg0: i32, %arg1: i32, %arg2: i32) -> (i32, i32, i32) {
    %c0_i32 = arith.constant 0 : i32
    %c0_i32_0 = arith.constant 0 : i32
    return %arg0, %c0_i32, %arg2 : i32, i32, i32
  }
  func.func @transform_2(%arg0: i32, %arg1: i32, %arg2: i32) -> (i32, i32, i32) {
    %c0_i32 = arith.constant 0 : i32
    %c0_i32_0 = arith.constant 0 : i32
    return %arg0, %arg1, %c0_i32 : i32, i32, i32
  }
  func.func @transform_3(%arg0: i32, %arg1: i32, %arg2: i32) -> (i32, i32, i32) {
    %c1_i32 = arith.constant 1 : i32
    %c0_i32 = arith.constant 0 : i32
    return %arg0, %arg2, %c1_i32 : i32, i32, i32
  }
  func.func @transform_4(%arg0: i32, %arg1: i32, %arg2: i32) -> (i32, i32, i32) {
    %c2_i32 = arith.constant 2 : i32
    %c0_i32 = arith.constant 0 : i32
    return %arg0, %arg2, %c2_i32 : i32, i32, i32
  }
  func.func @transform_5(%arg0: i32, %arg1: i32, %arg2: i32) -> (i32, i32, i32) {
    %c0_i32 = arith.constant 0 : i32
    %c0_i32_0 = arith.constant 0 : i32
    return %arg0, %arg1, %c0_i32 : i32, i32, i32
  }
}

module attributes {stable_mosaic.version = 11 : i64} {
  func.func @_linear_kernel(%arg0: i32, %arg1: i32, %arg2: i32, %arg3: memref<16x128xf32, #tpu.memory_space<vmem>>, %arg4: memref<128x128xbf16, #tpu.memory_space<vmem>>, %arg5: memref<1x128xf32, #tpu.memory_space<vmem>>, %arg6: memref<16x128xbf16, #tpu.memory_space<vmem>>, %arg7: memref<16x128xf32, #tpu.memory_space<vmem>>) attributes {dimension_semantics = [#tpu.dimension_semantics<parallel>, #tpu.dimension_semantics<parallel>, #tpu.dimension_semantics<arbitrary>], iteration_bounds = array<i64: 1, 1, 1>, scalar_prefetch = 0 : i64, scratch_operands = 1 : i64, tpu.core_type = #tpu.core_type<tc>, window_params = [{transform_indices = @transform_0, window_bounds = array<i64: 16, 128>}, {transform_indices = @transform_1, window_bounds = array<i64: 128, 128>}, {transform_indices = @transform_2, window_bounds = array<i64: 1, 128>}, {transform_indices = @transform_3, window_bounds = array<i64: 16, 128>}]} {
    %c0_i32 = arith.constant 0 : i32
    %0 = arith.cmpi eq, %arg2, %c0_i32 : i32
    %1 = arith.extui %0 : i1 to i32
    %c0_i32_0 = arith.constant 0 : i32
    %2 = arith.cmpi ne, %1, %c0_i32_0 : i32
    scf.if %2 {
      %cst_10 = arith.constant 0.000000e+00 : f32
      %13 = vector.broadcast %cst_10 : f32 to vector<16x128xf32>
      %c0_11 = arith.constant 0 : index
      %c0_12 = arith.constant 0 : index
      %14 = vector.load %arg7[%c0_11, %c0_12] : memref<16x128xf32, #tpu.memory_space<vmem>>, vector<16x128xf32>
      tpu.vector_store %arg7[%c0_11, %c0_12], %13 {strides = array<i32>} : memref<16x128xf32, #tpu.memory_space<vmem>>, vector<16x128xf32>,
    } else {
    }
    %c0 = arith.constant 0 : index
    %c0_1 = arith.constant 0 : index
    %3 = vector.load %arg7[%c0, %c0_1] : memref<16x128xf32, #tpu.memory_space<vmem>>, vector<16x128xf32>
    %c0_2 = arith.constant 0 : index
    %c0_3 = arith.constant 0 : index
    %4 = vector.load %arg3[%c0_2, %c0_3] : memref<16x128xf32, #tpu.memory_space<vmem>>, vector<16x128xf32>
    %5 = arith.truncf %4 : vector<16x128xf32> to vector<16x128xbf16>
    %c0_4 = arith.constant 0 : index
    %c0_5 = arith.constant 0 : index
    %6 = vector.load %arg4[%c0_4, %c0_5] : memref<128x128xbf16, #tpu.memory_space<vmem>>, vector<128x128xbf16>
    %cst = arith.constant dense<0.000000e+00> : vector<16x128xf32>
    %7 = tpu.matmul %5, %6, %cst {dimension_numbers = #tpu.dot_dimension_numbers<[1], [0], [0], [1], [0, 0, 1, 1], [], []>} : vector<16x128xbf16>, vector<128x128xbf16>, vector<16x128xf32> -> vector<16x128xf32>
    %8 = arith.addf %3, %7 : vector<16x128xf32>
    %c0_6 = arith.constant 0 : index
    %c0_7 = arith.constant 0 : index
    %9 = vector.load %arg7[%c0_6, %c0_7] : memref<16x128xf32, #tpu.memory_space<vmem>>, vector<16x128xf32>
    tpu.vector_store %arg7[%c0_6, %c0_7], %8 {strides = array<i32>} : memref<16x128xf32, #tpu.memory_space<vmem>>, vector<16x128xf32>,
    %c0_i32_8 = arith.constant 0 : i32
    %10 = arith.cmpi eq, %arg2, %c0_i32_8 : i32
    %11 = arith.extui %10 : i1 to i32
    %c0_i32_9 = arith.constant 0 : i32
    %12 = arith.cmpi ne, %11, %c0_i32_9 : i32
    scf.if %12 {
      %c0_10 = arith.constant 0 : index
      %c0_11 = arith.constant 0 : index
      %13 = vector.load %arg7[%c0_10, %c0_11] : memref<16x128xf32, #tpu.memory_space<vmem>>, vector<16x128xf32>
      %c0_12 = arith.constant 0 : index
      %c0_13 = arith.constant 0 : index
      %14 = vector.load %arg5[%c0_12, %c0_13] : memref<1x128xf32, #tpu.memory_space<vmem>>, vector<1x128xf32>
      %15 = vector.broadcast %14 : vector<1x128xf32> to vector<16x128xf32>
      %16 = arith.addf %13, %15 : vector<16x128xf32>
      %17 = arith.truncf %16 : vector<16x128xf32> to vector<16x128xbf16>
      %c0_14 = arith.constant 0 : index
      %c0_15 = arith.constant 0 : index
      %18 = vector.load %arg6[%c0_14, %c0_15] : memref<16x128xbf16, #tpu.memory_space<vmem>>, vector<16x128xbf16>
      tpu.vector_store %arg6[%c0_14, %c0_15], %17 {strides = array<i32>} : memref<16x128xbf16, #tpu.memory_space<vmem>>, vector<16x128xbf16>,
    } else {
    }
    return
  }
  func.func @transform_0(%arg0: i32, %arg1: i32, %arg2: i32) -> (i32, i32) {
    %c0_i32 = arith.constant 0 : i32
    return %arg0, %arg2 : i32, i32
  }
  func.func @transform_1(%arg0: i32, %arg1: i32, %arg2: i32) -> (i32, i32) {
    %c0_i32 = arith.constant 0 : i32
    return %arg2, %arg1 : i32, i32
  }
  func.func @transform_2(%arg0: i32, %arg1: i32, %arg2: i32) -> (i32, i32) {
    %c0_i32 = arith.constant 0 : i32
    %c0_i32_0 = arith.constant 0 : i32
    return %c0_i32, %arg1 : i32, i32
  }
  func.func @transform_3(%arg0: i32, %arg1: i32, %arg2: i32) -> (i32, i32) {
    %c0_i32 = arith.constant 0 : i32
    return %arg0, %arg1 : i32, i32
  }
}

module attributes {stable_mosaic.version = 11 : i64} {
  func.func @_linear_add_ln_kernel(%arg0: i32, %arg1: i32, %arg2: i32, %arg3: memref<16x128xbf16, #tpu.memory_space<vmem>>, %arg4: memref<128x128xbf16, #tpu.memory_space<vmem>>, %arg5: memref<1x128xf32, #tpu.memory_space<vmem>>, %arg6: memref<16x128xf32, #tpu.memory_space<vmem>>, %arg7: memref<1x128xf32, #tpu.memory_space<vmem>>, %arg8: memref<1x128xf32, #tpu.memory_space<vmem>>, %arg9: memref<16x128xf32, #tpu.memory_space<vmem>>, %arg10: memref<16x128xf32, #tpu.memory_space<vmem>>) attributes {dimension_semantics = [#tpu.dimension_semantics<parallel>, #tpu.dimension_semantics<parallel>, #tpu.dimension_semantics<arbitrary>], iteration_bounds = array<i64: 1, 1, 1>, scalar_prefetch = 0 : i64, scratch_operands = 1 : i64, tpu.core_type = #tpu.core_type<tc>, window_params = [{transform_indices = @transform_0, window_bounds = array<i64: 16, 128>}, {transform_indices = @transform_1, window_bounds = array<i64: 128, 128>}, {transform_indices = @transform_2, window_bounds = array<i64: 1, 128>}, {transform_indices = @transform_3, window_bounds = array<i64: 16, 128>}, {transform_indices = @transform_4, window_bounds = array<i64: 1, 128>}, {transform_indices = @transform_5, window_bounds = array<i64: 1, 128>}, {transform_indices = @transform_6, window_bounds = array<i64: 16, 128>}]} {
    %c0_i32 = arith.constant 0 : i32
    %0 = arith.cmpi eq, %arg2, %c0_i32 : i32
    %1 = arith.extui %0 : i1 to i32
    %c0_i32_0 = arith.constant 0 : i32
    %2 = arith.cmpi ne, %1, %c0_i32_0 : i32
    scf.if %2 {
      %cst_10 = arith.constant 0.000000e+00 : f32
      %12 = vector.broadcast %cst_10 : f32 to vector<16x128xf32>
      %c0_11 = arith.constant 0 : index
      %c0_12 = arith.constant 0 : index
      %13 = vector.load %arg10[%c0_11, %c0_12] : memref<16x128xf32, #tpu.memory_space<vmem>>, vector<16x128xf32>
      tpu.vector_store %arg10[%c0_11, %c0_12], %12 {strides = array<i32>} : memref<16x128xf32, #tpu.memory_space<vmem>>, vector<16x128xf32>,
    } else {
    }
    %c0 = arith.constant 0 : index
    %c0_1 = arith.constant 0 : index
    %3 = vector.load %arg10[%c0, %c0_1] : memref<16x128xf32, #tpu.memory_space<vmem>>, vector<16x128xf32>
    %c0_2 = arith.constant 0 : index
    %c0_3 = arith.constant 0 : index
    %4 = vector.load %arg3[%c0_2, %c0_3] : memref<16x128xbf16, #tpu.memory_space<vmem>>, vector<16x128xbf16>
    %c0_4 = arith.constant 0 : index
    %c0_5 = arith.constant 0 : index
    %5 = vector.load %arg4[%c0_4, %c0_5] : memref<128x128xbf16, #tpu.memory_space<vmem>>, vector<128x128xbf16>
    %cst = arith.constant dense<0.000000e+00> : vector<16x128xf32>
    %6 = tpu.matmul %4, %5, %cst {dimension_numbers = #tpu.dot_dimension_numbers<[1], [0], [0], [1], [0, 0, 1, 1], [], []>} : vector<16x128xbf16>, vector<128x128xbf16>, vector<16x128xf32> -> vector<16x128xf32>
    %7 = arith.addf %3, %6 : vector<16x128xf32>
    %c0_6 = arith.constant 0 : index
    %c0_7 = arith.constant 0 : index
    %8 = vector.load %arg10[%c0_6, %c0_7] : memref<16x128xf32, #tpu.memory_space<vmem>>, vector<16x128xf32>
    tpu.vector_store %arg10[%c0_6, %c0_7], %7 {strides = array<i32>} : memref<16x128xf32, #tpu.memory_space<vmem>>, vector<16x128xf32>,
    %c0_i32_8 = arith.constant 0 : i32
    %9 = arith.cmpi eq, %arg2, %c0_i32_8 : i32
    %10 = arith.extui %9 : i1 to i32
    %c0_i32_9 = arith.constant 0 : i32
    %11 = arith.cmpi ne, %10, %c0_i32_9 : i32
    scf.if %11 {
      %c0_10 = arith.constant 0 : index
      %c0_11 = arith.constant 0 : index
      %12 = vector.load %arg10[%c0_10, %c0_11] : memref<16x128xf32, #tpu.memory_space<vmem>>, vector<16x128xf32>
      %c0_12 = arith.constant 0 : index
      %c0_13 = arith.constant 0 : index
      %13 = vector.load %arg5[%c0_12, %c0_13] : memref<1x128xf32, #tpu.memory_space<vmem>>, vector<1x128xf32>
      %14 = vector.broadcast %13 : vector<1x128xf32> to vector<16x128xf32>
      %15 = arith.addf %12, %14 : vector<16x128xf32>
      %c0_14 = arith.constant 0 : index
      %c0_15 = arith.constant 0 : index
      %16 = vector.load %arg6[%c0_14, %c0_15] : memref<16x128xf32, #tpu.memory_space<vmem>>, vector<16x128xf32>
      %17 = arith.addf %15, %16 : vector<16x128xf32>
      %cst_16 = arith.constant dense<0.000000e+00> : vector<16xf32>
      %18 = vector.multi_reduction <add>, %17, %cst_16 [1] : vector<16x128xf32> to vector<16xf32>
      %19 = vector.shape_cast %18 : vector<16xf32> to vector<16x1xf32>
      %cst_17 = arith.constant 1.280000e+02 : f32
      %20 = vector.broadcast %cst_17 : f32 to vector<16x1xf32>
      %21 = arith.divf %19, %20 : vector<16x1xf32>
      %22 = vector.broadcast %21 : vector<16x1xf32> to vector<16x128xf32>
      %23 = arith.subf %17, %22 : vector<16x128xf32>
      %24 = arith.mulf %23, %23 : vector<16x128xf32>
      %cst_18 = arith.constant dense<0.000000e+00> : vector<16xf32>
      %25 = vector.multi_reduction <add>, %24, %cst_18 [1] : vector<16x128xf32> to vector<16xf32>
      %26 = vector.shape_cast %25 : vector<16xf32> to vector<16x1xf32>
      %cst_19 = arith.constant 1.280000e+02 : f32
      %27 = vector.broadcast %cst_19 : f32 to vector<16x1xf32>
      %28 = arith.divf %26, %27 : vector<16x1xf32>
      %cst_20 = arith.constant 9.99999974E-6 : f32
      %29 = vector.broadcast %cst_20 : f32 to vector<16x1xf32>
      %30 = arith.addf %28, %29 : vector<16x1xf32>
      %31 = math.rsqrt %30 : vector<16x1xf32>
      %32 = vector.broadcast %31 : vector<16x1xf32> to vector<16x128xf32>
      %33 = arith.mulf %23, %32 : vector<16x128xf32>
      %c0_21 = arith.constant 0 : index
      %c0_22 = arith.constant 0 : index
      %34 = vector.load %arg7[%c0_21, %c0_22] : memref<1x128xf32, #tpu.memory_space<vmem>>, vector<1x128xf32>
      %35 = vector.broadcast %34 : vector<1x128xf32> to vector<16x128xf32>
      %36 = arith.mulf %33, %35 : vector<16x128xf32>
      %c0_23 = arith.constant 0 : index
      %c0_24 = arith.constant 0 : index
      %37 = vector.load %arg8[%c0_23, %c0_24] : memref<1x128xf32, #tpu.memory_space<vmem>>, vector<1x128xf32>
      %38 = vector.broadcast %37 : vector<1x128xf32> to vector<16x128xf32>
      %39 = arith.addf %36, %38 : vector<16x128xf32>
      %c0_25 = arith.constant 0 : index
      %c0_26 = arith.constant 0 : index
      %40 = vector.load %arg9[%c0_25, %c0_26] : memref<16x128xf32, #tpu.memory_space<vmem>>, vector<16x128xf32>
      tpu.vector_store %arg9[%c0_25, %c0_26], %39 {strides = array<i32>} : memref<16x128xf32, #tpu.memory_space<vmem>>, vector<16x128xf32>,
    } else {
    }
    return
  }
  func.func @transform_0(%arg0: i32, %arg1: i32, %arg2: i32) -> (i32, i32) {
    %c0_i32 = arith.constant 0 : i32
    return %arg0, %arg2 : i32, i32
  }
  func.func @transform_1(%arg0: i32, %arg1: i32, %arg2: i32) -> (i32, i32) {
    %c0_i32 = arith.constant 0 : i32
    return %arg2, %arg1 : i32, i32
  }
  func.func @transform_2(%arg0: i32, %arg1: i32, %arg2: i32) -> (i32, i32) {
    %c0_i32 = arith.constant 0 : i32
    %c0_i32_0 = arith.constant 0 : i32
    return %c0_i32, %arg1 : i32, i32
  }
  func.func @transform_3(%arg0: i32, %arg1: i32, %arg2: i32) -> (i32, i32) {
    %c0_i32 = arith.constant 0 : i32
    return %arg0, %arg1 : i32, i32
  }
  func.func @transform_4(%arg0: i32, %arg1: i32, %arg2: i32) -> (i32, i32) {
    %c0_i32 = arith.constant 0 : i32
    %c0_i32_0 = arith.constant 0 : i32
    return %c0_i32, %arg1 : i32, i32
  }
  func.func @transform_5(%arg0: i32, %arg1: i32, %arg2: i32) -> (i32, i32) {
    %c0_i32 = arith.constant 0 : i32
    %c0_i32_0 = arith.constant 0 : i32
    return %c0_i32, %arg1 : i32, i32
  }
  func.func @transform_6(%arg0: i32, %arg1: i32, %arg2: i32) -> (i32, i32) {
    %c0_i32 = arith.constant 0 : i32
    return %arg0, %arg1 : i32, i32
  }
}

module attributes {stable_mosaic.version = 11 : i64} {
  func.func @_linear_kernel(%arg0: i32, %arg1: i32, %arg2: i32, %arg3: memref<32x128xf32, #tpu.memory_space<vmem>>, %arg4: memref<128x256xbf16, #tpu.memory_space<vmem>>, %arg5: memref<1x256xf32, #tpu.memory_space<vmem>>, %arg6: memref<32x256xbf16, #tpu.memory_space<vmem>>, %arg7: memref<32x256xf32, #tpu.memory_space<vmem>>) attributes {dimension_semantics = [#tpu.dimension_semantics<parallel>, #tpu.dimension_semantics<parallel>, #tpu.dimension_semantics<arbitrary>], iteration_bounds = array<i64: 1, 1, 1>, scalar_prefetch = 0 : i64, scratch_operands = 1 : i64, tpu.core_type = #tpu.core_type<tc>, window_params = [{transform_indices = @transform_0, window_bounds = array<i64: 32, 128>}, {transform_indices = @transform_1, window_bounds = array<i64: 128, 256>}, {transform_indices = @transform_2, window_bounds = array<i64: 1, 256>}, {transform_indices = @transform_3, window_bounds = array<i64: 32, 256>}]} {
    %c0_i32 = arith.constant 0 : i32
    %0 = arith.cmpi eq, %arg2, %c0_i32 : i32
    %1 = arith.extui %0 : i1 to i32
    %c0_i32_0 = arith.constant 0 : i32
    %2 = arith.cmpi ne, %1, %c0_i32_0 : i32
    scf.if %2 {
      %cst_10 = arith.constant 0.000000e+00 : f32
      %13 = vector.broadcast %cst_10 : f32 to vector<32x256xf32>
      %c0_11 = arith.constant 0 : index
      %c0_12 = arith.constant 0 : index
      %14 = vector.load %arg7[%c0_11, %c0_12] : memref<32x256xf32, #tpu.memory_space<vmem>>, vector<32x256xf32>
      tpu.vector_store %arg7[%c0_11, %c0_12], %13 {strides = array<i32>} : memref<32x256xf32, #tpu.memory_space<vmem>>, vector<32x256xf32>,
    } else {
    }
    %c0 = arith.constant 0 : index
    %c0_1 = arith.constant 0 : index
    %3 = vector.load %arg7[%c0, %c0_1] : memref<32x256xf32, #tpu.memory_space<vmem>>, vector<32x256xf32>
    %c0_2 = arith.constant 0 : index
    %c0_3 = arith.constant 0 : index
    %4 = vector.load %arg3[%c0_2, %c0_3] : memref<32x128xf32, #tpu.memory_space<vmem>>, vector<32x128xf32>
    %5 = arith.truncf %4 : vector<32x128xf32> to vector<32x128xbf16>
    %c0_4 = arith.constant 0 : index
    %c0_5 = arith.constant 0 : index
    %6 = vector.load %arg4[%c0_4, %c0_5] : memref<128x256xbf16, #tpu.memory_space<vmem>>, vector<128x256xbf16>
    %cst = arith.constant dense<0.000000e+00> : vector<32x256xf32>
    %7 = tpu.matmul %5, %6, %cst {dimension_numbers = #tpu.dot_dimension_numbers<[1], [0], [0], [1], [0, 0, 1, 1], [], []>} : vector<32x128xbf16>, vector<128x256xbf16>, vector<32x256xf32> -> vector<32x256xf32>
    %8 = arith.addf %3, %7 : vector<32x256xf32>
    %c0_6 = arith.constant 0 : index
    %c0_7 = arith.constant 0 : index
    %9 = vector.load %arg7[%c0_6, %c0_7] : memref<32x256xf32, #tpu.memory_space<vmem>>, vector<32x256xf32>
    tpu.vector_store %arg7[%c0_6, %c0_7], %8 {strides = array<i32>} : memref<32x256xf32, #tpu.memory_space<vmem>>, vector<32x256xf32>,
    %c0_i32_8 = arith.constant 0 : i32
    %10 = arith.cmpi eq, %arg2, %c0_i32_8 : i32
    %11 = arith.extui %10 : i1 to i32
    %c0_i32_9 = arith.constant 0 : i32
    %12 = arith.cmpi ne, %11, %c0_i32_9 : i32
    scf.if %12 {
      %c0_10 = arith.constant 0 : index
      %c0_11 = arith.constant 0 : index
      %13 = vector.load %arg7[%c0_10, %c0_11] : memref<32x256xf32, #tpu.memory_space<vmem>>, vector<32x256xf32>
      %c0_12 = arith.constant 0 : index
      %c0_13 = arith.constant 0 : index
      %14 = vector.load %arg5[%c0_12, %c0_13] : memref<1x256xf32, #tpu.memory_space<vmem>>, vector<1x256xf32>
      %15 = vector.broadcast %14 : vector<1x256xf32> to vector<32x256xf32>
      %16 = arith.addf %13, %15 : vector<32x256xf32>
      %17 = arith.truncf %16 : vector<32x256xf32> to vector<32x256xbf16>
      %c0_14 = arith.constant 0 : index
      %c0_15 = arith.constant 0 : index
      %18 = vector.load %arg6[%c0_14, %c0_15] : memref<32x256xbf16, #tpu.memory_space<vmem>>, vector<32x256xbf16>
      tpu.vector_store %arg6[%c0_14, %c0_15], %17 {strides = array<i32>} : memref<32x256xbf16, #tpu.memory_space<vmem>>, vector<32x256xbf16>,
    } else {
    }
    return
  }
  func.func @transform_0(%arg0: i32, %arg1: i32, %arg2: i32) -> (i32, i32) {
    %c0_i32 = arith.constant 0 : i32
    return %arg0, %arg2 : i32, i32
  }
  func.func @transform_1(%arg0: i32, %arg1: i32, %arg2: i32) -> (i32, i32) {
    %c0_i32 = arith.constant 0 : i32
    return %arg2, %arg1 : i32, i32
  }
  func.func @transform_2(%arg0: i32, %arg1: i32, %arg2: i32) -> (i32, i32) {
    %c0_i32 = arith.constant 0 : i32
    %c0_i32_0 = arith.constant 0 : i32
    return %c0_i32, %arg1 : i32, i32
  }
  func.func @transform_3(%arg0: i32, %arg1: i32, %arg2: i32) -> (i32, i32) {
    %c0_i32 = arith.constant 0 : i32
    return %arg0, %arg1 : i32, i32
  }
}

module attributes {stable_mosaic.version = 11 : i64} {
  func.func @_flash_attn_kernel(%arg0: i32, %arg1: i32, %arg2: i32, %arg3: memref<1x8x128xbf16, #tpu.memory_space<vmem>>, %arg4: memref<1x16x128xbf16, #tpu.memory_space<vmem>>, %arg5: memref<1x16x128xbf16, #tpu.memory_space<vmem>>, %arg6: memref<1x8x128xbf16, #tpu.memory_space<vmem>>, %arg7: memref<4x8x1xf32, #tpu.memory_space<vmem>>, %arg8: memref<4x8x1xf32, #tpu.memory_space<vmem>>, %arg9: memref<8x128xf32, #tpu.memory_space<vmem>>) attributes {dimension_semantics = [#tpu.dimension_semantics<parallel>, #tpu.dimension_semantics<parallel>, #tpu.dimension_semantics<arbitrary>], iteration_bounds = array<i64: 2, 1, 1>, scalar_prefetch = 0 : i64, scratch_operands = 3 : i64, tpu.core_type = #tpu.core_type<tc>, window_params = [{transform_indices = @transform_0, window_bounds = array<i64: 1, 8, 128>}, {transform_indices = @transform_1, window_bounds = array<i64: 1, 16, 128>}, {transform_indices = @transform_2, window_bounds = array<i64: 1, 16, 128>}, {transform_indices = @transform_3, window_bounds = array<i64: 1, 8, 128>}]} {
    %c0_i32 = arith.constant 0 : i32
    %0 = arith.cmpi eq, %arg2, %c0_i32 : i32
    %1 = arith.extui %0 : i1 to i32
    %c0_i32_0 = arith.constant 0 : i32
    %2 = arith.cmpi ne, %1, %c0_i32_0 : i32
    scf.if %2 {
      %cst_84 = arith.constant -1.000000e+30 : f32
      %144 = vector.broadcast %cst_84 : f32 to vector<4x8x1xf32>
      %c0_85 = arith.constant 0 : index
      %c0_86 = arith.constant 0 : index
      %c0_87 = arith.constant 0 : index
      %145 = vector.load %arg7[%c0_85, %c0_86, %c0_87] : memref<4x8x1xf32, #tpu.memory_space<vmem>>, vector<4x8x1xf32>
      tpu.vector_store %arg7[%c0_85, %c0_86, %c0_87], %144 {strides = array<i32>} : memref<4x8x1xf32, #tpu.memory_space<vmem>>, vector<4x8x1xf32>,
      %cst_88 = arith.constant 0.000000e+00 : f32
      %146 = vector.broadcast %cst_88 : f32 to vector<4x8x1xf32>
      %c0_89 = arith.constant 0 : index
      %c0_90 = arith.constant 0 : index
      %c0_91 = arith.constant 0 : index
      %147 = vector.load %arg8[%c0_89, %c0_90, %c0_91] : memref<4x8x1xf32, #tpu.memory_space<vmem>>, vector<4x8x1xf32>
      tpu.vector_store %arg8[%c0_89, %c0_90, %c0_91], %146 {strides = array<i32>} : memref<4x8x1xf32, #tpu.memory_space<vmem>>, vector<4x8x1xf32>,
      %cst_92 = arith.constant 0.000000e+00 : f32
      %148 = vector.broadcast %cst_92 : f32 to vector<8x128xf32>
      %c0_93 = arith.constant 0 : index
      %c0_94 = arith.constant 0 : index
      %149 = vector.load %arg9[%c0_93, %c0_94] : memref<8x128xf32, #tpu.memory_space<vmem>>, vector<8x128xf32>
      tpu.vector_store %arg9[%c0_93, %c0_94], %148 {strides = array<i32>} : memref<8x128xf32, #tpu.memory_space<vmem>>, vector<8x128xf32>,
    } else {
    }
    %c0 = arith.constant 0 : index
    %c0_1 = arith.constant 0 : index
    %c0_2 = arith.constant 0 : index
    %3 = vector.load %arg3[%c0, %c0_1, %c0_2] : memref<1x8x128xbf16, #tpu.memory_space<vmem>>, vector<1x8x128xbf16>
    %4 = vector.shape_cast %3 : vector<1x8x128xbf16> to vector<8x128xbf16>
    %c0_3 = arith.constant 0 : index
    %c0_4 = arith.constant 0 : index
    %c0_5 = arith.constant 0 : index
    %5 = vector.load %arg4[%c0_3, %c0_4, %c0_5] : memref<1x16x128xbf16, #tpu.memory_space<vmem>>, vector<1x16x128xbf16>
    %6 = vector.shape_cast %5 : vector<1x16x128xbf16> to vector<16x128xbf16>
    %c0_6 = arith.constant 0 : index
    %c0_7 = arith.constant 0 : index
    %c0_8 = arith.constant 0 : index
    %7 = vector.load %arg5[%c0_6, %c0_7, %c0_8] : memref<1x16x128xbf16, #tpu.memory_space<vmem>>, vector<1x16x128xbf16>
    %8 = vector.shape_cast %7 : vector<1x16x128xbf16> to vector<16x128xbf16>
    %9 = vector.extract_strided_slice %4 {offsets = [0, 0], sizes = [8, 32], strides = [1, 1]} : vector<8x128xbf16> to vector<8x32xbf16>
    %10 = vector.extract_strided_slice %6 {offsets = [0, 0], sizes = [16, 32], strides = [1, 1]} : vector<16x128xbf16> to vector<16x32xbf16>
    %cst = arith.constant dense<0.000000e+00> : vector<8x16xf32>
    %11 = tpu.matmul %9, %10, %cst {dimension_numbers = #tpu.dot_dimension_numbers<[1], [1], [0], [0], [0, 0, 1, 0], [], []>} : vector<8x32xbf16>, vector<16x32xbf16>, vector<8x16xf32> -> vector<8x16xf32>
    %c0_9 = arith.constant 0 : index
    %c0_10 = arith.constant 0 : index
    %c0_11 = arith.constant 0 : index
    %12 = vector.load %arg7[%c0_9, %c0_10, %c0_11] : memref<4x8x1xf32, #tpu.memory_space<vmem>>, vector<1x8x1xf32>
    %13 = vector.shape_cast %12 : vector<1x8x1xf32> to vector<8x1xf32>
    %cst_12 = arith.constant dense<0xFF800000> : vector<8xf32>
    %14 = vector.multi_reduction <maximumf>, %11, %cst_12 [1] : vector<8x16xf32> to vector<8xf32>
    %15 = vector.shape_cast %14 : vector<8xf32> to vector<8x1xf32>
    %16 = arith.maximumf %13, %15 : vector<8x1xf32>
    %17 = arith.subf %13, %16 : vector<8x1xf32>
    %18 = math.exp %17 : vector<8x1xf32>
    %19 = vector.broadcast %16 : vector<8x1xf32> to vector<8x16xf32>
    %20 = arith.subf %11, %19 : vector<8x16xf32>
    %21 = math.exp %20 : vector<8x16xf32>
    %c0_13 = arith.constant 0 : index
    %c0_14 = arith.constant 0 : index
    %c0_15 = arith.constant 0 : index
    %22 = vector.load %arg8[%c0_13, %c0_14, %c0_15] : memref<4x8x1xf32, #tpu.memory_space<vmem>>, vector<1x8x1xf32>
    %23 = vector.shape_cast %22 : vector<1x8x1xf32> to vector<8x1xf32>
    %24 = arith.mulf %18, %23 : vector<8x1xf32>
    %cst_16 = arith.constant dense<0.000000e+00> : vector<8xf32>
    %25 = vector.multi_reduction <add>, %21, %cst_16 [1] : vector<8x16xf32> to vector<8xf32>
    %26 = vector.shape_cast %25 : vector<8xf32> to vector<8x1xf32>
    %27 = arith.addf %24, %26 : vector<8x1xf32>
    %c0_17 = arith.constant 0 : index
    %c0_18 = arith.constant 0 : index
    %c0_19 = arith.constant 0 : index
    %28 = vector.load %arg8[%c0_17, %c0_18, %c0_19] : memref<4x8x1xf32, #tpu.memory_space<vmem>>, vector<1x8x1xf32>
    %29 = vector.shape_cast %28 : vector<1x8x1xf32> to vector<8x1xf32>
    %30 = vector.shape_cast %27 : vector<8x1xf32> to vector<1x8x1xf32>
    tpu.vector_store %arg8[%c0_17, %c0_18, %c0_19], %30 {strides = array<i32>} : memref<4x8x1xf32, #tpu.memory_space<vmem>>, vector<1x8x1xf32>,
    %c0_20 = arith.constant 0 : index
    %c0_21 = arith.constant 0 : index
    %31 = vector.load %arg9[%c0_20, %c0_21] : memref<8x128xf32, #tpu.memory_space<vmem>>, vector<8x32xf32>
    %32 = vector.broadcast %18 : vector<8x1xf32> to vector<8x32xf32>
    %33 = arith.mulf %32, %31 : vector<8x32xf32>
    %34 = arith.truncf %21 : vector<8x16xf32> to vector<8x16xbf16>
    %35 = vector.extract_strided_slice %8 {offsets = [0, 0], sizes = [16, 32], strides = [1, 1]} : vector<16x128xbf16> to vector<16x32xbf16>
    %cst_22 = arith.constant dense<0.000000e+00> : vector<8x32xf32>
    %36 = tpu.matmul %34, %35, %cst_22 {dimension_numbers = #tpu.dot_dimension_numbers<[1], [0], [0], [1], [0, 0, 1, 1], [], []>} : vector<8x16xbf16>, vector<16x32xbf16>, vector<8x32xf32> -> vector<8x32xf32>
    %37 = arith.addf %33, %36 : vector<8x32xf32>
    %c0_23 = arith.constant 0 : index
    %c0_24 = arith.constant 0 : index
    %38 = vector.load %arg9[%c0_23, %c0_24] : memref<8x128xf32, #tpu.memory_space<vmem>>, vector<8x32xf32>
    tpu.vector_store %arg9[%c0_23, %c0_24], %37 {strides = array<i32>} : memref<8x128xf32, #tpu.memory_space<vmem>>, vector<8x32xf32>,
    %c0_25 = arith.constant 0 : index
    %c0_26 = arith.constant 0 : index
    %c0_27 = arith.constant 0 : index
    %39 = vector.load %arg7[%c0_25, %c0_26, %c0_27] : memref<4x8x1xf32, #tpu.memory_space<vmem>>, vector<1x8x1xf32>
    %40 = vector.shape_cast %39 : vector<1x8x1xf32> to vector<8x1xf32>
    %41 = vector.shape_cast %16 : vector<8x1xf32> to vector<1x8x1xf32>
    tpu.vector_store %arg7[%c0_25, %c0_26, %c0_27], %41 {strides = array<i32>} : memref<4x8x1xf32, #tpu.memory_space<vmem>>, vector<1x8x1xf32>,
    %42 = vector.extract_strided_slice %4 {offsets = [0, 32], sizes = [8, 32], strides = [1, 1]} : vector<8x128xbf16> to vector<8x32xbf16>
    %43 = vector.extract_strided_slice %6 {offsets = [0, 32], sizes = [16, 32], strides = [1, 1]} : vector<16x128xbf16> to vector<16x32xbf16>
    %cst_28 = arith.constant dense<0.000000e+00> : vector<8x16xf32>
    %44 = tpu.matmul %42, %43, %cst_28 {dimension_numbers = #tpu.dot_dimension_numbers<[1], [1], [0], [0], [0, 0, 1, 0], [], []>} : vector<8x32xbf16>, vector<16x32xbf16>, vector<8x16xf32> -> vector<8x16xf32>
    %c1 = arith.constant 1 : index
    %c0_29 = arith.constant 0 : index
    %c0_30 = arith.constant 0 : index
    %45 = vector.load %arg7[%c1, %c0_29, %c0_30] : memref<4x8x1xf32, #tpu.memory_space<vmem>>, vector<1x8x1xf32>
    %46 = vector.shape_cast %45 : vector<1x8x1xf32> to vector<8x1xf32>
    %cst_31 = arith.constant dense<0xFF800000> : vector<8xf32>
    %47 = vector.multi_reduction <maximumf>, %44, %cst_31 [1] : vector<8x16xf32> to vector<8xf32>
    %48 = vector.shape_cast %47 : vector<8xf32> to vector<8x1xf32>
    %49 = arith.maximumf %46, %48 : vector<8x1xf32>
    %50 = arith.subf %46, %49 : vector<8x1xf32>
    %51 = math.exp %50 : vector<8x1xf32>
    %52 = vector.broadcast %49 : vector<8x1xf32> to vector<8x16xf32>
    %53 = arith.subf %44, %52 : vector<8x16xf32>
    %54 = math.exp %53 : vector<8x16xf32>
    %c1_32 = arith.constant 1 : index
    %c0_33 = arith.constant 0 : index
    %c0_34 = arith.constant 0 : index
    %55 = vector.load %arg8[%c1_32, %c0_33, %c0_34] : memref<4x8x1xf32, #tpu.memory_space<vmem>>, vector<1x8x1xf32>
    %56 = vector.shape_cast %55 : vector<1x8x1xf32> to vector<8x1xf32>
    %57 = arith.mulf %51, %56 : vector<8x1xf32>
    %cst_35 = arith.constant dense<0.000000e+00> : vector<8xf32>
    %58 = vector.multi_reduction <add>, %54, %cst_35 [1] : vector<8x16xf32> to vector<8xf32>
    %59 = vector.shape_cast %58 : vector<8xf32> to vector<8x1xf32>
    %60 = arith.addf %57, %59 : vector<8x1xf32>
    %c1_36 = arith.constant 1 : index
    %c0_37 = arith.constant 0 : index
    %c0_38 = arith.constant 0 : index
    %61 = vector.load %arg8[%c1_36, %c0_37, %c0_38] : memref<4x8x1xf32, #tpu.memory_space<vmem>>, vector<1x8x1xf32>
    %62 = vector.shape_cast %61 : vector<1x8x1xf32> to vector<8x1xf32>
    %63 = vector.shape_cast %60 : vector<8x1xf32> to vector<1x8x1xf32>
    tpu.vector_store %arg8[%c1_36, %c0_37, %c0_38], %63 {strides = array<i32>} : memref<4x8x1xf32, #tpu.memory_space<vmem>>, vector<1x8x1xf32>,
    %c0_39 = arith.constant 0 : index
    %c32 = arith.constant 32 : index
    %64 = vector.load %arg9[%c0_39, %c32] : memref<8x128xf32, #tpu.memory_space<vmem>>, vector<8x32xf32>
    %65 = vector.broadcast %51 : vector<8x1xf32> to vector<8x32xf32>
    %66 = arith.mulf %65, %64 : vector<8x32xf32>
    %67 = arith.truncf %54 : vector<8x16xf32> to vector<8x16xbf16>
    %68 = vector.extract_strided_slice %8 {offsets = [0, 32], sizes = [16, 32], strides = [1, 1]} : vector<16x128xbf16> to vector<16x32xbf16>
    %cst_40 = arith.constant dense<0.000000e+00> : vector<8x32xf32>
    %69 = tpu.matmul %67, %68, %cst_40 {dimension_numbers = #tpu.dot_dimension_numbers<[1], [0], [0], [1], [0, 0, 1, 1], [], []>} : vector<8x16xbf16>, vector<16x32xbf16>, vector<8x32xf32> -> vector<8x32xf32>
    %70 = arith.addf %66, %69 : vector<8x32xf32>
    %c0_41 = arith.constant 0 : index
    %c32_42 = arith.constant 32 : index
    %71 = vector.load %arg9[%c0_41, %c32_42] : memref<8x128xf32, #tpu.memory_space<vmem>>, vector<8x32xf32>
    tpu.vector_store %arg9[%c0_41, %c32_42], %70 {strides = array<i32>} : memref<8x128xf32, #tpu.memory_space<vmem>>, vector<8x32xf32>,
    %c1_43 = arith.constant 1 : index
    %c0_44 = arith.constant 0 : index
    %c0_45 = arith.constant 0 : index
    %72 = vector.load %arg7[%c1_43, %c0_44, %c0_45] : memref<4x8x1xf32, #tpu.memory_space<vmem>>, vector<1x8x1xf32>
    %73 = vector.shape_cast %72 : vector<1x8x1xf32> to vector<8x1xf32>
    %74 = vector.shape_cast %49 : vector<8x1xf32> to vector<1x8x1xf32>
    tpu.vector_store %arg7[%c1_43, %c0_44, %c0_45], %74 {strides = array<i32>} : memref<4x8x1xf32, #tpu.memory_space<vmem>>, vector<1x8x1xf32>,
    %75 = vector.extract_strided_slice %4 {offsets = [0, 64], sizes = [8, 32], strides = [1, 1]} : vector<8x128xbf16> to vector<8x32xbf16>
    %76 = vector.extract_strided_slice %6 {offsets = [0, 64], sizes = [16, 32], strides = [1, 1]} : vector<16x128xbf16> to vector<16x32xbf16>
    %cst_46 = arith.constant dense<0.000000e+00> : vector<8x16xf32>
    %77 = tpu.matmul %75, %76, %cst_46 {dimension_numbers = #tpu.dot_dimension_numbers<[1], [1], [0], [0], [0, 0, 1, 0], [], []>} : vector<8x32xbf16>, vector<16x32xbf16>, vector<8x16xf32> -> vector<8x16xf32>
    %c2 = arith.constant 2 : index
    %c0_47 = arith.constant 0 : index
    %c0_48 = arith.constant 0 : index
    %78 = vector.load %arg7[%c2, %c0_47, %c0_48] : memref<4x8x1xf32, #tpu.memory_space<vmem>>, vector<1x8x1xf32>
    %79 = vector.shape_cast %78 : vector<1x8x1xf32> to vector<8x1xf32>
    %cst_49 = arith.constant dense<0xFF800000> : vector<8xf32>
    %80 = vector.multi_reduction <maximumf>, %77, %cst_49 [1] : vector<8x16xf32> to vector<8xf32>
    %81 = vector.shape_cast %80 : vector<8xf32> to vector<8x1xf32>
    %82 = arith.maximumf %79, %81 : vector<8x1xf32>
    %83 = arith.subf %79, %82 : vector<8x1xf32>
    %84 = math.exp %83 : vector<8x1xf32>
    %85 = vector.broadcast %82 : vector<8x1xf32> to vector<8x16xf32>
    %86 = arith.subf %77, %85 : vector<8x16xf32>
    %87 = math.exp %86 : vector<8x16xf32>
    %c2_50 = arith.constant 2 : index
    %c0_51 = arith.constant 0 : index
    %c0_52 = arith.constant 0 : index
    %88 = vector.load %arg8[%c2_50, %c0_51, %c0_52] : memref<4x8x1xf32, #tpu.memory_space<vmem>>, vector<1x8x1xf32>
    %89 = vector.shape_cast %88 : vector<1x8x1xf32> to vector<8x1xf32>
    %90 = arith.mulf %84, %89 : vector<8x1xf32>
    %cst_53 = arith.constant dense<0.000000e+00> : vector<8xf32>
    %91 = vector.multi_reduction <add>, %87, %cst_53 [1] : vector<8x16xf32> to vector<8xf32>
    %92 = vector.shape_cast %91 : vector<8xf32> to vector<8x1xf32>
    %93 = arith.addf %90, %92 : vector<8x1xf32>
    %c2_54 = arith.constant 2 : index
    %c0_55 = arith.constant 0 : index
    %c0_56 = arith.constant 0 : index
    %94 = vector.load %arg8[%c2_54, %c0_55, %c0_56] : memref<4x8x1xf32, #tpu.memory_space<vmem>>, vector<1x8x1xf32>
    %95 = vector.shape_cast %94 : vector<1x8x1xf32> to vector<8x1xf32>
    %96 = vector.shape_cast %93 : vector<8x1xf32> to vector<1x8x1xf32>
    tpu.vector_store %arg8[%c2_54, %c0_55, %c0_56], %96 {strides = array<i32>} : memref<4x8x1xf32, #tpu.memory_space<vmem>>, vector<1x8x1xf32>,
    %c0_57 = arith.constant 0 : index
    %c64 = arith.constant 64 : index
    %97 = vector.load %arg9[%c0_57, %c64] : memref<8x128xf32, #tpu.memory_space<vmem>>, vector<8x32xf32>
    %98 = vector.broadcast %84 : vector<8x1xf32> to vector<8x32xf32>
    %99 = arith.mulf %98, %97 : vector<8x32xf32>
    %100 = arith.truncf %87 : vector<8x16xf32> to vector<8x16xbf16>
    %101 = vector.extract_strided_slice %8 {offsets = [0, 64], sizes = [16, 32], strides = [1, 1]} : vector<16x128xbf16> to vector<16x32xbf16>
    %cst_58 = arith.constant dense<0.000000e+00> : vector<8x32xf32>
    %102 = tpu.matmul %100, %101, %cst_58 {dimension_numbers = #tpu.dot_dimension_numbers<[1], [0], [0], [1], [0, 0, 1, 1], [], []>} : vector<8x16xbf16>, vector<16x32xbf16>, vector<8x32xf32> -> vector<8x32xf32>
    %103 = arith.addf %99, %102 : vector<8x32xf32>
    %c0_59 = arith.constant 0 : index
    %c64_60 = arith.constant 64 : index
    %104 = vector.load %arg9[%c0_59, %c64_60] : memref<8x128xf32, #tpu.memory_space<vmem>>, vector<8x32xf32>
    tpu.vector_store %arg9[%c0_59, %c64_60], %103 {strides = array<i32>} : memref<8x128xf32, #tpu.memory_space<vmem>>, vector<8x32xf32>,
    %c2_61 = arith.constant 2 : index
    %c0_62 = arith.constant 0 : index
    %c0_63 = arith.constant 0 : index
    %105 = vector.load %arg7[%c2_61, %c0_62, %c0_63] : memref<4x8x1xf32, #tpu.memory_space<vmem>>, vector<1x8x1xf32>
    %106 = vector.shape_cast %105 : vector<1x8x1xf32> to vector<8x1xf32>
    %107 = vector.shape_cast %82 : vector<8x1xf32> to vector<1x8x1xf32>
    tpu.vector_store %arg7[%c2_61, %c0_62, %c0_63], %107 {strides = array<i32>} : memref<4x8x1xf32, #tpu.memory_space<vmem>>, vector<1x8x1xf32>,
    %108 = vector.extract_strided_slice %4 {offsets = [0, 96], sizes = [8, 32], strides = [1, 1]} : vector<8x128xbf16> to vector<8x32xbf16>
    %109 = vector.extract_strided_slice %6 {offsets = [0, 96], sizes = [16, 32], strides = [1, 1]} : vector<16x128xbf16> to vector<16x32xbf16>
    %cst_64 = arith.constant dense<0.000000e+00> : vector<8x16xf32>
    %110 = tpu.matmul %108, %109, %cst_64 {dimension_numbers = #tpu.dot_dimension_numbers<[1], [1], [0], [0], [0, 0, 1, 0], [], []>} : vector<8x32xbf16>, vector<16x32xbf16>, vector<8x16xf32> -> vector<8x16xf32>
    %c3 = arith.constant 3 : index
    %c0_65 = arith.constant 0 : index
    %c0_66 = arith.constant 0 : index
    %111 = vector.load %arg7[%c3, %c0_65, %c0_66] : memref<4x8x1xf32, #tpu.memory_space<vmem>>, vector<1x8x1xf32>
    %112 = vector.shape_cast %111 : vector<1x8x1xf32> to vector<8x1xf32>
    %cst_67 = arith.constant dense<0xFF800000> : vector<8xf32>
    %113 = vector.multi_reduction <maximumf>, %110, %cst_67 [1] : vector<8x16xf32> to vector<8xf32>
    %114 = vector.shape_cast %113 : vector<8xf32> to vector<8x1xf32>
    %115 = arith.maximumf %112, %114 : vector<8x1xf32>
    %116 = arith.subf %112, %115 : vector<8x1xf32>
    %117 = math.exp %116 : vector<8x1xf32>
    %118 = vector.broadcast %115 : vector<8x1xf32> to vector<8x16xf32>
    %119 = arith.subf %110, %118 : vector<8x16xf32>
    %120 = math.exp %119 : vector<8x16xf32>
    %c3_68 = arith.constant 3 : index
    %c0_69 = arith.constant 0 : index
    %c0_70 = arith.constant 0 : index
    %121 = vector.load %arg8[%c3_68, %c0_69, %c0_70] : memref<4x8x1xf32, #tpu.memory_space<vmem>>, vector<1x8x1xf32>
    %122 = vector.shape_cast %121 : vector<1x8x1xf32> to vector<8x1xf32>
    %123 = arith.mulf %117, %122 : vector<8x1xf32>
    %cst_71 = arith.constant dense<0.000000e+00> : vector<8xf32>
    %124 = vector.multi_reduction <add>, %120, %cst_71 [1] : vector<8x16xf32> to vector<8xf32>
    %125 = vector.shape_cast %124 : vector<8xf32> to vector<8x1xf32>
    %126 = arith.addf %123, %125 : vector<8x1xf32>
    %c3_72 = arith.constant 3 : index
    %c0_73 = arith.constant 0 : index
    %c0_74 = arith.constant 0 : index
    %127 = vector.load %arg8[%c3_72, %c0_73, %c0_74] : memref<4x8x1xf32, #tpu.memory_space<vmem>>, vector<1x8x1xf32>
    %128 = vector.shape_cast %127 : vector<1x8x1xf32> to vector<8x1xf32>
    %129 = vector.shape_cast %126 : vector<8x1xf32> to vector<1x8x1xf32>
    tpu.vector_store %arg8[%c3_72, %c0_73, %c0_74], %129 {strides = array<i32>} : memref<4x8x1xf32, #tpu.memory_space<vmem>>, vector<1x8x1xf32>,
    %c0_75 = arith.constant 0 : index
    %c96 = arith.constant 96 : index
    %130 = vector.load %arg9[%c0_75, %c96] : memref<8x128xf32, #tpu.memory_space<vmem>>, vector<8x32xf32>
    %131 = vector.broadcast %117 : vector<8x1xf32> to vector<8x32xf32>
    %132 = arith.mulf %131, %130 : vector<8x32xf32>
    %133 = arith.truncf %120 : vector<8x16xf32> to vector<8x16xbf16>
    %134 = vector.extract_strided_slice %8 {offsets = [0, 96], sizes = [16, 32], strides = [1, 1]} : vector<16x128xbf16> to vector<16x32xbf16>
    %cst_76 = arith.constant dense<0.000000e+00> : vector<8x32xf32>
    %135 = tpu.matmul %133, %134, %cst_76 {dimension_numbers = #tpu.dot_dimension_numbers<[1], [0], [0], [1], [0, 0, 1, 1], [], []>} : vector<8x16xbf16>, vector<16x32xbf16>, vector<8x32xf32> -> vector<8x32xf32>
    %136 = arith.addf %132, %135 : vector<8x32xf32>
    %c0_77 = arith.constant 0 : index
    %c96_78 = arith.constant 96 : index
    %137 = vector.load %arg9[%c0_77, %c96_78] : memref<8x128xf32, #tpu.memory_space<vmem>>, vector<8x32xf32>
    tpu.vector_store %arg9[%c0_77, %c96_78], %136 {strides = array<i32>} : memref<8x128xf32, #tpu.memory_space<vmem>>, vector<8x32xf32>,
    %c3_79 = arith.constant 3 : index
    %c0_80 = arith.constant 0 : index
    %c0_81 = arith.constant 0 : index
    %138 = vector.load %arg7[%c3_79, %c0_80, %c0_81] : memref<4x8x1xf32, #tpu.memory_space<vmem>>, vector<1x8x1xf32>
    %139 = vector.shape_cast %138 : vector<1x8x1xf32> to vector<8x1xf32>
    %140 = vector.shape_cast %115 : vector<8x1xf32> to vector<1x8x1xf32>
    tpu.vector_store %arg7[%c3_79, %c0_80, %c0_81], %140 {strides = array<i32>} : memref<4x8x1xf32, #tpu.memory_space<vmem>>, vector<1x8x1xf32>,
    %c0_i32_82 = arith.constant 0 : i32
    %141 = arith.cmpi eq, %arg2, %c0_i32_82 : i32
    %142 = arith.extui %141 : i1 to i32
    %c0_i32_83 = arith.constant 0 : i32
    %143 = arith.cmpi ne, %142, %c0_i32_83 : i32
    scf.if %143 {
      %c0_84 = arith.constant 0 : index
      %c0_85 = arith.constant 0 : index
      %144 = vector.load %arg9[%c0_84, %c0_85] : memref<8x128xf32, #tpu.memory_space<vmem>>, vector<8x32xf32>
      %c0_86 = arith.constant 0 : index
      %c0_87 = arith.constant 0 : index
      %c0_88 = arith.constant 0 : index
      %145 = vector.load %arg8[%c0_86, %c0_87, %c0_88] : memref<4x8x1xf32, #tpu.memory_space<vmem>>, vector<1x8x1xf32>
      %146 = vector.shape_cast %145 : vector<1x8x1xf32> to vector<8x1xf32>
      %147 = tpu.reciprocal %146 {approx = true} : vector<8x1xf32> -> vector<8x1xf32>
      %148 = vector.broadcast %147 : vector<8x1xf32> to vector<8x32xf32>
      %149 = arith.mulf %144, %148 : vector<8x32xf32>
      %c0_89 = arith.constant 0 : index
      %c32_90 = arith.constant 32 : index
      %150 = vector.load %arg9[%c0_89, %c32_90] : memref<8x128xf32, #tpu.memory_space<vmem>>, vector<8x32xf32>
      %c1_91 = arith.constant 1 : index
      %c0_92 = arith.constant 0 : index
      %c0_93 = arith.constant 0 : index
      %151 = vector.load %arg8[%c1_91, %c0_92, %c0_93] : memref<4x8x1xf32, #tpu.memory_space<vmem>>, vector<1x8x1xf32>
      %152 = vector.shape_cast %151 : vector<1x8x1xf32> to vector<8x1xf32>
      %153 = tpu.reciprocal %152 {approx = true} : vector<8x1xf32> -> vector<8x1xf32>
      %154 = vector.broadcast %153 : vector<8x1xf32> to vector<8x32xf32>
      %155 = arith.mulf %150, %154 : vector<8x32xf32>
      %c0_94 = arith.constant 0 : index
      %c64_95 = arith.constant 64 : index
      %156 = vector.load %arg9[%c0_94, %c64_95] : memref<8x128xf32, #tpu.memory_space<vmem>>, vector<8x32xf32>
      %c2_96 = arith.constant 2 : index
      %c0_97 = arith.constant 0 : index
      %c0_98 = arith.constant 0 : index
      %157 = vector.load %arg8[%c2_96, %c0_97, %c0_98] : memref<4x8x1xf32, #tpu.memory_space<vmem>>, vector<1x8x1xf32>
      %158 = vector.shape_cast %157 : vector<1x8x1xf32> to vector<8x1xf32>
      %159 = tpu.reciprocal %158 {approx = true} : vector<8x1xf32> -> vector<8x1xf32>
      %160 = vector.broadcast %159 : vector<8x1xf32> to vector<8x32xf32>
      %161 = arith.mulf %156, %160 : vector<8x32xf32>
      %c0_99 = arith.constant 0 : index
      %c96_100 = arith.constant 96 : index
      %162 = vector.load %arg9[%c0_99, %c96_100] : memref<8x128xf32, #tpu.memory_space<vmem>>, vector<8x32xf32>
      %c3_101 = arith.constant 3 : index
      %c0_102 = arith.constant 0 : index
      %c0_103 = arith.constant 0 : index
      %163 = vector.load %arg8[%c3_101, %c0_102, %c0_103] : memref<4x8x1xf32, #tpu.memory_space<vmem>>, vector<1x8x1xf32>
      %164 = vector.shape_cast %163 : vector<1x8x1xf32> to vector<8x1xf32>
      %165 = tpu.reciprocal %164 {approx = true} : vector<8x1xf32> -> vector<8x1xf32>
      %166 = vector.broadcast %165 : vector<8x1xf32> to vector<8x32xf32>
      %167 = arith.mulf %162, %166 : vector<8x32xf32>
      %168 = tpu.concatenate %149, %155, %161, %167 in 1 : vector<8x32xf32>, vector<8x32xf32>, vector<8x32xf32>, vector<8x32xf32> -> vector<8x128xf32>
      %169 = arith.truncf %168 : vector<8x128xf32> to vector<8x128xbf16>
      %c0_104 = arith.constant 0 : index
      %c0_105 = arith.constant 0 : index
      %c0_106 = arith.constant 0 : index
      %170 = vector.load %arg6[%c0_104, %c0_105, %c0_106] : memref<1x8x128xbf16, #tpu.memory_space<vmem>>, vector<1x8x128xbf16>
      %171 = vector.shape_cast %170 : vector<1x8x128xbf16> to vector<8x128xbf16>
      %172 = vector.shape_cast %169 : vector<8x128xbf16> to vector<1x8x128xbf16>
      tpu.vector_store %arg6[%c0_104, %c0_105, %c0_106], %172 {strides = array<i32>} : memref<1x8x128xbf16, #tpu.memory_space<vmem>>, vector<1x8x128xbf16>,
    } else {
    }
    return
  }
  func.func @transform_0(%arg0: i32, %arg1: i32, %arg2: i32) -> (i32, i32, i32) {
    %c0_i32 = arith.constant 0 : i32
    %c0_i32_0 = arith.constant 0 : i32
    return %arg0, %arg1, %c0_i32 : i32, i32, i32
  }
  func.func @transform_1(%arg0: i32, %arg1: i32, %arg2: i32) -> (i32, i32, i32) {
    %c0_i32 = arith.constant 0 : i32
    %c0_i32_0 = arith.constant 0 : i32
    return %arg0, %arg2, %c0_i32 : i32, i32, i32
  }
  func.func @transform_2(%arg0: i32, %arg1: i32, %arg2: i32) -> (i32, i32, i32) {
    %c1_i32 = arith.constant 1 : i32
    %c0_i32 = arith.constant 0 : i32
    return %arg0, %arg2, %c1_i32 : i32, i32, i32
  }
  func.func @transform_3(%arg0: i32, %arg1: i32, %arg2: i32) -> (i32, i32, i32) {
    %c0_i32 = arith.constant 0 : i32
    %c0_i32_0 = arith.constant 0 : i32
    return %arg0, %arg1, %c0_i32 : i32, i32, i32
  }
}

module attributes {stable_mosaic.version = 11 : i64} {
  func.func @_linear_kernel(%arg0: i32, %arg1: i32, %arg2: i32, %arg3: memref<16x128xf32, #tpu.memory_space<vmem>>, %arg4: memref<128x256xbf16, #tpu.memory_space<vmem>>, %arg5: memref<1x256xf32, #tpu.memory_space<vmem>>, %arg6: memref<16x256xbf16, #tpu.memory_space<vmem>>, %arg7: memref<16x256xf32, #tpu.memory_space<vmem>>) attributes {dimension_semantics = [#tpu.dimension_semantics<parallel>, #tpu.dimension_semantics<parallel>, #tpu.dimension_semantics<arbitrary>], iteration_bounds = array<i64: 1, 1, 1>, scalar_prefetch = 0 : i64, scratch_operands = 1 : i64, tpu.core_type = #tpu.core_type<tc>, window_params = [{transform_indices = @transform_0, window_bounds = array<i64: 16, 128>}, {transform_indices = @transform_1, window_bounds = array<i64: 128, 256>}, {transform_indices = @transform_2, window_bounds = array<i64: 1, 256>}, {transform_indices = @transform_3, window_bounds = array<i64: 16, 256>}]} {
    %c0_i32 = arith.constant 0 : i32
    %0 = arith.cmpi eq, %arg2, %c0_i32 : i32
    %1 = arith.extui %0 : i1 to i32
    %c0_i32_0 = arith.constant 0 : i32
    %2 = arith.cmpi ne, %1, %c0_i32_0 : i32
    scf.if %2 {
      %cst_10 = arith.constant 0.000000e+00 : f32
      %13 = vector.broadcast %cst_10 : f32 to vector<16x256xf32>
      %c0_11 = arith.constant 0 : index
      %c0_12 = arith.constant 0 : index
      %14 = vector.load %arg7[%c0_11, %c0_12] : memref<16x256xf32, #tpu.memory_space<vmem>>, vector<16x256xf32>
      tpu.vector_store %arg7[%c0_11, %c0_12], %13 {strides = array<i32>} : memref<16x256xf32, #tpu.memory_space<vmem>>, vector<16x256xf32>,
    } else {
    }
    %c0 = arith.constant 0 : index
    %c0_1 = arith.constant 0 : index
    %3 = vector.load %arg7[%c0, %c0_1] : memref<16x256xf32, #tpu.memory_space<vmem>>, vector<16x256xf32>
    %c0_2 = arith.constant 0 : index
    %c0_3 = arith.constant 0 : index
    %4 = vector.load %arg3[%c0_2, %c0_3] : memref<16x128xf32, #tpu.memory_space<vmem>>, vector<16x128xf32>
    %5 = arith.truncf %4 : vector<16x128xf32> to vector<16x128xbf16>
    %c0_4 = arith.constant 0 : index
    %c0_5 = arith.constant 0 : index
    %6 = vector.load %arg4[%c0_4, %c0_5] : memref<128x256xbf16, #tpu.memory_space<vmem>>, vector<128x256xbf16>
    %cst = arith.constant dense<0.000000e+00> : vector<16x256xf32>
    %7 = tpu.matmul %5, %6, %cst {dimension_numbers = #tpu.dot_dimension_numbers<[1], [0], [0], [1], [0, 0, 1, 1], [], []>} : vector<16x128xbf16>, vector<128x256xbf16>, vector<16x256xf32> -> vector<16x256xf32>
    %8 = arith.addf %3, %7 : vector<16x256xf32>
    %c0_6 = arith.constant 0 : index
    %c0_7 = arith.constant 0 : index
    %9 = vector.load %arg7[%c0_6, %c0_7] : memref<16x256xf32, #tpu.memory_space<vmem>>, vector<16x256xf32>
    tpu.vector_store %arg7[%c0_6, %c0_7], %8 {strides = array<i32>} : memref<16x256xf32, #tpu.memory_space<vmem>>, vector<16x256xf32>,
    %c0_i32_8 = arith.constant 0 : i32
    %10 = arith.cmpi eq, %arg2, %c0_i32_8 : i32
    %11 = arith.extui %10 : i1 to i32
    %c0_i32_9 = arith.constant 0 : i32
    %12 = arith.cmpi ne, %11, %c0_i32_9 : i32
    scf.if %12 {
      %c0_10 = arith.constant 0 : index
      %c0_11 = arith.constant 0 : index
      %13 = vector.load %arg7[%c0_10, %c0_11] : memref<16x256xf32, #tpu.memory_space<vmem>>, vector<16x256xf32>
      %c0_12 = arith.constant 0 : index
      %c0_13 = arith.constant 0 : index
      %14 = vector.load %arg5[%c0_12, %c0_13] : memref<1x256xf32, #tpu.memory_space<vmem>>, vector<1x256xf32>
      %15 = vector.broadcast %14 : vector<1x256xf32> to vector<16x256xf32>
      %16 = arith.addf %13, %15 : vector<16x256xf32>
      %cst_14 = arith.constant 0.000000e+00 : f32
      %17 = vector.broadcast %cst_14 : f32 to vector<16x256xf32>
      %18 = arith.maximumf %16, %17 : vector<16x256xf32>
      %19 = arith.truncf %18 : vector<16x256xf32> to vector<16x256xbf16>
      %c0_15 = arith.constant 0 : index
      %c0_16 = arith.constant 0 : index
      %20 = vector.load %arg6[%c0_15, %c0_16] : memref<16x256xbf16, #tpu.memory_space<vmem>>, vector<16x256xbf16>
      tpu.vector_store %arg6[%c0_15, %c0_16], %19 {strides = array<i32>} : memref<16x256xbf16, #tpu.memory_space<vmem>>, vector<16x256xbf16>,
    } else {
    }
    return
  }
  func.func @transform_0(%arg0: i32, %arg1: i32, %arg2: i32) -> (i32, i32) {
    %c0_i32 = arith.constant 0 : i32
    return %arg0, %arg2 : i32, i32
  }
  func.func @transform_1(%arg0: i32, %arg1: i32, %arg2: i32) -> (i32, i32) {
    %c0_i32 = arith.constant 0 : i32
    return %arg2, %arg1 : i32, i32
  }
  func.func @transform_2(%arg0: i32, %arg1: i32, %arg2: i32) -> (i32, i32) {
    %c0_i32 = arith.constant 0 : i32
    %c0_i32_0 = arith.constant 0 : i32
    return %c0_i32, %arg1 : i32, i32
  }
  func.func @transform_3(%arg0: i32, %arg1: i32, %arg2: i32) -> (i32, i32) {
    %c0_i32 = arith.constant 0 : i32
    return %arg0, %arg1 : i32, i32
  }
}

module attributes {stable_mosaic.version = 11 : i64} {
  func.func @_linear_add_ln_kernel(%arg0: i32, %arg1: i32, %arg2: i32, %arg3: memref<16x256xbf16, #tpu.memory_space<vmem>>, %arg4: memref<256x128xbf16, #tpu.memory_space<vmem>>, %arg5: memref<1x128xf32, #tpu.memory_space<vmem>>, %arg6: memref<16x128xf32, #tpu.memory_space<vmem>>, %arg7: memref<1x128xf32, #tpu.memory_space<vmem>>, %arg8: memref<1x128xf32, #tpu.memory_space<vmem>>, %arg9: memref<16x128xf32, #tpu.memory_space<vmem>>, %arg10: memref<16x128xf32, #tpu.memory_space<vmem>>) attributes {dimension_semantics = [#tpu.dimension_semantics<parallel>, #tpu.dimension_semantics<parallel>, #tpu.dimension_semantics<arbitrary>], iteration_bounds = array<i64: 1, 1, 1>, scalar_prefetch = 0 : i64, scratch_operands = 1 : i64, tpu.core_type = #tpu.core_type<tc>, window_params = [{transform_indices = @transform_0, window_bounds = array<i64: 16, 256>}, {transform_indices = @transform_1, window_bounds = array<i64: 256, 128>}, {transform_indices = @transform_2, window_bounds = array<i64: 1, 128>}, {transform_indices = @transform_3, window_bounds = array<i64: 16, 128>}, {transform_indices = @transform_4, window_bounds = array<i64: 1, 128>}, {transform_indices = @transform_5, window_bounds = array<i64: 1, 128>}, {transform_indices = @transform_6, window_bounds = array<i64: 16, 128>}]} {
    %c0_i32 = arith.constant 0 : i32
    %0 = arith.cmpi eq, %arg2, %c0_i32 : i32
    %1 = arith.extui %0 : i1 to i32
    %c0_i32_0 = arith.constant 0 : i32
    %2 = arith.cmpi ne, %1, %c0_i32_0 : i32
    scf.if %2 {
      %cst_10 = arith.constant 0.000000e+00 : f32
      %12 = vector.broadcast %cst_10 : f32 to vector<16x128xf32>
      %c0_11 = arith.constant 0 : index
      %c0_12 = arith.constant 0 : index
      %13 = vector.load %arg10[%c0_11, %c0_12] : memref<16x128xf32, #tpu.memory_space<vmem>>, vector<16x128xf32>
      tpu.vector_store %arg10[%c0_11, %c0_12], %12 {strides = array<i32>} : memref<16x128xf32, #tpu.memory_space<vmem>>, vector<16x128xf32>,
    } else {
    }
    %c0 = arith.constant 0 : index
    %c0_1 = arith.constant 0 : index
    %3 = vector.load %arg10[%c0, %c0_1] : memref<16x128xf32, #tpu.memory_space<vmem>>, vector<16x128xf32>
    %c0_2 = arith.constant 0 : index
    %c0_3 = arith.constant 0 : index
    %4 = vector.load %arg3[%c0_2, %c0_3] : memref<16x256xbf16, #tpu.memory_space<vmem>>, vector<16x256xbf16>
    %c0_4 = arith.constant 0 : index
    %c0_5 = arith.constant 0 : index
    %5 = vector.load %arg4[%c0_4, %c0_5] : memref<256x128xbf16, #tpu.memory_space<vmem>>, vector<256x128xbf16>
    %cst = arith.constant dense<0.000000e+00> : vector<16x128xf32>
    %6 = tpu.matmul %4, %5, %cst {dimension_numbers = #tpu.dot_dimension_numbers<[1], [0], [0], [1], [0, 0, 1, 1], [], []>} : vector<16x256xbf16>, vector<256x128xbf16>, vector<16x128xf32> -> vector<16x128xf32>
    %7 = arith.addf %3, %6 : vector<16x128xf32>
    %c0_6 = arith.constant 0 : index
    %c0_7 = arith.constant 0 : index
    %8 = vector.load %arg10[%c0_6, %c0_7] : memref<16x128xf32, #tpu.memory_space<vmem>>, vector<16x128xf32>
    tpu.vector_store %arg10[%c0_6, %c0_7], %7 {strides = array<i32>} : memref<16x128xf32, #tpu.memory_space<vmem>>, vector<16x128xf32>,
    %c0_i32_8 = arith.constant 0 : i32
    %9 = arith.cmpi eq, %arg2, %c0_i32_8 : i32
    %10 = arith.extui %9 : i1 to i32
    %c0_i32_9 = arith.constant 0 : i32
    %11 = arith.cmpi ne, %10, %c0_i32_9 : i32
    scf.if %11 {
      %c0_10 = arith.constant 0 : index
      %c0_11 = arith.constant 0 : index
      %12 = vector.load %arg10[%c0_10, %c0_11] : memref<16x128xf32, #tpu.memory_space<vmem>>, vector<16x128xf32>
      %c0_12 = arith.constant 0 : index
      %c0_13 = arith.constant 0 : index
      %13 = vector.load %arg5[%c0_12, %c0_13] : memref<1x128xf32, #tpu.memory_space<vmem>>, vector<1x128xf32>
      %14 = vector.broadcast %13 : vector<1x128xf32> to vector<16x128xf32>
      %15 = arith.addf %12, %14 : vector<16x128xf32>
      %c0_14 = arith.constant 0 : index
      %c0_15 = arith.constant 0 : index
      %16 = vector.load %arg6[%c0_14, %c0_15] : memref<16x128xf32, #tpu.memory_space<vmem>>, vector<16x128xf32>
      %17 = arith.addf %15, %16 : vector<16x128xf32>
      %cst_16 = arith.constant dense<0.000000e+00> : vector<16xf32>
      %18 = vector.multi_reduction <add>, %17, %cst_16 [1] : vector<16x128xf32> to vector<16xf32>
      %19 = vector.shape_cast %18 : vector<16xf32> to vector<16x1xf32>
      %cst_17 = arith.constant 1.280000e+02 : f32
      %20 = vector.broadcast %cst_17 : f32 to vector<16x1xf32>
      %21 = arith.divf %19, %20 : vector<16x1xf32>
      %22 = vector.broadcast %21 : vector<16x1xf32> to vector<16x128xf32>
      %23 = arith.subf %17, %22 : vector<16x128xf32>
      %24 = arith.mulf %23, %23 : vector<16x128xf32>
      %cst_18 = arith.constant dense<0.000000e+00> : vector<16xf32>
      %25 = vector.multi_reduction <add>, %24, %cst_18 [1] : vector<16x128xf32> to vector<16xf32>
      %26 = vector.shape_cast %25 : vector<16xf32> to vector<16x1xf32>
      %cst_19 = arith.constant 1.280000e+02 : f32
      %27 = vector.broadcast %cst_19 : f32 to vector<16x1xf32>
      %28 = arith.divf %26, %27 : vector<16x1xf32>
      %cst_20 = arith.constant 9.99999974E-6 : f32
      %29 = vector.broadcast %cst_20 : f32 to vector<16x1xf32>
      %30 = arith.addf %28, %29 : vector<16x1xf32>
      %31 = math.rsqrt %30 : vector<16x1xf32>
      %32 = vector.broadcast %31 : vector<16x1xf32> to vector<16x128xf32>
      %33 = arith.mulf %23, %32 : vector<16x128xf32>
      %c0_21 = arith.constant 0 : index
      %c0_22 = arith.constant 0 : index
      %34 = vector.load %arg7[%c0_21, %c0_22] : memref<1x128xf32, #tpu.memory_space<vmem>>, vector<1x128xf32>
      %35 = vector.broadcast %34 : vector<1x128xf32> to vector<16x128xf32>
      %36 = arith.mulf %33, %35 : vector<16x128xf32>
      %c0_23 = arith.constant 0 : index
      %c0_24 = arith.constant 0 : index
      %37 = vector.load %arg8[%c0_23, %c0_24] : memref<1x128xf32, #tpu.memory_space<vmem>>, vector<1x128xf32>
      %38 = vector.broadcast %37 : vector<1x128xf32> to vector<16x128xf32>
      %39 = arith.addf %36, %38 : vector<16x128xf32>
      %c0_25 = arith.constant 0 : index
      %c0_26 = arith.constant 0 : index
      %40 = vector.load %arg9[%c0_25, %c0_26] : memref<16x128xf32, #tpu.memory_space<vmem>>, vector<16x128xf32>
      tpu.vector_store %arg9[%c0_25, %c0_26], %39 {strides = array<i32>} : memref<16x128xf32, #tpu.memory_space<vmem>>, vector<16x128xf32>,
    } else {
    }
    return
  }
  func.func @transform_0(%arg0: i32, %arg1: i32, %arg2: i32) -> (i32, i32) {
    %c0_i32 = arith.constant 0 : i32
    return %arg0, %arg2 : i32, i32
  }
  func.func @transform_1(%arg0: i32, %arg1: i32, %arg2: i32) -> (i32, i32) {
    %c0_i32 = arith.constant 0 : i32
    return %arg2, %arg1 : i32, i32
  }
  func.func @transform_2(%arg0: i32, %arg1: i32, %arg2: i32) -> (i32, i32) {
    %c0_i32 = arith.constant 0 : i32
    %c0_i32_0 = arith.constant 0 : i32
    return %c0_i32, %arg1 : i32, i32
  }
  func.func @transform_3(%arg0: i32, %arg1: i32, %arg2: i32) -> (i32, i32) {
    %c0_i32 = arith.constant 0 : i32
    return %arg0, %arg1 : i32, i32
  }
  func.func @transform_4(%arg0: i32, %arg1: i32, %arg2: i32) -> (i32, i32) {
    %c0_i32 = arith.constant 0 : i32
    %c0_i32_0 = arith.constant 0 : i32
    return %c0_i32, %arg1 : i32, i32
  }
  func.func @transform_5(%arg0: i32, %arg1: i32, %arg2: i32) -> (i32, i32) {
    %c0_i32 = arith.constant 0 : i32
    %c0_i32_0 = arith.constant 0 : i32
    return %c0_i32, %arg1 : i32, i32
  }
  func.func @transform_6(%arg0: i32, %arg1: i32, %arg2: i32) -> (i32, i32) {
    %c0_i32 = arith.constant 0 : i32
    return %arg0, %arg1 : i32, i32
  }
}

module attributes {stable_mosaic.version = 11 : i64} {
  func.func @_linear_kernel(%arg0: i32, %arg1: i32, %arg2: i32, %arg3: memref<16x128xf32, #tpu.memory_space<vmem>>, %arg4: memref<128x256xbf16, #tpu.memory_space<vmem>>, %arg5: memref<1x256xf32, #tpu.memory_space<vmem>>, %arg6: memref<16x256xf32, #tpu.memory_space<vmem>>, %arg7: memref<16x256xf32, #tpu.memory_space<vmem>>) attributes {dimension_semantics = [#tpu.dimension_semantics<parallel>, #tpu.dimension_semantics<parallel>, #tpu.dimension_semantics<arbitrary>], iteration_bounds = array<i64: 1, 1, 1>, scalar_prefetch = 0 : i64, scratch_operands = 1 : i64, tpu.core_type = #tpu.core_type<tc>, window_params = [{transform_indices = @transform_0, window_bounds = array<i64: 16, 128>}, {transform_indices = @transform_1, window_bounds = array<i64: 128, 256>}, {transform_indices = @transform_2, window_bounds = array<i64: 1, 256>}, {transform_indices = @transform_3, window_bounds = array<i64: 16, 256>}]} {
    %c0_i32 = arith.constant 0 : i32
    %0 = arith.cmpi eq, %arg2, %c0_i32 : i32
    %1 = arith.extui %0 : i1 to i32
    %c0_i32_0 = arith.constant 0 : i32
    %2 = arith.cmpi ne, %1, %c0_i32_0 : i32
    scf.if %2 {
      %cst_10 = arith.constant 0.000000e+00 : f32
      %13 = vector.broadcast %cst_10 : f32 to vector<16x256xf32>
      %c0_11 = arith.constant 0 : index
      %c0_12 = arith.constant 0 : index
      %14 = vector.load %arg7[%c0_11, %c0_12] : memref<16x256xf32, #tpu.memory_space<vmem>>, vector<16x256xf32>
      tpu.vector_store %arg7[%c0_11, %c0_12], %13 {strides = array<i32>} : memref<16x256xf32, #tpu.memory_space<vmem>>, vector<16x256xf32>,
    } else {
    }
    %c0 = arith.constant 0 : index
    %c0_1 = arith.constant 0 : index
    %3 = vector.load %arg7[%c0, %c0_1] : memref<16x256xf32, #tpu.memory_space<vmem>>, vector<16x256xf32>
    %c0_2 = arith.constant 0 : index
    %c0_3 = arith.constant 0 : index
    %4 = vector.load %arg3[%c0_2, %c0_3] : memref<16x128xf32, #tpu.memory_space<vmem>>, vector<16x128xf32>
    %5 = arith.truncf %4 : vector<16x128xf32> to vector<16x128xbf16>
    %c0_4 = arith.constant 0 : index
    %c0_5 = arith.constant 0 : index
    %6 = vector.load %arg4[%c0_4, %c0_5] : memref<128x256xbf16, #tpu.memory_space<vmem>>, vector<128x256xbf16>
    %cst = arith.constant dense<0.000000e+00> : vector<16x256xf32>
    %7 = tpu.matmul %5, %6, %cst {dimension_numbers = #tpu.dot_dimension_numbers<[1], [0], [0], [1], [0, 0, 1, 1], [], []>} : vector<16x128xbf16>, vector<128x256xbf16>, vector<16x256xf32> -> vector<16x256xf32>
    %8 = arith.addf %3, %7 : vector<16x256xf32>
    %c0_6 = arith.constant 0 : index
    %c0_7 = arith.constant 0 : index
    %9 = vector.load %arg7[%c0_6, %c0_7] : memref<16x256xf32, #tpu.memory_space<vmem>>, vector<16x256xf32>
    tpu.vector_store %arg7[%c0_6, %c0_7], %8 {strides = array<i32>} : memref<16x256xf32, #tpu.memory_space<vmem>>, vector<16x256xf32>,
    %c0_i32_8 = arith.constant 0 : i32
    %10 = arith.cmpi eq, %arg2, %c0_i32_8 : i32
    %11 = arith.extui %10 : i1 to i32
    %c0_i32_9 = arith.constant 0 : i32
    %12 = arith.cmpi ne, %11, %c0_i32_9 : i32
    scf.if %12 {
      %c0_10 = arith.constant 0 : index
      %c0_11 = arith.constant 0 : index
      %13 = vector.load %arg7[%c0_10, %c0_11] : memref<16x256xf32, #tpu.memory_space<vmem>>, vector<16x256xf32>
      %c0_12 = arith.constant 0 : index
      %c0_13 = arith.constant 0 : index
      %14 = vector.load %arg5[%c0_12, %c0_13] : memref<1x256xf32, #tpu.memory_space<vmem>>, vector<1x256xf32>
      %15 = vector.broadcast %14 : vector<1x256xf32> to vector<16x256xf32>
      %16 = arith.addf %13, %15 : vector<16x256xf32>
      %c0_14 = arith.constant 0 : index
      %c0_15 = arith.constant 0 : index
      %17 = vector.load %arg6[%c0_14, %c0_15] : memref<16x256xf32, #tpu.memory_space<vmem>>, vector<16x256xf32>
      tpu.vector_store %arg6[%c0_14, %c0_15], %16 {strides = array<i32>} : memref<16x256xf32, #tpu.memory_space<vmem>>, vector<16x256xf32>,
    } else {
    }
    return
  }
  func.func @transform_0(%arg0: i32, %arg1: i32, %arg2: i32) -> (i32, i32) {
    %c0_i32 = arith.constant 0 : i32
    return %arg0, %arg2 : i32, i32
  }
  func.func @transform_1(%arg0: i32, %arg1: i32, %arg2: i32) -> (i32, i32) {
    %c0_i32 = arith.constant 0 : i32
    return %arg2, %arg1 : i32, i32
  }
  func.func @transform_2(%arg0: i32, %arg1: i32, %arg2: i32) -> (i32, i32) {
    %c0_i32 = arith.constant 0 : i32
    %c0_i32_0 = arith.constant 0 : i32
    return %c0_i32, %arg1 : i32, i32
  }
  func.func @transform_3(%arg0: i32, %arg1: i32, %arg2: i32) -> (i32, i32) {
    %c0_i32 = arith.constant 0 : i32
    return %arg0, %arg1 : i32, i32
  }
}

</mosaic_0001>

<bundles_post_ra>
// kernel: decoder_forward.19
= control target key start
LH: loop header
LB: loop body
LE: loop exit
PB: predicated region body
PF: predicated region fallthrough
CT: control target
= control target key end

     0   :  { %8 = vsyncpa [#allocation4], 0  ;;  %s448_s15 = smov [#allocation3]   ;;  %s449_s17 = smov 192   ;;  %s495_s0 = inlined_call_operand.vmem [shape: f32[16,128], index: 0, kind: input, shape index: {}]   ;;  %s496_s1 = inlined_call_operand.hbm [shape: bf16[128,384], index: 1, kind: input, shape index: {}]   ;;  %s497_s2 = inlined_call_operand.vmem [shape: f32[1,384], index: 2, kind: input, shape index: {}]   ;;  %s498_s3 = inlined_call_operand.vmem [shape: bf16[16,384], index: 3, kind: output, shape index: {}]  }
   0x1   :  { %s15_s14 = sshll.u32 %s496_s1, 4  ;;  %s17_s16 = sshll.u32 %s448_s15, 4  ;;  %s16_s14 = int_to_ptr.hbm [resolvable:$true] %s15_s14  ;;  %s18_s16 = int_to_ptr.vmem [resolvable:$true] %s17_s16 }
   0x2   :  { %s450_s18 = smov 12  }
   0x3   :  { %23 = dma.hbm_to_vmem [thread:$0]  %s16_s14, 3072, %s18_s16, [#allocation4], %s449_s17, %s449_s17, %s450_s18  }
   0x4   :  { %446 = dma.done.wait [#allocation4], 3072  }
   0x5   :  { %447 = vsyncadd [#allocation4], 4294964224  ;;  %v385_v0 = vld [vmem:[#allocation3 + $0xa8] sm:$0xf]  ;;  %v417_v1 = vld [vmem:[#allocation3 + $0xb0] sm:$0xf0] }
   0x6   :  { %v416_v2 = vld [vmem:[#allocation3 + $0xac] sm:$0xf]  ;;  %v386_v3 = vor.u32 %v417_v1, %v385_v0  ;;  %v387_v4 = vld [vmem:[#allocation3 + $0xb4] sm:$0xf0]  ;;  %v393_v5 = vld [vmem:[#allocation3 + $0xb0] sm:$0xf] }
   0x7   :  { %v418_v6 = vld [vmem:[#allocation3 + $0xb8] sm:$0xf0]  ;;  %v390_v7 = vor.u32 %v416_v2, %v387_v4  ;;  %v373_v9 = vld [vmem:[#allocation3 + $0x90] sm:$0xf]  ;;  %v413_v11 = vld [vmem:[#allocation3 + $0x94] sm:$0xf] }
   0x8   :  { %v394_v8 = vor.u32 %v418_v6, %v393_v5  ;;  %v414_v10 = vld [vmem:[#allocation3 + $0x98] sm:$0xf0]  ;;  %209 = vmatpush.bf16.msra.mxu0 %v386_v3  ;;  %v375_v13 = vld [vmem:[#allocation3 + $0x9c] sm:$0xf0]  ;;  %v381_v14 = vld [vmem:[#allocation3 + $0x98] sm:$0xf] }
   0x9   :  { %v374_v12 = vor.u32 %v414_v10, %v373_v9  ;;  %v415_v15 = vld [vmem:[#allocation3 + $0xa0] sm:$0xf0]  ;;  %223 = vmatpush.bf16.msra.mxu1 %v390_v7  ;;  %v378_v16 = vor.u32 %v413_v11, %v375_v13  ;;  %v361_v18 = vld [vmem:[#allocation3 + $0x78] sm:$0xf]  ;;  %v410_v20 = vld [vmem:[#allocation3 + $0x7c] sm:$0xf] }
   0xa   :  { %237 = vmatpush.bf16.msra.mxu2 %v394_v8  ;;  %v382_v17 = vor.u32 %v415_v15, %v381_v14  ;;  %v411_v19 = vld [vmem:[#allocation3 + $0x80] sm:$0xf0]  ;;  %v363_v21 = vld [vmem:[#allocation3 + $0x84] sm:$0xf0]  ;;  %v369_v22 = vld [vmem:[#allocation3 + $0x80] sm:$0xf] }
   0xb   :  { %v412_v23 = vld [vmem:[#allocation3 + $0x88] sm:$0xf0]  ;;  %v362_v24 = vor.u32 %v411_v19, %v361_v18  ;;  %v366_v25 = vor.u32 %v410_v20, %v363_v21  ;;  %v349_v27 = vld [vmem:[#allocation3 + $0x60] sm:$0xf]  ;;  %v407_v29 = vld [vmem:[#allocation3 + $0x64] sm:$0xf] }
   0xc   :  { %210 = vmatpush.bf16.msra.mxu0 %v374_v12  ;;  %v370_v26 = vor.u32 %v412_v23, %v369_v22  ;;  %v408_v28 = vld [vmem:[#allocation3 + $0x68] sm:$0xf0]  ;;  %v351_v30 = vld [vmem:[#allocation3 + $0x6c] sm:$0xf0]  ;;  %v357_v31 = vld [vmem:[#allocation3 + $0x68] sm:$0xf] }
   0xd   :  { %224 = vmatpush.bf16.msra.mxu1 %v378_v16  ;;  %v409_v32 = vld [vmem:[#allocation3 + $0x70] sm:$0xf0]  ;;  %v350_v33 = vor.u32 %v408_v28, %v349_v27  ;;  %v354_v34 = vor.u32 %v407_v29, %v351_v30  ;;  %v337_v36 = vld [vmem:[#allocation3 + $0x48] sm:$0xf]  ;;  %v404_v38 = vld [vmem:[#allocation3 + $0x4c] sm:$0xf] }
   0xe   :  { %238 = vmatpush.bf16.msra.mxu2 %v382_v17  ;;  %v358_v35 = vor.u32 %v409_v32, %v357_v31  ;;  %v405_v37 = vld [vmem:[#allocation3 + $0x50] sm:$0xf0]  ;;  %v339_v39 = vld [vmem:[#allocation3 + $0x54] sm:$0xf0]  ;;  %v345_v40 = vld [vmem:[#allocation3 + $0x50] sm:$0xf] }
   0xf   :  { %v406_v41 = vld [vmem:[#allocation3 + $0x58] sm:$0xf0]  ;;  %v338_v42 = vor.u32 %v405_v37, %v337_v36  ;;  %v342_v43 = vor.u32 %v404_v38, %v339_v39  ;;  %v325_v45 = vld [vmem:[#allocation3 + $0x30] sm:$0xf]  ;;  %v401_v47 = vld [vmem:[#allocation3 + $0x34] sm:$0xf] }
  0x10   :  { %211 = vmatpush.bf16.msra.mxu0 %v362_v24  ;;  %v346_v44 = vor.u32 %v406_v41, %v345_v40  ;;  %v402_v46 = vld [vmem:[#allocation3 + $0x38] sm:$0xf0]  ;;  %v327_v48 = vld [vmem:[#allocation3 + $0x3c] sm:$0xf0]  ;;  %v333_v49 = vld [vmem:[#allocation3 + $0x38] sm:$0xf] }
  0x11   :  { %225 = vmatpush.bf16.msra.mxu1 %v366_v25  ;;  %v403_v50 = vld [vmem:[#allocation3 + $0x40] sm:$0xf0]  ;;  %v326_v51 = vor.u32 %v402_v46, %v325_v45  ;;  %v330_v52 = vor.u32 %v401_v47, %v327_v48  ;;  %v313_v54 = vld [vmem:[#allocation3 + $0x18] sm:$0xf]  ;;  %v398_v56 = vld [vmem:[#allocation3 + $0x1c] sm:$0xf] }
  0x12   :  { %239 = vmatpush.bf16.msra.mxu2 %v370_v26  ;;  %v334_v53 = vor.u32 %v403_v50, %v333_v49  ;;  %v399_v55 = vld [vmem:[#allocation3 + $0x20] sm:$0xf0]  ;;  %v315_v57 = vld [vmem:[#allocation3 + $0x24] sm:$0xf0]  ;;  %v321_v58 = vld [vmem:[#allocation3 + $0x20] sm:$0xf] }
  0x13   :  { %v400_v59 = vld [vmem:[#allocation3 + $0x28] sm:$0xf0]  ;;  %v314_v60 = vor.u32 %v399_v55, %v313_v54  ;;  %v318_v61 = vor.u32 %v398_v56, %v315_v57  ;;  %v301_v63 = vld [vmem:[#allocation3] sm:$0xf]  ;;  %v395_v1 = vld [vmem:[#allocation3 + $0x4] sm:$0xf] }
  0x14   :  { %212 = vmatpush.bf16.msra.mxu0 %v350_v33  ;;  %v322_v62 = vor.u32 %v400_v59, %v321_v58  ;;  %v396_v0 = vld [vmem:[#allocation3 + $0x8] sm:$0xf0]  ;;  %v303_v2 = vld [vmem:[#allocation3 + $0xc] sm:$0xf0]  ;;  %v309_v3 = vld [vmem:[#allocation3 + $0x8] sm:$0xf] }
  0x15   :  { %226 = vmatpush.bf16.msra.mxu1 %v354_v34  ;;  %v397_v4 = vld [vmem:[#allocation3 + $0x10] sm:$0xf0]  ;;  %v302_v5 = vor.u32 %v396_v0, %v301_v63  ;;  %v46_v6 = vld [vmem:[%s495_s0] sm:$0xff]  ;;  %v47_v7 = vld [vmem:[%s495_s0 + $0x8] sm:$0xff]  ;;  %v306_v8 = vor.u32 %v395_v1, %v303_v2 }
  0x16   :  { %240 = vmatpush.bf16.msra.mxu2 %v358_v35  ;;  %v310_v9 = vor.u32 %v397_v4, %v309_v3  ;;  %v48_v10 = vpack.c.bf16 %v47_v7, %v46_v6  ;;  %v272_v11 = vld [vmem:[%s497_s2] sm:$0x7] }
  0x17   :  { %v274_v12 = vperm.slane %v272_v11, 0  ;;  %v275_v13 = vperm.slane %v272_v11, 1  ;;  %v276_v19 = vperm.slane %v272_v11, 2 }
  0x18   :  { %213 = vmatpush.bf16.msra.mxu0 %v338_v42 }
  0x19   :  { %227 = vmatpush.bf16.msra.mxu1 %v342_v43 }
  0x1a   :  { %241 = vmatpush.bf16.msra.mxu2 %v346_v44 }
  0x1c   :  { %214 = vmatpush.bf16.msra.mxu0 %v326_v51 }
  0x1d   :  { %228 = vmatpush.bf16.msra.mxu1 %v330_v52 }
  0x1e   :  { %242 = vmatpush.bf16.msra.mxu2 %v334_v53 }
  0x20   :  { %215 = vmatpush.bf16.msra.mxu0 %v314_v60 }
  0x21   :  { %229 = vmatpush.bf16.msra.mxu1 %v318_v61 }
  0x22   :  { %243 = vmatpush.bf16.msra.mxu2 %v322_v62 }
  0x24   :  { %216 = vmatpush.bf16.msra.mxu0 %v302_v5 }
  0x25   :  { %230 = vmatpush.bf16.msra.mxu1 %v306_v8 }
  0x26   :  { %244 = vmatpush.bf16.msra.mxu2 %v310_v9 }
  0x27   :  { %217 = vmatmul.bf16.vlgmr.msra.gmra.mxu0 %v48_v10 }
  0x28   :  { %231 = vmatmul.bf16.vlgmr.msra.gmra.mxu1 %v48_v10 }
  0x29   :  { %245 = vmatmul.bf16.vlgmr.msra.gmra.mxu2 %v48_v10 }
  0xa4   :  { %v218_v14 = vpop.f32.mrf.mxu0 }
  0xa5   :  { %v280_v15 = vadd.f32 %v274_v12, %v218_v14  ;;  %v232_v16 = vpop.f32.mrf.mxu1 }
  0xa6   :  { %v281_v17 = vadd.f32 %v275_v13, %v232_v16 }
  0xa8   :  { %v286_v18 = vpack.c.bf16 %v281_v17, %v280_v15 }
  0xaa   :  { %290 = vst [vmem:[%s498_s3] sm:$0xff] %v286_v18 }
  0xac   :  { %v246_v20 = vpop.f32.mrf.mxu2  ;;  %v220_v22 = vpop.f32.mrf.mxu0 }
  0xad   :  { %v282_v21 = vadd.f32 %v276_v19, %v246_v20  ;;  %v283_v23 = vadd.f32 %v274_v12, %v220_v22  ;;  %v234_v24 = vpop.f32.mrf.mxu1 }
  0xae   :  { %v284_v26 = vadd.f32 %v275_v13, %v234_v24 }
  0xaf   :  { %v287_v25 = vpack.c.bf16 %v282_v21, %v282_v21 }
  0xb0   :  { %v288_v27 = vpack.c.bf16 %v284_v26, %v283_v23 }
  0xb1   :  { %291 = vst [vmem:[%s498_s3 + $0x8] sm:$0xf] %v287_v25 }
  0xb2   :  { %292 = vst [vmem:[%s498_s3 + $0xc] sm:$0xff] %v288_v27 }
  0xb4   :  { %v248_v28 = vpop.f32.mrf.mxu2 }
  0xb5   :  { %v285_v29 = vadd.f32 %v276_v19, %v248_v28 }
  0xb7   :  { %v289_v30 = vpack.c.bf16 %v285_v29, %v285_v29 }
  0xb9   :  { %293 = vst [vmem:[%s498_s3 + $0x14] sm:$0xf] %v289_v30 }
  0xba   :  { %298 = vsyncpa [#allocation4], 1 }

// kernel: decoder_forward.21
= control target key start
LH: loop header
LB: loop body
LE: loop exit
PB: predicated region body
PF: predicated region fallthrough
CT: control target
= control target key end

     0   :  { %v256_v18 = vmov 128.0   ;;  %s340_s1 = inlined_call_operand.vmem [shape: bf16[128,128], index: 1, kind: input, shape index: {}]   ;;  %s341_s2 = inlined_call_operand.vmem [shape: f32[1,128], index: 2, kind: input, shape index: {}]   ;;  %s342_s0 = inlined_call_operand.vmem [shape: bf16[16,128], index: 0, kind: input, shape index: {}]   ;;  %s343_s3 = inlined_call_operand.vmem [shape: f32[16,128], index: 3, kind: input, shape index: {}]   ;;  %s344_s4 = inlined_call_operand.vmem [shape: f32[1,128], index: 4, kind: input, shape index: {}]   ;;  %s345_s5 = inlined_call_operand.vmem [shape: f32[1,128], index: 5, kind: input, shape index: {}]   ;;  %s346_s6 = inlined_call_operand.vmem [shape: f32[16,128], index: 6, kind: output, shape index: {}]  }
   0x1   :  { %v245_v0 = vld [vmem:[%s340_s1 + $0x38] sm:$0xff]  ;;  %v244_v1 = vld [vmem:[%s340_s1 + $0x30] sm:$0xff]  ;;  %v243_v2 = vld [vmem:[%s340_s1 + $0x28] sm:$0xff]  ;;  %250 = vrcp.f32 %v256_v18 }
   0x2   :  { %103 = vmatpush.bf16.msra.mxu0 %v245_v0  ;;  %v242_v3 = vld [vmem:[%s340_s1 + $0x20] sm:$0xff]  ;;  %v241_v4 = vld [vmem:[%s340_s1 + $0x18] sm:$0xff]  ;;  %v240_v5 = vld [vmem:[%s340_s1 + $0x10] sm:$0xff] }
   0x3   :  { %v239_v6 = vld [vmem:[%s340_s1 + $0x8] sm:$0xff]  ;;  %v238_v7 = vld [vmem:[%s340_s1] sm:$0xff] }
   0x4   :  { %v237_v8 = vld [vmem:[%s342_s0] sm:$0xff]  ;;  %v133_v15 = vld [vmem:[%s343_s3 + $0x8] sm:$0xff] }
   0x5   :  { %v247_v9 = vld [vmem:[%s341_s2] ss:$0 sm:$0xff] }
   0x6   :  { %104 = vmatpush.bf16.msra.mxu0 %v244_v1  ;;  %v132_v11 = vld [vmem:[%s343_s3] sm:$0xff] }
   0x7   :  { %v251_v19 = vpop.eup %250  ;;  %v248_v47 = vld [vmem:[%s344_s4] ss:$0 sm:$0xff] }
   0x8   :  { %v141_v20 = vmul.f32 128.0, %v251_v19  ;;  %vm145_vm0 = vweird.f32 %v251_v19  ;;  %v249_v50 = vld [vmem:[%s345_s5] ss:$0 sm:$0xff] }
   0xa   :  { %105 = vmatpush.bf16.msra.mxu0 %v243_v2  ;;  %v142_v21 = vsub.f32 1.0, %v141_v20 }
   0xc   :  { %v143_v22 = vmul.f32 %v251_v19, %v142_v21 }
   0xe   :  { %106 = vmatpush.bf16.msra.mxu0 %v242_v3  ;;  %v144_v23 = vadd.f32 %v251_v19, %v143_v22 }
  0x10   :  { %v146_v24 = vsel %vm145_vm0, %v251_v19, %v144_v23 }
  0x12   :  { %107 = vmatpush.bf16.msra.mxu0 %v241_v4 }
  0x16   :  { %108 = vmatpush.bf16.msra.mxu0 %v240_v5 }
  0x1a   :  { %109 = vmatpush.bf16.msra.mxu0 %v239_v6 }
  0x1e   :  { %110 = vmatpush.bf16.msra.mxu0 %v238_v7 }
  0x21   :  { %111 = vmatmul.bf16.vlgmr.msra.gmra.mxu0 %v237_v8 }
  0x9e   :  { %v112_v10 = vpop.f32.mrf.mxu0 }
  0x9f   :  { %v130_v12 = vadd.f32 %v247_v9, %v112_v10 }
  0xa1   :  { %v134_v13 = vadd.f32 %v132_v11, %v130_v12 }
  0xa3   :  { %136 = vadd.xlane.f32.xlu0 %v134_v13 }
  0xa6   :  { %v114_v14 = vpop.f32.mrf.mxu0 }
  0xa7   :  { %v131_v16 = vadd.f32 %v247_v9, %v114_v14 }
  0xa9   :  { %v135_v17 = vadd.f32 %v133_v15, %v131_v16 }
  0xab   :  { %138 = vadd.xlane.f32.xlu0 %v135_v17 }
 0x116   :  { %v137_v25 = vpop.xlane.xlu0 %136 }
 0x117   :  { %v147_v26 = vmul.f32 %v146_v24, %v137_v25 }
 0x119   :  { %v149_v27 = vsub.f32 %v134_v13, %v147_v26 }
 0x11b   :  { %v151_v28 = vmul.f32 %v149_v27, %v149_v27 }
 0x11d   :  { %153 = vadd.xlane.f32.xlu1 %v151_v28 }
 0x11e   :  { %v139_v29 = vpop.xlane.xlu0 %138 }
 0x11f   :  { %v148_v30 = vmul.f32 %v146_v24, %v139_v29 }
 0x121   :  { %v150_v31 = vsub.f32 %v135_v17, %v148_v30 }
 0x123   :  { %v152_v32 = vmul.f32 %v150_v31, %v150_v31 }
 0x125   :  { %155 = vadd.xlane.f32.xlu1 %v152_v32 }
 0x190   :  { %v154_v33 = vpop.xlane.xlu1 %153 }
 0x191   :  { %v157_v34 = vmul.f32 %v154_v33, %v146_v24 }
 0x193   :  { %v159_v35 = vadd.f32 1e-05, %v157_v34 }
 0x195   :  { %252 = vrsqrt.f32 %v159_v35  ;;  %vm167_vm2 = vweird.f32 %v159_v35 }
 0x198   :  { %v156_v36 = vpop.xlane.xlu1 %155 }
 0x199   :  { %v158_v37 = vmul.f32 %v156_v36, %v146_v24 }
 0x19b   :  { %v253_v38 = vpop.eup %252  ;;  %v160_v39 = vadd.f32 1e-05, %v158_v37 }
 0x19c   :  { %v162_v40 = vmul.f32 %v253_v38, %v159_v35  ;;  %vm168_vm1 = vweird.f32 %v253_v38 }
 0x19d   :  { %254 = vrsqrt.f32 %v160_v39  ;;  %vm169_vm3 = vmor %vm167_vm2, %vm168_vm1  ;;  %vm177_vm5 = vweird.f32 %v160_v39 }
 0x19e   :  { %v163_v41 = vmul.f32 %v253_v38, %v162_v40 }
 0x1a0   :  { %v164_v42 = vmul.f32 0.5, %v163_v41 }
 0x1a2   :  { %v165_v43 = vsub.f32 1.5, %v164_v42 }
 0x1a3   :  { %v255_v44 = vpop.eup %254 }
 0x1a4   :  { %v166_v45 = vmul.f32 %v253_v38, %v165_v43  ;;  %v172_v46 = vmul.f32 %v255_v44, %v160_v39  ;;  %vm178_vm4 = vweird.f32 %v255_v44 }
 0x1a5   :  { %vm179_vm6 = vmor %vm177_vm5, %vm178_vm4 }
 0x1a6   :  { %v170_v48 = vsel %vm169_vm3, %v253_v38, %v166_v45  ;;  %v173_v49 = vmul.f32 %v255_v44, %v172_v46 }
 0x1a7   :  { %v181_v51 = vmul.f32 %v170_v48, %v149_v27 }
 0x1a8   :  { %v174_v52 = vmul.f32 0.5, %v173_v49 }
 0x1a9   :  { %v187_v53 = vmul.f32 %v248_v47, %v181_v51 }
 0x1aa   :  { %v175_v54 = vsub.f32 1.5, %v174_v52 }
 0x1ab   :  { %v193_v55 = vadd.f32 %v249_v50, %v187_v53 }
 0x1ac   :  { %v176_v56 = vmul.f32 %v255_v44, %v175_v54 }
 0x1ad   :  { %195 = vst [vmem:[%s346_s6] sm:$0xff] %v193_v55 }
 0x1ae   :  { %v180_v57 = vsel %vm179_vm6, %v255_v44, %v176_v56 }
 0x1af   :  { %v182_v58 = vmul.f32 %v180_v57, %v150_v31 }
 0x1b1   :  { %v188_v59 = vmul.f32 %v248_v47, %v182_v58 }
 0x1b3   :  { %v194_v60 = vadd.f32 %v249_v50, %v188_v59 }
 0x1b5   :  { %196 = vst [vmem:[%s346_s6 + $0x8] sm:$0xff] %v194_v60 }

// kernel: decoder_forward.22
= control target key start
LH: loop header
LB: loop body
LE: loop exit
PB: predicated region body
PF: predicated region fallthrough
CT: control target
= control target key end

     0   :  { %8 = vsyncpa [#allocation4], 0  ;;  %s218_s15 = smov [#allocation3]   ;;  %s219_s17 = smov 64   ;;  %s256_s0 = inlined_call_operand.vmem [shape: f32[16,128], index: 0, kind: input, shape index: {}]   ;;  %s257_s1 = inlined_call_operand.hbm [shape: bf16[128,128], index: 1, kind: input, shape index: {}]   ;;  %s258_s2 = inlined_call_operand.vmem [shape: f32[1,128], index: 2, kind: input, shape index: {}]   ;;  %s259_s3 = inlined_call_operand.vmem [shape: bf16[16,128], index: 3, kind: output, shape index: {}]  }
   0x1   :  { %s15_s14 = sshll.u32 %s257_s1, 4  ;;  %s17_s16 = sshll.u32 %s218_s15, 4  ;;  %s16_s14 = int_to_ptr.hbm [resolvable:$true] %s15_s14  ;;  %s18_s16 = int_to_ptr.vmem [resolvable:$true] %s17_s16 }
   0x2   :  { %s220_s18 = smov 4  }
   0x3   :  { %23 = dma.hbm_to_vmem [thread:$0]  %s16_s14, 1024, %s18_s16, [#allocation4], %s219_s17, %s219_s17, %s220_s18  }
   0x4   :  { %216 = dma.done.wait [#allocation4], 1024  }
   0x5   :  { %217 = vsyncadd [#allocation4], 4294966272  ;;  %v182_v0 = vld [vmem:[#allocation3 + $0x38] sm:$0xff]  ;;  %v181_v1 = vld [vmem:[#allocation3 + $0x30] sm:$0xff] }
   0x6   :  { %105 = vmatpush.bf16.msra.mxu0 %v182_v0  ;;  %v180_v2 = vld [vmem:[#allocation3 + $0x28] sm:$0xff]  ;;  %v179_v3 = vld [vmem:[#allocation3 + $0x20] sm:$0xff]  ;;  %v178_v4 = vld [vmem:[#allocation3 + $0x18] sm:$0xff] }
   0x7   :  { %v177_v5 = vld [vmem:[#allocation3 + $0x10] sm:$0xff]  ;;  %v176_v6 = vld [vmem:[#allocation3 + $0x8] sm:$0xff]  ;;  %v175_v7 = vld [vmem:[#allocation3] sm:$0xff] }
   0x8   :  { %v38_v8 = vld [vmem:[%s256_s0] sm:$0xff]  ;;  %v39_v9 = vld [vmem:[%s256_s0 + $0x8] sm:$0xff] }
   0x9   :  { %v40_v10 = vpack.c.bf16 %v39_v9, %v38_v8  ;;  %v191_v12 = vld [vmem:[%s258_s2] ss:$0 sm:$0xff] }
   0xa   :  { %106 = vmatpush.bf16.msra.mxu0 %v181_v1 }
   0xe   :  { %107 = vmatpush.bf16.msra.mxu0 %v180_v2 }
  0x12   :  { %108 = vmatpush.bf16.msra.mxu0 %v179_v3 }
  0x16   :  { %109 = vmatpush.bf16.msra.mxu0 %v178_v4 }
  0x1a   :  { %110 = vmatpush.bf16.msra.mxu0 %v177_v5 }
  0x1e   :  { %111 = vmatpush.bf16.msra.mxu0 %v176_v6 }
  0x22   :  { %112 = vmatpush.bf16.msra.mxu0 %v175_v7 }
  0x25   :  { %113 = vmatmul.bf16.vlgmr.msra.gmra.mxu0 %v40_v10 }
  0xa2   :  { %v114_v11 = vpop.f32.mrf.mxu0 }
  0xa3   :  { %v132_v14 = vadd.f32 %v191_v12, %v114_v11 }
  0xaa   :  { %v116_v13 = vpop.f32.mrf.mxu0 }
  0xab   :  { %v133_v15 = vadd.f32 %v191_v12, %v116_v13 }
  0xad   :  { %v186_v16 = vpack.c.bf16 %v133_v15, %v132_v14 }
  0xaf   :  { %187 = vst [vmem:[%s259_s3] sm:$0xff] %v186_v16  }
  0xb0   :  { %142 = vsyncpa [#allocation4], 1 }

// kernel: decoder_forward.20
= control target key start
LH: loop header
LB: loop body
LE: loop exit
PB: predicated region body
PF: predicated region fallthrough
CT: control target
= control target key end

     0   :  { %s1101_s18 = smov 0   ;;  %s1103_s19 = smov 0   ;;  %s1243_s0 = inlined_call_operand.vmem [shape: f32[8,8], index: 0, kind: input, shape index: {}]   ;;  %s1244_s1 = inlined_call_operand.vmem [shape: f32[2,1,8], index: 1, kind: input, shape index: {}]   ;;  %s1245_s2 = inlined_call_operand.vmem [shape: bf16[2,8,384], index: 2, kind: input, shape index: {}, may-alias: {2,3,4}]   ;;  %s1246_s3 = inlined_call_operand.vmem [shape: bf16[2,8,384], index: 3, kind: input, shape index: {}, may-alias: {2,3,4}]   ;;  %s1247_s4 = inlined_call_operand.vmem [shape: bf16[2,8,384], index: 4, kind: input, shape index: {}, may-alias: {2,3,4}]   ;;  %s1248_s5 = inlined_call_operand.vmem [shape: bf16[2,8,128], index: 5, kind: output, shape index: {}]  }
   0x1   :  { %s1105_s20 = smov 0  }
   0x2 LB: > { %s34_s21 = sadd.s32 1, %s1059_s19  ;;  %p965_p0 = scmp.ge.s32.totalorder %s1063_s20, 1  ;;  %s1063_s20 = sphi %s1105_s20, %s15_s20   ;;  %s1059_s19 = sphi %s1103_s19, %s1250_s19   ;;  %s1055_s18 = sphi %s1101_s18, %s1249_s18  }
   0x3   : > { %p36_p1 = scmp.ge.s32.totalorder %s34_s21, 2  ;;  %p275_p2 = scmp.lt.s32.totalorder %s1063_s20, 3 }
   0x5   : > { %s1252_s21 = smov (%p36_p1, %s34_s21), 0  ;;  %p276_p3 = pnand %p965_p0, %p275_p2 }
   0x6   : > { %p349_p4 = scmp.lt.s32.totalorder (!%p276_p3), %s1055_s18, 1  ;;  %s1066_s9 = smov (!%p276_p3), 64  }
   0x7   : > { %279 = sbr.rel (%p276_p3) target bundleno = 1180 (0x49c), region = 40  ;;  %s1067_s10 = smov (!%p276_p3), 96  }
   0x8   : > { %s1068_s11 = smov (!%p276_p3), 32  }
   0xc   : > { %s1254_s18 = smov (!%p349_p4, %s1055_s18), 1  ;;  %vm415_vm0 = vcmask 261120   ;;  %vm396_vm1 = vcmask 7168   ;;  %v1065_v3 = vmov -1e+30   ;;  %v409_v5 = vld [vmem:[%s1243_s0] sm:$0xff] }
   0xd   : > { %s1122_s22 = smul.u32 12, %s1254_s18  ;;  %s354_s25 = scalar_lea.vmem %s1244_s1, %s1254_s18  ;;  %397 = vst.msk [vmem:[#allocation2] sm:$0xff] %vm396_vm1, %v1065_v3  ;;  %vm436_vm2 = vcmask 64512   ;;  %v1069_v15 = vmov 0   ;;  %v1070_v16 = vmov 0.0   ;;  %vm471_vm3 = vcmask 1043456  }
   0xe   : > { %398 = vst.msk [vmem:[#allocation2 + $0x8] sm:$0xff] %vm396_vm1, %v1065_v3  ;;  %v1016_v4 = vld [vmem:[%s354_s25] ss:$0 sm:$0xff]  ;;  %1013 = vset.pattern.permute.xlu1 %v1069_v15  ;;  %1014 = vset.pattern.permute.xlu2 %v1069_v15  ;;  %vm582_vm4 = vcmask 523520   ;;  %vm667_vm5 = vcmask 785920   ;;  %vm752_vm6 = vcmask 1048320  }
   0xf   : > { %s884_s28 = scalar_lea.vmem %s1246_s3, %s1122_s22  ;;  %s363_s6 = scalar_lea.vmem %s1245_s2, %s1122_s22  ;;  %399 = vst.msk [vmem:[#allocation2 + $0x10] sm:$0xff] %vm396_vm1, %v1065_v3  ;;  %v1145_v6 = vadd.f32 %v1016_v4, %v409_v5  ;;  %1015 = vset.pattern.permute.xlu0 %v1069_v15  ;;  %vm792_vm7 = vcmask 523264   ;;  %vm794_vm8 = vcmask 785408  }
  0x10   : > { %v970_v0 = vld [vmem:[%s884_s28 + $0x4] sm:$0xf]  ;;  %v406_v2 = vld [vmem:[%s363_s6] sm:$0xf]  ;;  %400 = vst.msk [vmem:[#allocation2 + $0x18] sm:$0xff] %vm396_vm1, %v1065_v3  ;;  %s890_s14 = scalar_lea.vmem %s1247_s4, %s1122_s22  ;;  %s969_s15 = sshll.u32 %s1254_s18, 2 }
  0x11   : > { %v420_v1 = vsel %vm415_vm0, %v970_v0, 0  ;;  %v497_v10 = vunpack.c.l.b16 %v970_v0  ;;  %v492_v13 = vunpack.c.l.b16 %v406_v2  ;;  %405 = vst [vmem:[#allocation4] sm:$0xff] %v1070_v16  ;;  %v971_v23 = vld [vmem:[%s890_s14 + $0x8] sm:$0xf]  ;;  %s390_s22 = scalar_lea.vmem %s1248_s5, %s969_s15 }
  0x12   : > { %429 = vmatpush.bf16.xpose.msra.mxu0 %v420_v1  ;;  %401 = vst.msk [vmem:[#allocation3] sm:$0xff] %vm396_vm1, %v1070_v16  ;;  %v473_v24 = vsel %vm471_vm3, %v971_v23, 0  ;;  %v554_v50 = vunpack.c.l.b16 %v971_v23 }
  0x13   : > { %v498_v12 = vpack.c.b16 %v497_v10, %v497_v10  ;;  %v493_v14 = vpack.c.b16 %v492_v13, %v492_v13  ;;  %402 = vst.msk [vmem:[#allocation3 + $0x8] sm:$0xff] %vm396_vm1, %v1070_v16  ;;  %482 = vmatpush.bf16.msra.mxu1 %v473_v24 }
  0x14   : > { %403 = vst.msk [vmem:[#allocation3 + $0x10] sm:$0xff] %vm396_vm1, %v1070_v16  ;;  %v1157_v17 = vld [vmem:[#allocation2] sm:$0xff]  ;;  %v555_v52 = vpack.c.b16 %v554_v50, %v554_v50 }
  0x15   : > { %587 = vrot.lane.b32.xlu2 %v498_v12, %s1066_s9  ;;  %404 = vst.msk [vmem:[#allocation3 + $0x18] sm:$0xff] %vm396_vm1, %v1070_v16  ;;  %v521_v53 = vld [vmem:[#allocation2 + $0x8] sm:$0xff] }
  0x16   : > { %v609_v60 = vld [vmem:[#allocation2 + $0x10] sm:$0xff] }
  0x17   : > { %v694_v56 = vld [vmem:[#allocation2 + $0x18] sm:$0xff] }
  0x19   : > { %972 = vmatmul.msk.bf16.vlgmr.msra.gmra.mxu0 %vm415_vm0, %v406_v2 }
  0x1d   : > { %585 = vrot.lane.b32.xlu2 %v493_v14, %s1066_s9 }
  0x25   : > { %670 = vrot.lane.b32.xlu2 %v493_v14, %s1068_s11 }
  0x6f   : > { %v588_v25 = vpop.permute.xlu2 %587 }
  0x70   : > { %v593_v26 = vsel %vm415_vm0, %v588_v25, 0 }
  0x71   : > { %602 = vmatpush.bf16.xpose.msrb.mxu1 %v593_v26 }
  0x77   : > { %v586_v33 = vpop.permute.xlu2 %585 }
  0x7f   : > { %v671_v36 = vpop.permute.xlu2 %670 }
  0x96   : > { %v431_v7 = vpop.f32.mrf.mxu0 }
  0x97   : > { %v432_v8 = vadd.f32 %v431_v7, %v1145_v6 }
  0x99   : > { %v437_v9 = vsel %vm436_vm2, %v432_v8, -inf }
  0x9a   : > { %438 = vmax.xlane.f32.xlu0 %v437_v9 }
  0x9e   : > { %v433_v11 = vpop.f32.mrf.mxu0 }
  0xae   : > { %499 = vrot.lane.b32.xlu0 %v498_v12, %s1067_s10 }
 0x10d   : > { %v439_v18 = vpop.xlane.xlu0 %438 }
 0x10e   : > { %v1160_v19 = vmax.f32 %v1157_v17, %v439_v18 }
 0x110   : > { %v441_v20 = vsub.f32 %v1157_v17, %v1160_v19  ;;  %490 = vst.msk [vmem:[#allocation2] sm:$0xff] %vm396_vm1, %v1160_v19  ;;  %446 = vperm.xlu1 %1013, %v1160_v19  }
 0x112   : > { %v442_v62 = vmul.f32 1.442695, %v441_v20 }
 0x118   : > { %494 = vrot.lane.b32.xlu1 %v493_v14, %s1067_s10 }
 0x120   : > { %672 = vrot.lane.b32.xlu1 %v498_v12, %s1068_s11  ;;  %v500_v21 = vpop.permute.xlu0 %499 }
 0x121   : > { %v505_v22 = vsel %vm415_vm0, %v500_v21, 0 }
 0x122   : > { %514 = vmatpush.bf16.xpose.msra.mxu2 %v505_v22 }
 0x182   : > { %v447_v27 = vpop.permute.xlu1 %446 }
 0x183   : > { %v449_v28 = vsub.f32 %v432_v8, %v447_v27 }
 0x185   : > { %v450_v29 = vmul.f32 1.442695, %v449_v28 }
 0x187   : > { %1017 = vpow2.f32 %v450_v29 }
 0x188   : > { %1019 = vpow2.f32 %v442_v62 }
 0x18a   : > { %v495_v30 = vpop.permute.xlu1 %494 }
 0x18b   : > { %974 = vmatmul.msk.bf16.vlgmr.msra.gmra.mxu2 %vm415_vm0, %v495_v30 }
 0x18d   : > { %v1018_v31 = vpop.eup %1017 }
 0x18e   : > { %v467_v32 = vpack.c.bf16 %v1018_v31, %v1018_v31  ;;  %v1020_v2 = vpop.eup %1019  ;;  %v454_v4 = vsel %vm436_vm2, %v1018_v31, 0.0 }
 0x190   : > { %973 = vmatmul.msk.bf16.vlgmr.msra.gmra.mxu1 %vm436_vm2, %v467_v32 }
 0x192   : > { %v673_v34 = vpop.permute.xlu1 %672 }
 0x193   : > { %v678_v35 = vsel %vm415_vm0, %v673_v34, 0 }
 0x194   : > { %687 = vmatpush.bf16.xpose.msrb.mxu0 %v678_v35 }
 0x19b   : > { %978 = vmatmul.msk.bf16.vlgmr.msrb.gmra.mxu0 %vm415_vm0, %v671_v36  ;;  %v452_v36 = vld [vmem:[#allocation3] sm:$0xff] }
 0x1a0   : > { %976 = vmatmul.msk.bf16.vlgmr.msrb.gmra.mxu1 %vm415_vm0, %v586_v33 }
 0x20d   : > { %v1181_v37 = vpop.f32.mrf.mxu1 }
 0x20e   : > { %v516_v38 = vpop.f32.mrf.mxu2 }
 0x20f   : > { %v517_v39 = vadd.f32 %v516_v38, %v1145_v6 }
 0x211   : > { %v522_v40 = vsel %vm436_vm2, %v517_v39, -inf }
 0x212   : > { %523 = vmax.xlane.f32.xlu1 %v522_v40 }
 0x215   : > { %v486_v41 = vpop.f32.mrf.mxu1 }
 0x216   : > { %v518_v42 = vpop.f32.mrf.mxu2 }
 0x217   : > { %v538_v42 = vld [vmem:[#allocation3 + $0x8] sm:$0xff] }
 0x218   : > { %v689_v43 = vpop.f32.mrf.mxu0 }
 0x219   : > { %v1186_v44 = vadd.f32 %v689_v43, %v1145_v6 }
 0x21b   : > { %v695_v45 = vsel %vm436_vm2, %v1186_v44, -inf }
 0x21c   : > { %696 = vmax.xlane.f32.xlu0 %v695_v45 }
 0x21d   : > { %v604_v46 = vpop.f32.mrf.mxu1 }
 0x21e   : > { %v1191_v47 = vadd.f32 %v604_v46, %v1145_v6 }
 0x220   : > { %v610_v48 = vsel %vm436_vm2, %v1191_v47, -inf  ;;  %v691_v49 = vpop.f32.mrf.mxu0 }
 0x221   : > { %611 = vmax.xlane.f32.xlu2 %v610_v48  ;;  %v711_v48 = vld [vmem:[#allocation3 + $0x18] sm:$0xff] }
 0x225   : > { %v606_v51 = vpop.f32.mrf.mxu1 }
 0x22b   : > { %556 = vrot.lane.b32.xlu1 %v555_v52, %s1067_s10 }
 0x285   : > { %v524_v54 = vpop.xlane.xlu1 %523 }
 0x286   : > { %v525_v55 = vmax.f32 %v521_v53, %v524_v54 }
 0x288   : > { %584 = vst.msk [vmem:[#allocation2 + $0x8] sm:$0xff] %vm396_vm1, %v525_v55  ;;  %531 = vperm.xlu2 %1014, %v525_v55   ;;  %v526_v0 = vsub.f32 %v521_v53, %v525_v55 }
 0x28a   : > { %v527_v1 = vmul.f32 1.442695, %v526_v0 }
 0x28c   : > { %1021 = vpow2.f32 %v527_v1 }
 0x28f   : > { %v697_v57 = vpop.xlane.xlu0 %696 }
 0x290   : > { %v698_v58 = vmax.f32 %v694_v56, %v697_v57  ;;  %641 = vrot.lane.b32.xlu2 %v555_v52, %s1066_s9 }
 0x292   : > { %v699_v59 = vsub.f32 %v694_v56, %v698_v58  ;;  %754 = vst.msk [vmem:[#allocation2 + $0x18] sm:$0xff] %vm396_vm1, %v698_v58  ;;  %704 = vperm.xlu1 %1013, %v698_v58   ;;  %v1022_v3 = vpop.eup %1021 }
 0x293   : > { %v539_v43 = vmul.f32 %v1022_v3, %v538_v42 }
 0x294   : > { %v612_v61 = vpop.xlane.xlu2 %611  ;;  %v700_v9 = vmul.f32 1.442695, %v699_v59 }
 0x295   : > { %v613_v63 = vmax.f32 %v609_v60, %v612_v61 }
 0x297   : > { %669 = vst.msk [vmem:[#allocation2 + $0x10] sm:$0xff] %vm396_vm1, %v613_v63  ;;  %619 = vperm.xlu0 %1015, %v613_v63   ;;  %v614_v5 = vsub.f32 %v609_v60, %v613_v63 }
 0x298   : > { %726 = vrot.lane.b32.xlu2 %v555_v52, %s1068_s11 }
 0x299   : > { %v615_v6 = vmul.f32 1.442695, %v614_v5  ;;  %v626_v5 = vld [vmem:[#allocation3 + $0x10] sm:$0xff] }
 0x29b   : > { %1023 = vpow2.f32 %v615_v6 }
 0x29c   : > { %1025 = vpow2.f32 %v700_v9 }
 0x29d   : > { %v557_v7 = vpop.permute.xlu1 %556 }
 0x29e   : > { %v562_v8 = vsel %vm471_vm3, %v557_v7, 0 }
 0x29f   : > { %571 = vmatpush.bf16.msra.mxu3 %v562_v8 }
 0x2a0   : > { %463 = vperm.xlu2 %1014, %v1020_v2  }
 0x2a1   : > { %v1206_v10 = vpop.eup %1023 }
 0x2a2   : > { %v1026_v11 = vpop.eup %1025  ;;  %v627_v8 = vmul.f32 %v1206_v10, %v626_v5 }
 0x2a3   : > { %v712_v49 = vmul.f32 %v1026_v11, %v711_v48 }
 0x2a8   : > { %548 = vperm.xlu2 %1014, %v1022_v3  }
 0x2bc   : > { %455 = vadd.xlane.f32.xlu1 %v454_v4 }
 0x2d5   : > { %636 = vperm.xlu1 %1013, %v1206_v10  }
 0x2dd   : > { %721 = vperm.xlu1 %1013, %v1026_v11  }
 0x2e2   : > { %v532_v12 = vpop.permute.xlu2 %531 }
 0x2e3   : > { %v534_v13 = vsub.f32 %v517_v39, %v532_v12 }
 0x2e5   : > { %v535_v14 = vmul.f32 1.442695, %v534_v13 }
 0x2e7   : > { %1027 = vpow2.f32 %v535_v14 }
 0x2ea   : > { %v642_v15 = vpop.permute.xlu2 %641 }
 0x2eb   : > { %v647_v20 = vsel %vm471_vm3, %v642_v15, 0 }
 0x2ec   : > { %656 = vmatpush.bf16.msrb.mxu3 %v647_v20 }
 0x2ed   : > { %v1028_v16 = vpop.eup %1027 }
 0x2ee   : > { %v540_v17 = vsel %vm436_vm2, %v1028_v16, 0.0  ;;  %v552_v18 = vpack.c.bf16 %v1028_v16, %v1028_v16 }
 0x2ef   : > { %541 = vadd.xlane.f32.xlu0 %v540_v17 }
 0x2f0   : > { %975 = vmatmul.msk.bf16.vlgmr.msra.gmra.mxu3 %vm436_vm2, %v552_v18 }
 0x2f2   : > { %v727_v19 = vpop.permute.xlu2 %726 }
 0x2f3   : > { %v732_v21 = vsel %vm471_vm3, %v727_v19, 0 }
 0x2f4   : > { %741 = vmatpush.bf16.msrb.mxu2 %v732_v21 }
 0x2fa   : > { %v464_v22 = vpop.permute.xlu2 %463 }
 0x2fb   : > { %v466_v23 = vmul.f32 0.0, %v464_v22 }
 0x2fd   : > { %v488_v24 = vadd.f32 %v1181_v37, %v466_v23  ;;  %v453_v37 = vmul.f32 %v1020_v2, %v452_v36 }
 0x2ff   : > { %489 = vst.msk [vmem:[#allocation4] sm:$0xff] %vm415_vm0, %v488_v24 }
 0x302   : > { %v549_v61 = vpop.permute.xlu2 %548 }
 0x304   : > { %v705_v25 = vpop.permute.xlu1 %704 }
 0x305   : > { %v707_v26 = vsub.f32 %v1186_v44, %v705_v25 }
 0x306   : > { %v545_v62 = vld [vmem:[#allocation4] sm:$0xff] }
 0x307   : > { %v708_v27 = vmul.f32 1.442695, %v707_v26  ;;  %v551_v63 = vmul.f32 %v549_v61, %v545_v62 }
 0x309   : > { %1029 = vpow2.f32 %v708_v27  ;;  %v620_v28 = vpop.permute.xlu0 %619 }
 0x30a   : > { %v622_v29 = vsub.f32 %v1191_v47, %v620_v28 }
 0x30c   : > { %v623_v30 = vmul.f32 1.442695, %v622_v29 }
 0x30e   : > { %1031 = vpow2.f32 %v623_v30 }
 0x30f   : > { %v1030_v31 = vpop.eup %1029 }
 0x310   : > { %v713_v32 = vsel %vm436_vm2, %v1030_v31, 0.0  ;;  %v725_v33 = vpack.c.bf16 %v1030_v31, %v1030_v31 }
 0x311   : > { %714 = vadd.xlane.f32.xlu0 %v713_v32 }
 0x312   : > { %979 = vmatmul.msk.bf16.vlgmr.msrb.gmra.mxu2 %vm436_vm2, %v725_v33 }
 0x314   : > { %v1032_v34 = vpop.eup %1031 }
 0x315   : > { %v640_v35 = vpack.c.bf16 %v1032_v34, %v1032_v34  ;;  %v628_v55 = vsel %vm436_vm2, %v1032_v34, 0.0 }
 0x317   : > { %977 = vmatmul.msk.bf16.vlgmr.msrb.gmra.mxu3 %vm436_vm2, %v640_v35 }
 0x32f   : > { %v456_v38 = vpop.xlane.xlu1 %455 }
 0x330   : > { %v457_v39 = vadd.f32 %v456_v38, %v453_v37 }
 0x332   : > { %459 = vst.msk [vmem:[#allocation3] sm:$0xff] %vm396_vm1, %v457_v39 }
 0x339   : > { %v759_v40 = vld [vmem:[#allocation3] sm:$0xff] }
 0x33a   : > { %1033 = vrcp.f32 %v759_v40 }
 0x340   : > { %v1034_v41 = vpop.eup %1033 }
 0x341   : > { %763 = vperm.xlu1 %1013, %v1034_v41  }
 0x347   : > { %v637_v3 = vpop.permute.xlu1 %636 }
 0x34f   : > { %v722_v12 = vpop.permute.xlu1 %721 }
 0x362   : > { %v542_v44 = vpop.xlane.xlu0 %541 }
 0x363   : > { %v543_v45 = vadd.f32 %v542_v44, %v539_v43 }
 0x365   : > { %544 = vst.msk [vmem:[#allocation3 + $0x8] sm:$0xff] %vm396_vm1, %v543_v45 }
 0x36c   : > { %v767_v53 = vld [vmem:[#allocation3 + $0x8] sm:$0xff] }
 0x36d   : > { %1035 = vrcp.f32 %v767_v53 }
 0x373   : > { %v573_v46 = vpop.f32.mrf.mxu3  ;;  %v1036_v58 = vpop.eup %1035 }
 0x374   : > { %578 = vrot.lane.b32.xlu2 %v573_v46, %s1068_s11 }
 0x37b   : > { %v575_v47 = vpop.f32.mrf.mxu3 }
 0x384   : > { %v715_v50 = vpop.xlane.xlu0 %714 }
 0x385   : > { %v716_v51 = vadd.f32 %v715_v50, %v712_v49 }
 0x387   : > { %717 = vst.msk [vmem:[#allocation3 + $0x18] sm:$0xff] %vm396_vm1, %v716_v51 }
 0x38e   : > { %v783_v57 = vld [vmem:[#allocation3 + $0x18] sm:$0xff] }
 0x38f   : > { %1037 = vrcp.f32 %v783_v57 }
 0x395   : > { %v743_v52 = vpop.f32.mrf.mxu2  ;;  %v1038_v60 = vpop.eup %1037 }
 0x39a   : > { %v658_v54 = vpop.f32.mrf.mxu3 }
 0x39b   : > { %663 = vrot.lane.b32.xlu0 %v658_v54, %s1066_s9 }
 0x39d   : > { %v745_v56 = vpop.f32.mrf.mxu2  ;;  %629 = vadd.xlane.f32.xlu2 %v628_v55 }
 0x3a2   : > { %v660_v59 = vpop.f32.mrf.mxu3 }
 0x3a3   : > { %771 = vperm.xlu0 %1015, %v1036_v58  }
 0x3ab   : > { %787 = vperm.xlu0 %1015, %v1038_v60  }
 0x3b3   : > { %v764_v20 = vpop.permute.xlu1 %763 }
 0x3b5   : > { %748 = vrot.lane.b32.xlu2 %v743_v52, %s1067_s10 }
 0x3ce   : > { %v579_v0 = vpop.permute.xlu2 %578 }
 0x3cf   : > { %v581_v1 = vadd.f32 %v579_v0, %v551_v63 }
 0x3d1   : > { %583 = vst.msk [vmem:[#allocation4] sm:$0xff] %vm582_vm4, %v581_v1 }
 0x3d8   : > { %v633_v2 = vld [vmem:[#allocation4] sm:$0xff] }
 0x3d9   : > { %v639_v4 = vmul.f32 %v637_v3, %v633_v2 }
 0x40d   : > { %v664_v6 = vpop.permute.xlu0 %663 }
 0x40e   : > { %v666_v7 = vadd.f32 %v664_v6, %v639_v4 }
 0x410   : > { %668 = vst.msk [vmem:[#allocation4] sm:$0xff] %vm667_vm5, %v666_v7  ;;  %v630_v9 = vpop.xlane.xlu2 %629 }
 0x411   : > { %v631_v11 = vadd.f32 %v630_v9, %v627_v8 }
 0x413   : > { %632 = vst.msk [vmem:[#allocation3 + $0x10] sm:$0xff] %vm396_vm1, %v631_v11 }
 0x415   : > { %v772_v19 = vpop.permute.xlu0 %771 }
 0x417   : > { %v718_v13 = vld [vmem:[#allocation4] sm:$0xff] }
 0x418   : > { %v749_v14 = vpop.permute.xlu2 %748  ;;  %v724_v15 = vmul.f32 %v722_v12, %v718_v13 }
 0x41a   : > { %v751_v16 = vadd.f32 %v749_v14, %v724_v15  ;;  %v775_v17 = vld [vmem:[#allocation3 + $0x10] sm:$0xff] }
 0x41b   : > { %1039 = vrcp.f32 %v775_v17 }
 0x41c   : > { %753 = vst.msk [vmem:[#allocation4] sm:$0xff] %vm752_vm6, %v751_v16 }
 0x41d   : > { %v788_v24 = vpop.permute.xlu0 %787 }
 0x421   : > { %v1040_v18 = vpop.eup %1039 }
 0x422   : > { %779 = vperm.xlu1 %1013, %v1040_v18  }
 0x423   : > { %v758_v10 = vld [vmem:[#allocation4] sm:$0xff] }
 0x424   : > { %v766_v21 = vmul.f32 %v764_v20, %v758_v10  ;;  %v774_v22 = vmul.f32 %v772_v19, %v758_v10  ;;  %v790_v26 = vmul.f32 %v788_v24, %v758_v10 }
 0x426   : > { %v791_v27 = vsel %vm415_vm0, %v766_v21, %v774_v22 }
 0x494   : > { %v780_v23 = vpop.permute.xlu1 %779 }
 0x495   : > { %v782_v25 = vmul.f32 %v780_v23, %v758_v10 }
 0x497   : > { %v793_v28 = vsel %vm792_vm7, %v791_v27, %v782_v25 }
 0x498   : > { %v795_v29 = vsel %vm794_vm8, %v793_v28, %v790_v26 }
 0x499   : > { %v796_v30 = vpack.c.bf16 %v795_v29, %v795_v29 }
 0x49b   : > { %797 = vst [vmem:[%s390_s22] sm:$0xf] %v796_v30 }
 0x49c PF: > { %s15_s20 = sadd.s32 1, %s1063_s20   ;;  %s1249_s18 = smov %s1059_s19 }
 0x49d   : > { %p12_p5 = scmp.ge.s32.totalorder %s15_s20, 4   ;;  %s1250_s19 = smov %s1252_s21 }
 0x49f   :  { %14 = sbr.rel (!%p12_p5) target bundleno = 2 (0x2), region = 96 }

// kernel: decoder_forward.25
= control target key start
LH: loop header
LB: loop body
LE: loop exit
PB: predicated region body
PF: predicated region fallthrough
CT: control target
= control target key end

     0   :  { %11 = vsyncpa [#allocation4], 0  ;;  %s302_s24 = smov [#allocation3]   ;;  %s303_s26 = smov 64   ;;  %s368_s0 = inlined_call_operand.vmem [shape: bf16[16,128], index: 0, kind: input, shape index: {}]   ;;  %s369_s1 = inlined_call_operand.hbm [shape: bf16[128,128], index: 1, kind: input, shape index: {}]   ;;  %s370_s2 = inlined_call_operand.vmem [shape: f32[1,128], index: 2, kind: input, shape index: {}]   ;;  %s371_s3 = inlined_call_operand.vmem [shape: f32[16,128], index: 3, kind: input, shape index: {}]   ;;  %s372_s4 = inlined_call_operand.vmem [shape: f32[1,128], index: 4, kind: input, shape index: {}]   ;;  %s373_s5 = inlined_call_operand.vmem [shape: f32[1,128], index: 5, kind: input, shape index: {}]   ;;  %s374_s6 = inlined_call_operand.vmem [shape: f32[16,128], index: 6, kind: output, shape index: {}]  }
   0x1   :  { %s18_s23 = sshll.u32 %s369_s1, 4  ;;  %s20_s25 = sshll.u32 %s302_s24, 4  ;;  %s19_s23 = int_to_ptr.hbm [resolvable:$true] %s18_s23  ;;  %s21_s25 = int_to_ptr.vmem [resolvable:$true] %s20_s25 }
   0x2   :  { %s304_s27 = smov 4  }
   0x3   :  { %26 = dma.hbm_to_vmem [thread:$0]  %s19_s23, 1024, %s21_s25, [#allocation4], %s303_s26, %s303_s26, %s304_s27  }
   0x4   :  { %300 = dma.done.wait [#allocation4], 1024  }
   0x5   :  { %301 = vsyncadd [#allocation4], 4294966272  ;;  %v262_v0 = vld [vmem:[#allocation3 + $0x38] sm:$0xff]  ;;  %v261_v1 = vld [vmem:[#allocation3 + $0x30] sm:$0xff]  ;;  %v305_v18 = vmov 128.0  }
   0x6   :  { %119 = vmatpush.bf16.msra.mxu0 %v262_v0  ;;  %v260_v2 = vld [vmem:[#allocation3 + $0x28] sm:$0xff]  ;;  %v259_v3 = vld [vmem:[#allocation3 + $0x20] sm:$0xff]  ;;  %v258_v4 = vld [vmem:[#allocation3 + $0x18] sm:$0xff]  ;;  %270 = vrcp.f32 %v305_v18 }
   0x7   :  { %v257_v5 = vld [vmem:[#allocation3 + $0x10] sm:$0xff]  ;;  %v256_v6 = vld [vmem:[#allocation3 + $0x8] sm:$0xff]  ;;  %v255_v7 = vld [vmem:[#allocation3] sm:$0xff] }
   0x8   :  { %v254_v8 = vld [vmem:[%s368_s0] sm:$0xff]  ;;  %v149_v15 = vld [vmem:[%s371_s3 + $0x8] sm:$0xff] }
   0x9   :  { %v267_v9 = vld [vmem:[%s370_s2] ss:$0 sm:$0xff] }
   0xa   :  { %120 = vmatpush.bf16.msra.mxu0 %v261_v1  ;;  %v148_v11 = vld [vmem:[%s371_s3] sm:$0xff] }
   0xb   :  { %v268_v47 = vld [vmem:[%s372_s4] ss:$0 sm:$0xff] }
   0xc   :  { %v271_v19 = vpop.eup %270  ;;  %v269_v50 = vld [vmem:[%s373_s5] ss:$0 sm:$0xff] }
   0xd   :  { %v157_v20 = vmul.f32 128.0, %v271_v19  ;;  %vm161_vm0 = vweird.f32 %v271_v19 }
   0xe   :  { %121 = vmatpush.bf16.msra.mxu0 %v260_v2 }
   0xf   :  { %v158_v21 = vsub.f32 1.0, %v157_v20 }
  0x11   :  { %v159_v22 = vmul.f32 %v271_v19, %v158_v21 }
  0x12   :  { %122 = vmatpush.bf16.msra.mxu0 %v259_v3 }
  0x13   :  { %v160_v23 = vadd.f32 %v271_v19, %v159_v22 }
  0x15   :  { %v162_v24 = vsel %vm161_vm0, %v271_v19, %v160_v23 }
  0x16   :  { %123 = vmatpush.bf16.msra.mxu0 %v258_v4 }
  0x1a   :  { %124 = vmatpush.bf16.msra.mxu0 %v257_v5 }
  0x1e   :  { %125 = vmatpush.bf16.msra.mxu0 %v256_v6 }
  0x22   :  { %126 = vmatpush.bf16.msra.mxu0 %v255_v7 }
  0x25   :  { %127 = vmatmul.bf16.vlgmr.msra.gmra.mxu0 %v254_v8 }
  0xa2   :  { %v128_v10 = vpop.f32.mrf.mxu0 }
  0xa3   :  { %v146_v12 = vadd.f32 %v267_v9, %v128_v10 }
  0xa5   :  { %v150_v13 = vadd.f32 %v148_v11, %v146_v12 }
  0xa7   :  { %152 = vadd.xlane.f32.xlu0 %v150_v13 }
  0xaa   :  { %v130_v14 = vpop.f32.mrf.mxu0 }
  0xab   :  { %v147_v16 = vadd.f32 %v267_v9, %v130_v14 }
  0xad   :  { %v151_v17 = vadd.f32 %v149_v15, %v147_v16 }
  0xaf   :  { %154 = vadd.xlane.f32.xlu0 %v151_v17 }
 0x11a   :  { %v153_v25 = vpop.xlane.xlu0 %152 }
 0x11b   :  { %v163_v26 = vmul.f32 %v162_v24, %v153_v25 }
 0x11d   :  { %v165_v27 = vsub.f32 %v150_v13, %v163_v26 }
 0x11f   :  { %v167_v28 = vmul.f32 %v165_v27, %v165_v27 }
 0x121   :  { %169 = vadd.xlane.f32.xlu1 %v167_v28 }
 0x122   :  { %v155_v29 = vpop.xlane.xlu0 %154 }
 0x123   :  { %v164_v30 = vmul.f32 %v162_v24, %v155_v29 }
 0x125   :  { %v166_v31 = vsub.f32 %v151_v17, %v164_v30 }
 0x127   :  { %v168_v32 = vmul.f32 %v166_v31, %v166_v31 }
 0x129   :  { %171 = vadd.xlane.f32.xlu1 %v168_v32 }
 0x194   :  { %v170_v33 = vpop.xlane.xlu1 %169 }
 0x195   :  { %v173_v34 = vmul.f32 %v170_v33, %v162_v24 }
 0x197   :  { %v175_v35 = vadd.f32 1e-05, %v173_v34 }
 0x199   :  { %272 = vrsqrt.f32 %v175_v35  ;;  %vm183_vm2 = vweird.f32 %v175_v35 }
 0x19c   :  { %v172_v36 = vpop.xlane.xlu1 %171 }
 0x19d   :  { %v174_v37 = vmul.f32 %v172_v36, %v162_v24 }
 0x19f   :  { %v273_v38 = vpop.eup %272  ;;  %v176_v39 = vadd.f32 1e-05, %v174_v37 }
 0x1a0   :  { %v178_v40 = vmul.f32 %v273_v38, %v175_v35  ;;  %vm184_vm1 = vweird.f32 %v273_v38 }
 0x1a1   :  { %274 = vrsqrt.f32 %v176_v39  ;;  %vm185_vm3 = vmor %vm183_vm2, %vm184_vm1  ;;  %vm193_vm5 = vweird.f32 %v176_v39 }
 0x1a2   :  { %v179_v41 = vmul.f32 %v273_v38, %v178_v40 }
 0x1a4   :  { %v180_v42 = vmul.f32 0.5, %v179_v41 }
 0x1a6   :  { %v181_v43 = vsub.f32 1.5, %v180_v42 }
 0x1a7   :  { %v275_v44 = vpop.eup %274 }
 0x1a8   :  { %v182_v45 = vmul.f32 %v273_v38, %v181_v43  ;;  %v188_v46 = vmul.f32 %v275_v44, %v176_v39  ;;  %vm194_vm4 = vweird.f32 %v275_v44 }
 0x1a9   :  { %vm195_vm6 = vmor %vm193_vm5, %vm194_vm4 }
 0x1aa   :  { %v186_v48 = vsel %vm185_vm3, %v273_v38, %v182_v45  ;;  %v189_v49 = vmul.f32 %v275_v44, %v188_v46 }
 0x1ab   :  { %v197_v51 = vmul.f32 %v186_v48, %v165_v27 }
 0x1ac   :  { %v190_v52 = vmul.f32 0.5, %v189_v49 }
 0x1ad   :  { %v203_v53 = vmul.f32 %v268_v47, %v197_v51 }
 0x1ae   :  { %v191_v54 = vsub.f32 1.5, %v190_v52 }
 0x1af   :  { %v209_v55 = vadd.f32 %v269_v50, %v203_v53 }
 0x1b0   :  { %v192_v56 = vmul.f32 %v275_v44, %v191_v54 }
 0x1b1   :  { %211 = vst [vmem:[%s374_s6] sm:$0xff] %v209_v55 }
 0x1b2   :  { %v196_v57 = vsel %vm195_vm6, %v275_v44, %v192_v56 }
 0x1b3   :  { %v198_v58 = vmul.f32 %v196_v57, %v166_v31 }
 0x1b5   :  { %v204_v59 = vmul.f32 %v268_v47, %v198_v58 }
 0x1b7   :  { %v210_v60 = vadd.f32 %v269_v50, %v204_v59 }
 0x1b9   :  { %212 = vst [vmem:[%s374_s6 + $0x8] sm:$0xff] %v210_v60 }
 0x1ba   :  { %217 = vsyncpa [#allocation4], 1 }

// kernel: decoder_forward.32
= control target key start
LH: loop header
LB: loop body
LE: loop exit
PB: predicated region body
PF: predicated region fallthrough
CT: control target
= control target key end

     0   :  { %8 = vsyncpa [#allocation4], 0  ;;  %s458_s0 = inlined_call_operand.hbm [shape: f32[32,128], index: 0, kind: input, shape index: {}]   ;;  %s459_s1 = inlined_call_operand.hbm [shape: bf16[128,256], index: 1, kind: input, shape index: {}]   ;;  %s460_s2 = inlined_call_operand.vmem [shape: f32[1,256], index: 2, kind: input, shape index: {}]   ;;  %s461_s3 = inlined_call_operand.vmem [shape: bf16[32,256], index: 3, kind: output, shape index: {}]  }
   0x1   :  { %s14_s14 = sshll.u32 %s458_s0, 4  ;;  %s15_s14 = int_to_ptr.hbm [resolvable:$true] %s14_s14 }
   0x2   :  { %9 = vsyncpa [#allocation6], 0  ;;  %s413_s15 = smov [#allocation3]   ;;  %s27_s19 = sshll.u32 %s459_s1, 4  ;;  %s28_s19 = int_to_ptr.hbm [resolvable:$true] %s27_s19 }
   0x3   :  { %s16_s16 = sshll.u32 %s413_s15, 4  ;;  %s414_s20 = smov 128   ;;  %s17_s16 = int_to_ptr.vmem [resolvable:$true] %s16_s16 }
   0x4   :  { %s415_s21 = smov 8   ;;  %s416_s22 = smov [#allocation5]  }
   0x5   :  { %22 = dma.hbm_to_vmem [thread:$0]  %s15_s14, 512, %s17_s16, [#allocation4], %s414_s20, %s414_s20, %s415_s21  }
   0x6   :  { %s29_s23 = sshll.u32 %s416_s22, 4  ;;  %s30_s23 = int_to_ptr.vmem [resolvable:$true] %s29_s23 }
   0x7   :  { %35 = dma.hbm_to_vmem [thread:$0]  %s28_s19, 2048, %s30_s23, [#allocation6], %s414_s20, %s414_s20, %s415_s21  }
   0x8   :  { %409 = dma.done.wait [#allocation4], 512  }
   0x9   :  { %410 = vsyncadd [#allocation4], 4294966784 }
   0xa   :  { %411 = dma.done.wait [#allocation6], 2048  }
   0xb   :  { %412 = vsyncadd [#allocation6], 4294965248  ;;  %v319_v0 = vld [vmem:[#allocation5 + $0x70] sm:$0xf]  ;;  %v340_v1 = vld [vmem:[#allocation5 + $0x74] sm:$0xf0] }
   0xc   :  { %v339_v2 = vld [vmem:[#allocation5 + $0x74] sm:$0xf]  ;;  %v320_v3 = vor.u32 %v340_v1, %v319_v0  ;;  %v321_v4 = vld [vmem:[#allocation5 + $0x78] sm:$0xf0]  ;;  %v311_v5 = vld [vmem:[#allocation5 + $0x60] sm:$0xf] }
   0xd   :  { %v338_v6 = vld [vmem:[#allocation5 + $0x64] sm:$0xf0]  ;;  %v324_v7 = vor.u32 %v339_v2, %v321_v4  ;;  %v337_v8 = vld [vmem:[#allocation5 + $0x64] sm:$0xf]  ;;  %v313_v9 = vld [vmem:[#allocation5 + $0x68] sm:$0xf0] }
   0xe   :  { %168 = vmatpush.bf16.msra.mxu0 %v320_v3  ;;  %341 = vmatpush.bf16.msra.mxu2 %v320_v3  ;;  %v312_v10 = vor.u32 %v338_v6, %v311_v5  ;;  %v316_v11 = vor.u32 %v337_v8, %v313_v9  ;;  %v303_v12 = vld [vmem:[#allocation5 + $0x50] sm:$0xf]  ;;  %v336_v13 = vld [vmem:[#allocation5 + $0x54] sm:$0xf0]  ;;  %v335_v14 = vld [vmem:[#allocation5 + $0x54] sm:$0xf] }
   0xf   :  { %187 = vmatpush.bf16.msra.mxu1 %v324_v7  ;;  %349 = vmatpush.bf16.msra.mxu3 %v324_v7  ;;  %v305_v15 = vld [vmem:[#allocation5 + $0x58] sm:$0xf0]  ;;  %v304_v16 = vor.u32 %v336_v13, %v303_v12  ;;  %v295_v18 = vld [vmem:[#allocation5 + $0x40] sm:$0xf]  ;;  %v334_v19 = vld [vmem:[#allocation5 + $0x44] sm:$0xf0] }
  0x10   :  { %v308_v17 = vor.u32 %v335_v14, %v305_v15  ;;  %v333_v20 = vld [vmem:[#allocation5 + $0x44] sm:$0xf]  ;;  %v297_v21 = vld [vmem:[#allocation5 + $0x48] sm:$0xf0]  ;;  %v296_v22 = vor.u32 %v334_v19, %v295_v18  ;;  %v287_v24 = vld [vmem:[#allocation5 + $0x30] sm:$0xf] }
  0x11   :  { %v300_v23 = vor.u32 %v333_v20, %v297_v21  ;;  %v332_v25 = vld [vmem:[#allocation5 + $0x34] sm:$0xf0]  ;;  %v331_v26 = vld [vmem:[#allocation5 + $0x34] sm:$0xf]  ;;  %v289_v27 = vld [vmem:[#allocation5 + $0x38] sm:$0xf0] }
  0x12   :  { %169 = vmatpush.bf16.msra.mxu0 %v312_v10  ;;  %342 = vmatpush.bf16.msra.mxu2 %v312_v10  ;;  %v288_v28 = vor.u32 %v332_v25, %v287_v24  ;;  %v292_v29 = vor.u32 %v331_v26, %v289_v27  ;;  %v279_v30 = vld [vmem:[#allocation5 + $0x20] sm:$0xf]  ;;  %v330_v31 = vld [vmem:[#allocation5 + $0x24] sm:$0xf0]  ;;  %v329_v32 = vld [vmem:[#allocation5 + $0x24] sm:$0xf] }
  0x13   :  { %188 = vmatpush.bf16.msra.mxu1 %v316_v11  ;;  %350 = vmatpush.bf16.msra.mxu3 %v316_v11  ;;  %v281_v33 = vld [vmem:[#allocation5 + $0x28] sm:$0xf0]  ;;  %v280_v34 = vor.u32 %v330_v31, %v279_v30  ;;  %v271_v36 = vld [vmem:[#allocation5 + $0x10] sm:$0xf]  ;;  %v328_v37 = vld [vmem:[#allocation5 + $0x14] sm:$0xf0] }
  0x14   :  { %v284_v35 = vor.u32 %v329_v32, %v281_v33  ;;  %v327_v38 = vld [vmem:[#allocation5 + $0x14] sm:$0xf]  ;;  %v273_v39 = vld [vmem:[#allocation5 + $0x18] sm:$0xf0]  ;;  %v272_v40 = vor.u32 %v328_v37, %v271_v36  ;;  %v263_v42 = vld [vmem:[#allocation5] sm:$0xf] }
  0x15   :  { %v276_v41 = vor.u32 %v327_v38, %v273_v39  ;;  %v326_v43 = vld [vmem:[#allocation5 + $0x4] sm:$0xf0]  ;;  %v325_v44 = vld [vmem:[#allocation5 + $0x4] sm:$0xf]  ;;  %v265_v45 = vld [vmem:[#allocation5 + $0x8] sm:$0xf0] }
  0x16   :  { %170 = vmatpush.bf16.msra.mxu0 %v304_v16  ;;  %343 = vmatpush.bf16.msra.mxu2 %v304_v16  ;;  %v66_v46 = vld [vmem:[#allocation3] sm:$0xff]  ;;  %v264_v47 = vor.u32 %v326_v43, %v263_v42  ;;  %v67_v48 = vld [vmem:[#allocation3 + $0x8] sm:$0xff]  ;;  %v68_v49 = vld [vmem:[#allocation3 + $0x10] sm:$0xff]  ;;  %v268_v51 = vor.u32 %v325_v44, %v265_v45 }
  0x17   :  { %189 = vmatpush.bf16.msra.mxu1 %v308_v17  ;;  %351 = vmatpush.bf16.msra.mxu3 %v308_v17  ;;  %v69_v50 = vld [vmem:[#allocation3 + $0x18] sm:$0xff]  ;;  %v70_v52 = vpack.c.bf16 %v67_v48, %v66_v46  ;;  %v233_v54 = vld [vmem:[%s460_s2] sm:$0x3] }
  0x18   :  { %v71_v53 = vpack.c.bf16 %v69_v50, %v68_v49  ;;  %v235_v55 = vperm.slane %v233_v54, 0  ;;  %v236_v56 = vperm.slane %v233_v54, 1 }
  0x1a   :  { %171 = vmatpush.bf16.msra.mxu0 %v296_v22  ;;  %344 = vmatpush.bf16.msra.mxu2 %v296_v22 }
  0x1b   :  { %190 = vmatpush.bf16.msra.mxu1 %v300_v23  ;;  %352 = vmatpush.bf16.msra.mxu3 %v300_v23 }
  0x1e   :  { %172 = vmatpush.bf16.msra.mxu0 %v288_v28  ;;  %345 = vmatpush.bf16.msra.mxu2 %v288_v28 }
  0x1f   :  { %191 = vmatpush.bf16.msra.mxu1 %v292_v29  ;;  %353 = vmatpush.bf16.msra.mxu3 %v292_v29 }
  0x22   :  { %173 = vmatpush.bf16.msra.mxu0 %v280_v34  ;;  %346 = vmatpush.bf16.msra.mxu2 %v280_v34 }
  0x23   :  { %192 = vmatpush.bf16.msra.mxu1 %v284_v35  ;;  %354 = vmatpush.bf16.msra.mxu3 %v284_v35 }
  0x26   :  { %174 = vmatpush.bf16.msra.mxu0 %v272_v40  ;;  %347 = vmatpush.bf16.msra.mxu2 %v272_v40 }
  0x27   :  { %193 = vmatpush.bf16.msra.mxu1 %v276_v41  ;;  %355 = vmatpush.bf16.msra.mxu3 %v276_v41 }
  0x2a   :  { %175 = vmatpush.bf16.msra.mxu0 %v264_v47  ;;  %348 = vmatpush.bf16.msra.mxu2 %v264_v47 }
  0x2b   :  { %194 = vmatpush.bf16.msra.mxu1 %v268_v51  ;;  %356 = vmatpush.bf16.msra.mxu3 %v268_v51 }
  0x2d   :  { %176 = vmatmul.bf16.vlgmr.msra.gmra.mxu0 %v70_v52  ;;  %181 = vmatmul.bf16.vlgmr.msra.gmra.mxu2 %v71_v53 }
  0x2e   :  { %195 = vmatmul.bf16.vlgmr.msra.gmra.mxu1 %v70_v52  ;;  %200 = vmatmul.bf16.vlgmr.msra.gmra.mxu3 %v71_v53 }
  0xaa   :  { %v177_v57 = vpop.f32.mrf.mxu0 }
  0xab   :  { %v239_v58 = vadd.f32 %v235_v55, %v177_v57  ;;  %v196_v59 = vpop.f32.mrf.mxu1 }
  0xac   :  { %v240_v60 = vadd.f32 %v236_v56, %v196_v59 }
  0xae   :  { %v247_v61 = vpack.c.bf16 %v240_v60, %v239_v58 }
  0xb0   :  { %251 = vst [vmem:[%s461_s3] sm:$0xff] %v247_v61  ;;  %v182_v62 = vpop.f32.mrf.mxu2 }
  0xb1   :  { %v243_v63 = vadd.f32 %v235_v55, %v182_v62  ;;  %v201_v0 = vpop.f32.mrf.mxu3 }
  0xb2   :  { %v244_v1 = vadd.f32 %v236_v56, %v201_v0  ;;  %v179_v2 = vpop.f32.mrf.mxu0 }
  0xb3   :  { %v241_v3 = vadd.f32 %v235_v55, %v179_v2  ;;  %v198_v4 = vpop.f32.mrf.mxu1 }
  0xb4   :  { %v249_v5 = vpack.c.bf16 %v244_v1, %v243_v63  ;;  %v242_v6 = vadd.f32 %v236_v56, %v198_v4 }
  0xb6   :  { %253 = vst [vmem:[%s461_s3 + $0x10] sm:$0xff] %v249_v5  ;;  %v248_v7 = vpack.c.bf16 %v242_v6, %v241_v3 }
  0xb8   :  { %252 = vst [vmem:[%s461_s3 + $0x8] sm:$0xff] %v248_v7  ;;  %v184_v8 = vpop.f32.mrf.mxu2 }
  0xb9   :  { %v245_v9 = vadd.f32 %v235_v55, %v184_v8  ;;  %v203_v10 = vpop.f32.mrf.mxu3 }
  0xba   :  { %v246_v11 = vadd.f32 %v236_v56, %v203_v10 }
  0xbc   :  { %v250_v12 = vpack.c.bf16 %v246_v11, %v245_v9 }
  0xbe   :  { %254 = vst [vmem:[%s461_s3 + $0x18] sm:$0xff] %v250_v12 }
  0xbf   :  { %259 = vsyncpa [#allocation4], 1 }
  0xc0   :  { %260 = vsyncpa [#allocation6], 1 }

// kernel: decoder_forward.26
= control target key start
LH: loop header
LB: loop body
LE: loop exit
PB: predicated region body
PF: predicated region fallthrough
CT: control target
= control target key end

     0   :  { %8 = vsyncpa [#allocation4], 0  ;;  %s316_s15 = smov [#allocation3]   ;;  %s317_s17 = smov 128   ;;  %s357_s0 = inlined_call_operand.vmem [shape: f32[16,128], index: 0, kind: input, shape index: {}]   ;;  %s358_s1 = inlined_call_operand.hbm [shape: bf16[128,256], index: 1, kind: input, shape index: {}]   ;;  %s359_s2 = inlined_call_operand.vmem [shape: f32[1,256], index: 2, kind: input, shape index: {}]   ;;  %s360_s3 = inlined_call_operand.vmem [shape: bf16[16,256], index: 3, kind: output, shape index: {}]  }
   0x1   :  { %s15_s14 = sshll.u32 %s358_s1, 4  ;;  %s17_s16 = sshll.u32 %s316_s15, 4  ;;  %s16_s14 = int_to_ptr.hbm [resolvable:$true] %s15_s14  ;;  %s18_s16 = int_to_ptr.vmem [resolvable:$true] %s17_s16 }
   0x2   :  { %s318_s18 = smov 8  }
   0x3   :  { %23 = dma.hbm_to_vmem [thread:$0]  %s16_s14, 2048, %s18_s16, [#allocation4], %s317_s17, %s317_s17, %s318_s18  }
   0x4   :  { %314 = dma.done.wait [#allocation4], 2048  }
   0x5   :  { %315 = vsyncadd [#allocation4], 4294965248  ;;  %v265_v0 = vld [vmem:[#allocation3 + $0x70] sm:$0xf]  ;;  %v286_v1 = vld [vmem:[#allocation3 + $0x74] sm:$0xf0] }
   0x6   :  { %v285_v2 = vld [vmem:[#allocation3 + $0x74] sm:$0xf]  ;;  %v266_v3 = vor.u32 %v286_v1, %v265_v0  ;;  %v267_v4 = vld [vmem:[#allocation3 + $0x78] sm:$0xf0]  ;;  %v257_v5 = vld [vmem:[#allocation3 + $0x60] sm:$0xf] }
   0x7   :  { %v284_v6 = vld [vmem:[#allocation3 + $0x64] sm:$0xf0]  ;;  %v270_v7 = vor.u32 %v285_v2, %v267_v4  ;;  %v283_v8 = vld [vmem:[#allocation3 + $0x64] sm:$0xf]  ;;  %v259_v9 = vld [vmem:[#allocation3 + $0x68] sm:$0xf0] }
   0x8   :  { %141 = vmatpush.bf16.msra.mxu0 %v266_v3  ;;  %v258_v10 = vor.u32 %v284_v6, %v257_v5  ;;  %v262_v11 = vor.u32 %v283_v8, %v259_v9  ;;  %v249_v12 = vld [vmem:[#allocation3 + $0x50] sm:$0xf]  ;;  %v282_v13 = vld [vmem:[#allocation3 + $0x54] sm:$0xf0]  ;;  %v281_v14 = vld [vmem:[#allocation3 + $0x54] sm:$0xf] }
   0x9   :  { %155 = vmatpush.bf16.msra.mxu1 %v270_v7  ;;  %v251_v15 = vld [vmem:[#allocation3 + $0x58] sm:$0xf0]  ;;  %v250_v16 = vor.u32 %v282_v13, %v249_v12  ;;  %v241_v18 = vld [vmem:[#allocation3 + $0x40] sm:$0xf]  ;;  %v280_v19 = vld [vmem:[#allocation3 + $0x44] sm:$0xf0] }
   0xa   :  { %v254_v17 = vor.u32 %v281_v14, %v251_v15  ;;  %v279_v20 = vld [vmem:[#allocation3 + $0x44] sm:$0xf]  ;;  %v243_v21 = vld [vmem:[#allocation3 + $0x48] sm:$0xf0]  ;;  %v242_v22 = vor.u32 %v280_v19, %v241_v18  ;;  %v233_v24 = vld [vmem:[#allocation3 + $0x30] sm:$0xf] }
   0xb   :  { %v246_v23 = vor.u32 %v279_v20, %v243_v21  ;;  %v278_v25 = vld [vmem:[#allocation3 + $0x34] sm:$0xf0]  ;;  %v277_v26 = vld [vmem:[#allocation3 + $0x34] sm:$0xf]  ;;  %v235_v27 = vld [vmem:[#allocation3 + $0x38] sm:$0xf0] }
   0xc   :  { %142 = vmatpush.bf16.msra.mxu0 %v258_v10  ;;  %v234_v28 = vor.u32 %v278_v25, %v233_v24  ;;  %v238_v29 = vor.u32 %v277_v26, %v235_v27  ;;  %v225_v30 = vld [vmem:[#allocation3 + $0x20] sm:$0xf]  ;;  %v276_v31 = vld [vmem:[#allocation3 + $0x24] sm:$0xf0]  ;;  %v275_v32 = vld [vmem:[#allocation3 + $0x24] sm:$0xf] }
   0xd   :  { %156 = vmatpush.bf16.msra.mxu1 %v262_v11  ;;  %v227_v33 = vld [vmem:[#allocation3 + $0x28] sm:$0xf0]  ;;  %v226_v34 = vor.u32 %v276_v31, %v225_v30  ;;  %v217_v36 = vld [vmem:[#allocation3 + $0x10] sm:$0xf]  ;;  %v274_v37 = vld [vmem:[#allocation3 + $0x14] sm:$0xf0] }
   0xe   :  { %v230_v35 = vor.u32 %v275_v32, %v227_v33  ;;  %v273_v38 = vld [vmem:[#allocation3 + $0x14] sm:$0xf]  ;;  %v219_v39 = vld [vmem:[#allocation3 + $0x18] sm:$0xf0]  ;;  %v218_v40 = vor.u32 %v274_v37, %v217_v36  ;;  %v209_v42 = vld [vmem:[#allocation3] sm:$0xf] }
   0xf   :  { %v222_v41 = vor.u32 %v273_v38, %v219_v39  ;;  %v272_v43 = vld [vmem:[#allocation3 + $0x4] sm:$0xf0]  ;;  %v271_v44 = vld [vmem:[#allocation3 + $0x4] sm:$0xf]  ;;  %v211_v45 = vld [vmem:[#allocation3 + $0x8] sm:$0xf0] }
  0x10   :  { %143 = vmatpush.bf16.msra.mxu0 %v250_v16  ;;  %v210_v46 = vor.u32 %v272_v43, %v209_v42  ;;  %v42_v47 = vld [vmem:[%s357_s0] sm:$0xff]  ;;  %v43_v48 = vld [vmem:[%s357_s0 + $0x8] sm:$0xff]  ;;  %v214_v49 = vor.u32 %v271_v44, %v211_v45 }
  0x11   :  { %157 = vmatpush.bf16.msra.mxu1 %v254_v17  ;;  %v44_v50 = vpack.c.bf16 %v43_v48, %v42_v47  ;;  %v184_v51 = vld [vmem:[%s359_s2] sm:$0x3] }
  0x12   :  { %v186_v52 = vperm.slane %v184_v51, 0  ;;  %v187_v53 = vperm.slane %v184_v51, 1 }
  0x14   :  { %144 = vmatpush.bf16.msra.mxu0 %v242_v22 }
  0x15   :  { %158 = vmatpush.bf16.msra.mxu1 %v246_v23 }
  0x18   :  { %145 = vmatpush.bf16.msra.mxu0 %v234_v28 }
  0x19   :  { %159 = vmatpush.bf16.msra.mxu1 %v238_v29 }
  0x1c   :  { %146 = vmatpush.bf16.msra.mxu0 %v226_v34 }
  0x1d   :  { %160 = vmatpush.bf16.msra.mxu1 %v230_v35 }
  0x20   :  { %147 = vmatpush.bf16.msra.mxu0 %v218_v40 }
  0x21   :  { %161 = vmatpush.bf16.msra.mxu1 %v222_v41 }
  0x24   :  { %148 = vmatpush.bf16.msra.mxu0 %v210_v46 }
  0x25   :  { %162 = vmatpush.bf16.msra.mxu1 %v214_v49 }
  0x27   :  { %149 = vmatmul.bf16.vlgmr.msra.gmra.mxu0 %v44_v50 }
  0x28   :  { %163 = vmatmul.bf16.vlgmr.msra.gmra.mxu1 %v44_v50 }
  0xa4   :  { %v150_v54 = vpop.f32.mrf.mxu0 }
  0xa5   :  { %v190_v55 = vadd.f32 %v186_v52, %v150_v54  ;;  %v164_v56 = vpop.f32.mrf.mxu1 }
  0xa6   :  { %v191_v57 = vadd.f32 %v187_v53, %v164_v56 }
  0xa7   :  { %v194_v58 = vmax.f32 %v190_v55, 0.0 }
  0xa8   :  { %v195_v59 = vmax.f32 %v191_v57, 0.0 }
  0xaa   :  { %v198_v60 = vpack.c.bf16 %v195_v59, %v194_v58 }
  0xac   :  { %200 = vst [vmem:[%s360_s3] sm:$0xff] %v198_v60  ;;  %v152_v61 = vpop.f32.mrf.mxu0 }
  0xad   :  { %v192_v62 = vadd.f32 %v186_v52, %v152_v61  ;;  %v166_v63 = vpop.f32.mrf.mxu1 }
  0xae   :  { %v193_v0 = vadd.f32 %v187_v53, %v166_v63 }
  0xaf   :  { %v196_v1 = vmax.f32 %v192_v62, 0.0 }
  0xb0   :  { %v197_v2 = vmax.f32 %v193_v0, 0.0 }
  0xb2   :  { %v199_v3 = vpack.c.bf16 %v197_v2, %v196_v1 }
  0xb4   :  { %201 = vst [vmem:[%s360_s3 + $0x8] sm:$0xff] %v199_v3 }
  0xb5   :  { %206 = vsyncpa [#allocation4], 1 }

// kernel: decoder_forward.24
= control target key start
LH: loop header
LB: loop body
LE: loop exit
PB: predicated region body
PF: predicated region fallthrough
CT: control target
= control target key end

     0   :  { %s1049_s12 = smov 0   ;;  %s1051_s13 = smov 0   ;;  %s1207_s0 = inlined_call_operand.vmem [shape: bf16[2,8,128], index: 0, kind: input, shape index: {}]   ;;  %s1208_s1 = inlined_call_operand.vmem [shape: bf16[2,16,256], index: 1, kind: input, shape index: {}, may-alias: {1,2}]   ;;  %s1209_s2 = inlined_call_operand.vmem [shape: bf16[2,16,256], index: 2, kind: input, shape index: {}, may-alias: {1,2}]   ;;  %s1210_s3 = inlined_call_operand.vmem [shape: bf16[2,8,128], index: 3, kind: output, shape index: {}]  }
   0x1   :  { %s1053_s14 = smov 0   ;;  %s1055_s15 = smov 0  }
   0x2   :  { %s1057_s16 = smov 0  }
   0x3 LB: > { %s32_s17 = sadd.s32 1, %s1017_s15  ;;  %p76_p1 = scmp.ne.s32.totalorder %s1009_s13, %s1005_s12  ;;  %s1021_s16 = sphi %s1057_s16, %s13_s16   ;;  %s1017_s15 = sphi %s1055_s15, %s1215_s15   ;;  %s1013_s14 = sphi %s1053_s14, %s1214_s14   ;;  %s1009_s13 = sphi %s1051_s13, %s1213_s13   ;;  %s1005_s12 = sphi %s1049_s12, %s1212_s12  }
   0x4   : > { %p34_p0 = scmp.ge.s32.totalorder %s32_s17, 2  ;;  %p77_p2 = scmp.eq.s32.totalorder %s1021_s16, 0 }
   0x5   : > { %s69_s20 = sadd.s32 1, %s1009_s13  ;;  %p874_p5 = scmp.ge.s32.totalorder %s1021_s16, 2 }
   0x6   : > { %s1217_s17 = smov (%p34_p0, %s32_s17), 0  ;;  %p1080_p3 = por %p77_p2, %p76_p1 }
   0x7   : > { %s64_s19 = ssub.s32 %s1017_s15, %s1217_s17  ;;  %158 = sbr.rel (%p874_p5) target bundleno = 24 (0x18), region = 16 }
   0x8   : > { %p67_p4 = scmp.eq.s32.totalorder %s64_s19, 0 }
   0xa   : > { %s1088_s21 = scalar_select %p67_p4, %s1009_s13, %s69_s20  }
   0xc   : > { %171 = sbr.rel (!%p1080_p3) target bundleno = 18 (0x12), region = 24  ;;  %s173_s22 = sand.u32 (%p1080_p3), 1, %s1009_s13  }
   0xd   : > { %s906_s23 = sshll.u32 (%p1080_p3), %s1017_s15, 4  ;;  %s875_s24 = sshll.u32 (%p1080_p3), %s173_s22, 3 }
   0xe   : > { %s181_s27 = scalar_lea.vmem (%p1080_p3), %s1208_s1, %s906_s23  ;;  %s175_s28 = scalar_lea.vmem (%p1080_p3), [#allocation5], %s875_s24 }
   0xf   : > { %v198_v0 = vld [vmem:[%s181_s27] sm:$0xf] (%p1080_p3)  ;;  %v200_v1 = vld [vmem:[%s181_s27 + $0x8] sm:$0xf] (%p1080_p3) }
  0x10   : > { %199 = vst [vmem:[%s175_s28] sm:$0xf] (%p1080_p3), %v198_v0 }
  0x11   : > { %201 = vst [vmem:[%s175_s28 + $0x4] sm:$0xf] %v200_v1 }
  0x12 PF: > { %229 = sbr.rel (!%p1080_p3) target bundleno = 24 (0x18), region = 65  ;;  %s231_s29 = sand.u32 (%p1080_p3), 1, %s1009_s13  }
  0x13   : > { %s907_s30 = sshll.u32 (%p1080_p3), %s1017_s15, 4  ;;  %s878_s4 = sshll.u32 (%p1080_p3), %s231_s29, 3 }
  0x14   : > { %s792_s7 = scalar_lea.vmem (%p1080_p3), %s1209_s2, %s907_s30  ;;  %s233_s8 = scalar_lea.vmem (%p1080_p3), [#allocation6], %s878_s4 }
  0x15   : > { %v881_v2 = vld [vmem:[%s792_s7 + $0x4] sm:$0xf] (%p1080_p3)  ;;  %v882_v3 = vld [vmem:[%s792_s7 + $0xc] sm:$0xf] (%p1080_p3) }
  0x16   : > { %258 = vst [vmem:[%s233_s8] sm:$0xf] (%p1080_p3), %v881_v2 }
  0x17   : > { %260 = vst [vmem:[%s233_s8 + $0x4] sm:$0xf] %v882_v3 }
  0x18 PF: > { %p883_p6 = scmp.ge.s32.totalorder %s1021_s16, 1  ;;  %p287_p7 = scmp.lt.s32.totalorder %s1021_s16, 3 }
  0x1a   : > { %p288_p8 = pnand %p883_p6, %p287_p7 }
  0x1b   : > { %s294_s9 = sand.u32 (!%p288_p8), 1, %s1005_s12   ;;  %p337_p9 = scmp.lt.s32.totalorder (!%p288_p8), %s1013_s14, 1 }
  0x1c   : > { %291 = sbr.rel (%p288_p8) target bundleno = 1193 (0x4a9), region = 106  ;;  %s1109_s10 = sshll.u32 (!%p288_p8), %s294_s9, 3 }
  0x1d   : > { %s296_s11 = scalar_lea.vmem (!%p288_p8), [#allocation5], %s1109_s10  ;;  %s1024_s22 = smov (!%p288_p8), 64  }
  0x1e   : > { %s1025_s23 = smov (!%p288_p8), 96   ;;  %s1026_s24 = smov (!%p288_p8), 32  }
  0x1f   : > { %s303_s25 = scalar_lea.vmem (!%p288_p8), [#allocation6], %s1109_s10 }
  0x21   : > { %vm378_vm0 = vcmask 261120   ;;  %v908_v4 = vld [vmem:[%s296_s11] sm:$0xff]  ;;  %s1219_s14 = smov (!%p337_p9, %s1013_s14), 1  ;;  %vm358_vm1 = vcmask 7168   ;;  %v1023_v7 = vmov -1e+30  }
  0x22   : > { %v383_v5 = vsel %vm378_vm0, %v908_v4, 0  ;;  %s886_s18 = sshll.u32 %s1219_s14, 2  ;;  %359 = vst.msk [vmem:[#allocation2] sm:$0xff] %vm358_vm1, %v1023_v7  ;;  %vm399_vm2 = vcmask 130048   ;;  %544 = vrot.lane.b32.xlu2 %v908_v4, %s1024_s22  ;;  %v1027_v13 = vmov 0   ;;  %v1028_v14 = vmov 0.0  }
  0x23   : > { %392 = vmatpush.bf16.xpose.msra.mxu0 %v383_v5  ;;  %s343_s12 = scalar_lea.vmem %s1207_s0, %s886_s18  ;;  %360 = vst.msk [vmem:[#allocation2 + $0x8] sm:$0xff] %vm358_vm1, %v1023_v7  ;;  %956 = vset.pattern.permute.xlu1 %v1027_v13  ;;  %v909_v21 = vld [vmem:[%s303_s25] sm:$0xff]  ;;  %vm539_vm3 = vcmask 523520   ;;  %vm622_vm4 = vcmask 785920   ;;  %vm705_vm5 = vcmask 1048320   ;;  %vm745_vm6 = vcmask 523264   ;;  %s352_s28 = scalar_lea.vmem %s1210_s3, %s886_s18 }
  0x24   : > { %v368_v6 = vld [vmem:[%s343_s12] sm:$0xf]  ;;  %361 = vst.msk [vmem:[#allocation2 + $0x10] sm:$0xff] %vm358_vm1, %v1023_v7  ;;  %957 = vset.pattern.permute.xlu2 %v1027_v13  ;;  %958 = vset.pattern.permute.xlu0 %v1027_v13  ;;  %vm747_vm7 = vcmask 785408  }
  0x25   : > { %362 = vst.msk [vmem:[#allocation2 + $0x18] sm:$0xff] %vm358_vm1, %v1023_v7  ;;  %v457_v11 = vunpack.c.l.b16 %v368_v6  ;;  %447 = vmatpush.bf16.msra.mxu1 %v909_v21 }
  0x26   : > { %367 = vst [vmem:[#allocation4] sm:$0xff] %v1028_v14 }
  0x27   : > { %v458_v12 = vpack.c.b16 %v457_v11, %v457_v11  ;;  %363 = vst.msk [vmem:[#allocation3] sm:$0xff] %vm358_vm1, %v1028_v14 }
  0x28   : > { %364 = vst.msk [vmem:[#allocation3 + $0x8] sm:$0xff] %vm358_vm1, %v1028_v14 }
  0x29   : > { %365 = vst.msk [vmem:[#allocation3 + $0x10] sm:$0xff] %vm358_vm1, %v1028_v14  ;;  %v398_v15 = vld [vmem:[#allocation2] sm:$0xff] }
  0x2a   : > { %892 = vmatmul.msk.bf16.vlgmr.msra.gmra.mxu0 %vm378_vm0, %v368_v6  ;;  %542 = vrot.lane.b32.xlu2 %v458_v12, %s1024_s22  ;;  %366 = vst.msk [vmem:[#allocation3 + $0x18] sm:$0xff] %vm358_vm1, %v1028_v14  ;;  %v483_v45 = vld [vmem:[#allocation2 + $0x8] sm:$0xff] }
  0x2b   : > { %v566_v52 = vld [vmem:[#allocation2 + $0x10] sm:$0xff] }
  0x2c   : > { %v649_v48 = vld [vmem:[#allocation2 + $0x18] sm:$0xff] }
  0x32   : > { %625 = vrot.lane.b32.xlu2 %v458_v12, %s1026_s24 }
  0x7c   : > { %v545_v22 = vpop.permute.xlu2 %544 }
  0x7d   : > { %v550_v23 = vsel %vm378_vm0, %v545_v22, 0 }
  0x7e   : > { %559 = vmatpush.bf16.xpose.msrb.mxu1 %v550_v23 }
  0x84   : > { %v543_v30 = vpop.permute.xlu2 %542 }
  0x8c   : > { %v626_v33 = vpop.permute.xlu2 %625 }
  0xa7   : > { %v394_v8 = vpop.f32.mrf.mxu0 }
  0xa8   : > { %v400_v9 = vsel %vm399_vm2, %v394_v8, -inf }
  0xa9   : > { %401 = vmax.xlane.f32.xlu0 %v400_v9 }
  0xaf   : > { %v396_v10 = vpop.f32.mrf.mxu0 }
  0xbd   : > { %461 = vrot.lane.b32.xlu0 %v908_v4, %s1025_s23 }
 0x11c   : > { %v402_v16 = vpop.xlane.xlu0 %401 }
 0x11d   : > { %v403_v17 = vmax.f32 %v398_v15, %v402_v16 }
 0x11f   : > { %v404_v18 = vsub.f32 %v398_v15, %v403_v17  ;;  %455 = vst.msk [vmem:[#allocation2] sm:$0xff] %vm358_vm1, %v403_v17  ;;  %409 = vperm.xlu1 %956, %v403_v17  }
 0x121   : > { %v405_v54 = vmul.f32 1.442695, %v404_v18 }
 0x127   : > { %459 = vrot.lane.b32.xlu1 %v458_v12, %s1025_s23 }
 0x12f   : > { %627 = vrot.lane.b32.xlu1 %v908_v4, %s1026_s24  ;;  %v462_v19 = vpop.permute.xlu0 %461 }
 0x130   : > { %v467_v20 = vsel %vm378_vm0, %v462_v19, 0 }
 0x131   : > { %476 = vmatpush.bf16.xpose.msra.mxu2 %v467_v20 }
 0x191   : > { %v410_v24 = vpop.permute.xlu1 %409 }
 0x192   : > { %v412_v25 = vsub.f32 %v394_v8, %v410_v24 }
 0x194   : > { %v413_v26 = vmul.f32 1.442695, %v412_v25  ;;  %v415_v25 = vld [vmem:[#allocation3] sm:$0xff] }
 0x196   : > { %959 = vpow2.f32 %v413_v26 }
 0x197   : > { %961 = vpow2.f32 %v405_v54 }
 0x199   : > { %v460_v27 = vpop.permute.xlu1 %459 }
 0x19a   : > { %898 = vmatmul.msk.bf16.vlgmr.msra.gmra.mxu2 %vm378_vm0, %v460_v27 }
 0x19c   : > { %v960_v28 = vpop.eup %959 }
 0x19d   : > { %v430_v29 = vpack.c.bf16 %v960_v28, %v960_v28  ;;  %v962_v58 = vpop.eup %961  ;;  %v417_v60 = vsel %vm399_vm2, %v960_v28, 0.0 }
 0x19e   : > { %v416_v26 = vmul.f32 %v962_v58, %v415_v25 }
 0x19f   : > { %897 = vmatmul.msk.bf16.vlgmr.msra.gmra.mxu1 %vm399_vm2, %v430_v29 }
 0x1a1   : > { %v628_v31 = vpop.permute.xlu1 %627 }
 0x1a2   : > { %v633_v32 = vsel %vm378_vm0, %v628_v31, 0  ;;  %v500_v31 = vld [vmem:[#allocation3 + $0x8] sm:$0xff] }
 0x1a3   : > { %642 = vmatpush.bf16.xpose.msrb.mxu0 %v633_v32 }
 0x1aa   : > { %902 = vmatmul.msk.bf16.vlgmr.msrb.gmra.mxu0 %vm378_vm0, %v626_v33 }
 0x1af   : > { %900 = vmatmul.msk.bf16.vlgmr.msrb.gmra.mxu1 %vm378_vm0, %v543_v30 }
 0x21c   : > { %v1147_v34 = vpop.f32.mrf.mxu1 }
 0x21d   : > { %v478_v35 = vpop.f32.mrf.mxu2 }
 0x21e   : > { %v484_v36 = vsel %vm399_vm2, %v478_v35, -inf }
 0x21f   : > { %485 = vmax.xlane.f32.xlu1 %v484_v36 }
 0x224   : > { %v451_v37 = vpop.f32.mrf.mxu1 }
 0x225   : > { %v480_v38 = vpop.f32.mrf.mxu2  ;;  %v666_v37 = vld [vmem:[#allocation3 + $0x18] sm:$0xff] }
 0x227   : > { %v1150_v39 = vpop.f32.mrf.mxu0 }
 0x228   : > { %v650_v40 = vsel %vm399_vm2, %v1150_v39, -inf }
 0x229   : > { %651 = vmax.xlane.f32.xlu0 %v650_v40 }
 0x22c   : > { %v1154_v41 = vpop.f32.mrf.mxu1 }
 0x22d   : > { %v567_v42 = vsel %vm399_vm2, %v1154_v41, -inf }
 0x22e   : > { %568 = vmax.xlane.f32.xlu2 %v567_v42 }
 0x22f   : > { %v646_v43 = vpop.f32.mrf.mxu0 }
 0x234   : > { %v563_v44 = vpop.f32.mrf.mxu1 }
 0x238   : > { %515 = vrot.lane.b32.xlu1 %v909_v21, %s1025_s23 }
 0x292   : > { %v486_v46 = vpop.xlane.xlu1 %485 }
 0x293   : > { %v487_v47 = vmax.f32 %v483_v45, %v486_v46 }
 0x295   : > { %541 = vst.msk [vmem:[#allocation2 + $0x8] sm:$0xff] %vm358_vm1, %v487_v47  ;;  %493 = vperm.xlu2 %957, %v487_v47   ;;  %v488_v56 = vsub.f32 %v483_v45, %v487_v47 }
 0x297   : > { %v489_v57 = vmul.f32 1.442695, %v488_v56 }
 0x299   : > { %963 = vpow2.f32 %v489_v57 }
 0x29c   : > { %v652_v49 = vpop.xlane.xlu0 %651 }
 0x29d   : > { %v653_v50 = vmax.f32 %v649_v48, %v652_v49  ;;  %598 = vrot.lane.b32.xlu2 %v909_v21, %s1024_s22 }
 0x29f   : > { %v654_v51 = vsub.f32 %v649_v48, %v653_v50  ;;  %707 = vst.msk [vmem:[#allocation2 + $0x18] sm:$0xff] %vm358_vm1, %v653_v50  ;;  %659 = vperm.xlu1 %956, %v653_v50   ;;  %v964_v59 = vpop.eup %963 }
 0x2a0   : > { %v501_v32 = vmul.f32 %v964_v59, %v500_v31 }
 0x2a1   : > { %v569_v53 = vpop.xlane.xlu2 %568  ;;  %v655_v0 = vmul.f32 1.442695, %v654_v51 }
 0x2a2   : > { %v570_v55 = vmax.f32 %v566_v52, %v569_v53 }
 0x2a4   : > { %624 = vst.msk [vmem:[#allocation2 + $0x10] sm:$0xff] %vm358_vm1, %v570_v55  ;;  %576 = vperm.xlu0 %958, %v570_v55   ;;  %v571_v61 = vsub.f32 %v566_v52, %v570_v55 }
 0x2a5   : > { %681 = vrot.lane.b32.xlu2 %v909_v21, %s1026_s24 }
 0x2a6   : > { %v572_v62 = vmul.f32 1.442695, %v571_v61 }
 0x2a8   : > { %965 = vpow2.f32 %v572_v62 }
 0x2a9   : > { %967 = vpow2.f32 %v655_v0 }
 0x2aa   : > { %v516_v63 = vpop.permute.xlu1 %515 }
 0x2ab   : > { %528 = vmatpush.bf16.msra.mxu3 %v516_v63 }
 0x2ad   : > { %426 = vperm.xlu2 %957, %v962_v58   ;;  %v583_v58 = vld [vmem:[#allocation3 + $0x10] sm:$0xff] }
 0x2ae   : > { %v1165_v1 = vpop.eup %965 }
 0x2af   : > { %v968_v2 = vpop.eup %967  ;;  %v584_v61 = vmul.f32 %v1165_v1, %v583_v58 }
 0x2b0   : > { %v667_v38 = vmul.f32 %v968_v2, %v666_v37 }
 0x2b5   : > { %510 = vperm.xlu2 %957, %v964_v59  }
 0x2c9   : > { %418 = vadd.xlane.f32.xlu1 %v417_v60 }
 0x2e2   : > { %593 = vperm.xlu1 %956, %v1165_v1  }
 0x2ea   : > { %676 = vperm.xlu1 %956, %v968_v2  }
 0x2ef   : > { %v494_v3 = vpop.permute.xlu2 %493 }
 0x2f0   : > { %v496_v4 = vsub.f32 %v478_v35, %v494_v3 }
 0x2f2   : > { %v497_v5 = vmul.f32 1.442695, %v496_v4 }
 0x2f4   : > { %969 = vpow2.f32 %v497_v5 }
 0x2f7   : > { %v599_v6 = vpop.permute.xlu2 %598 }
 0x2f8   : > { %611 = vmatpush.bf16.msrb.mxu3 %v599_v6 }
 0x2fa   : > { %v970_v7 = vpop.eup %969 }
 0x2fb   : > { %v502_v8 = vsel %vm399_vm2, %v970_v7, 0.0  ;;  %v514_v9 = vpack.c.bf16 %v970_v7, %v970_v7 }
 0x2fc   : > { %503 = vadd.xlane.f32.xlu0 %v502_v8 }
 0x2fd   : > { %899 = vmatmul.msk.bf16.vlgmr.msra.gmra.mxu3 %vm399_vm2, %v514_v9 }
 0x2ff   : > { %v682_v10 = vpop.permute.xlu2 %681 }
 0x300   : > { %694 = vmatpush.bf16.msrb.mxu2 %v682_v10 }
 0x307   : > { %v427_v11 = vpop.permute.xlu2 %426 }
 0x308   : > { %v429_v12 = vmul.f32 0.0, %v427_v11 }
 0x30a   : > { %v453_v13 = vadd.f32 %v1147_v34, %v429_v12 }
 0x30c   : > { %454 = vst.msk [vmem:[#allocation4] sm:$0xff] %vm378_vm0, %v453_v13 }
 0x30f   : > { %v511_v50 = vpop.permute.xlu2 %510 }
 0x311   : > { %v660_v14 = vpop.permute.xlu1 %659 }
 0x312   : > { %v662_v15 = vsub.f32 %v1150_v39, %v660_v14 }
 0x313   : > { %v507_v51 = vld [vmem:[#allocation4] sm:$0xff] }
 0x314   : > { %v663_v16 = vmul.f32 1.442695, %v662_v15  ;;  %v513_v52 = vmul.f32 %v511_v50, %v507_v51 }
 0x316   : > { %971 = vpow2.f32 %v663_v16  ;;  %v577_v17 = vpop.permute.xlu0 %576 }
 0x317   : > { %v579_v18 = vsub.f32 %v1154_v41, %v577_v17 }
 0x319   : > { %v580_v19 = vmul.f32 1.442695, %v579_v18 }
 0x31b   : > { %973 = vpow2.f32 %v580_v19 }
 0x31c   : > { %v972_v20 = vpop.eup %971 }
 0x31d   : > { %v668_v21 = vsel %vm399_vm2, %v972_v20, 0.0  ;;  %v680_v22 = vpack.c.bf16 %v972_v20, %v972_v20 }
 0x31e   : > { %669 = vadd.xlane.f32.xlu0 %v668_v21 }
 0x31f   : > { %903 = vmatmul.msk.bf16.vlgmr.msrb.gmra.mxu2 %vm399_vm2, %v680_v22 }
 0x321   : > { %v974_v23 = vpop.eup %973 }
 0x322   : > { %v597_v24 = vpack.c.bf16 %v974_v23, %v974_v23  ;;  %v585_v44 = vsel %vm399_vm2, %v974_v23, 0.0 }
 0x324   : > { %901 = vmatmul.msk.bf16.vlgmr.msrb.gmra.mxu3 %vm399_vm2, %v597_v24 }
 0x33c   : > { %v419_v27 = vpop.xlane.xlu1 %418 }
 0x33d   : > { %v420_v28 = vadd.f32 %v419_v27, %v416_v26 }
 0x33f   : > { %422 = vst.msk [vmem:[#allocation3] sm:$0xff] %vm358_vm1, %v420_v28 }
 0x346   : > { %v712_v29 = vld [vmem:[#allocation3] sm:$0xff] }
 0x347   : > { %975 = vrcp.f32 %v712_v29 }
 0x34d   : > { %v976_v30 = vpop.eup %975 }
 0x34e   : > { %716 = vperm.xlu1 %956, %v976_v30  }
 0x354   : > { %v594_v56 = vpop.permute.xlu1 %593 }
 0x35c   : > { %v677_v0 = vpop.permute.xlu1 %676 }
 0x36f   : > { %v504_v33 = vpop.xlane.xlu0 %503 }
 0x370   : > { %v505_v34 = vadd.f32 %v504_v33, %v501_v32 }
 0x372   : > { %506 = vst.msk [vmem:[#allocation3 + $0x8] sm:$0xff] %vm358_vm1, %v505_v34 }
 0x379   : > { %v720_v42 = vld [vmem:[#allocation3 + $0x8] sm:$0xff] }
 0x37a   : > { %977 = vrcp.f32 %v720_v42 }
 0x380   : > { %v530_v35 = vpop.f32.mrf.mxu3  ;;  %v978_v47 = vpop.eup %977 }
 0x381   : > { %535 = vrot.lane.b32.xlu2 %v530_v35, %s1026_s24 }
 0x388   : > { %v532_v36 = vpop.f32.mrf.mxu3 }
 0x391   : > { %v670_v39 = vpop.xlane.xlu0 %669 }
 0x392   : > { %v671_v40 = vadd.f32 %v670_v39, %v667_v38 }
 0x394   : > { %672 = vst.msk [vmem:[#allocation3 + $0x18] sm:$0xff] %vm358_vm1, %v671_v40 }
 0x39b   : > { %v736_v46 = vld [vmem:[#allocation3 + $0x18] sm:$0xff] }
 0x39c   : > { %979 = vrcp.f32 %v736_v46 }
 0x3a2   : > { %v696_v41 = vpop.f32.mrf.mxu2  ;;  %v980_v49 = vpop.eup %979 }
 0x3a7   : > { %v613_v43 = vpop.f32.mrf.mxu3 }
 0x3a8   : > { %618 = vrot.lane.b32.xlu0 %v613_v43, %s1024_s22 }
 0x3aa   : > { %v698_v45 = vpop.f32.mrf.mxu2  ;;  %586 = vadd.xlane.f32.xlu2 %v585_v44 }
 0x3af   : > { %v615_v48 = vpop.f32.mrf.mxu3 }
 0x3b0   : > { %724 = vperm.xlu0 %958, %v978_v47  }
 0x3b8   : > { %740 = vperm.xlu0 %958, %v980_v49  }
 0x3c0   : > { %v717_v9 = vpop.permute.xlu1 %716 }
 0x3c2   : > { %701 = vrot.lane.b32.xlu2 %v696_v41, %s1025_s23 }
 0x3db   : > { %v536_v53 = vpop.permute.xlu2 %535 }
 0x3dc   : > { %v538_v54 = vadd.f32 %v536_v53, %v513_v52 }
 0x3de   : > { %540 = vst.msk [vmem:[#allocation4] sm:$0xff] %vm539_vm3, %v538_v54 }
 0x3e5   : > { %v590_v55 = vld [vmem:[#allocation4] sm:$0xff] }
 0x3e6   : > { %v596_v57 = vmul.f32 %v594_v56, %v590_v55 }
 0x41a   : > { %v619_v59 = vpop.permute.xlu0 %618 }
 0x41b   : > { %v621_v60 = vadd.f32 %v619_v59, %v596_v57 }
 0x41d   : > { %623 = vst.msk [vmem:[#allocation4] sm:$0xff] %vm622_vm4, %v621_v60  ;;  %v587_v62 = vpop.xlane.xlu2 %586 }
 0x41e   : > { %v588_v63 = vadd.f32 %v587_v62, %v584_v61 }
 0x420   : > { %589 = vst.msk [vmem:[#allocation3 + $0x10] sm:$0xff] %vm358_vm1, %v588_v63 }
 0x422   : > { %v725_v8 = vpop.permute.xlu0 %724 }
 0x424   : > { %v673_v2 = vld [vmem:[#allocation4] sm:$0xff] }
 0x425   : > { %v702_v3 = vpop.permute.xlu2 %701  ;;  %v679_v4 = vmul.f32 %v677_v0, %v673_v2 }
 0x427   : > { %v704_v5 = vadd.f32 %v702_v3, %v679_v4  ;;  %v728_v6 = vld [vmem:[#allocation3 + $0x10] sm:$0xff] }
 0x428   : > { %981 = vrcp.f32 %v728_v6 }
 0x429   : > { %706 = vst.msk [vmem:[#allocation4] sm:$0xff] %vm705_vm5, %v704_v5 }
 0x42a   : > { %v741_v13 = vpop.permute.xlu0 %740 }
 0x42e   : > { %v982_v7 = vpop.eup %981 }
 0x42f   : > { %732 = vperm.xlu1 %956, %v982_v7  }
 0x430   : > { %v711_v1 = vld [vmem:[#allocation4] sm:$0xff] }
 0x431   : > { %v719_v10 = vmul.f32 %v717_v9, %v711_v1  ;;  %v727_v11 = vmul.f32 %v725_v8, %v711_v1  ;;  %v743_v15 = vmul.f32 %v741_v13, %v711_v1 }
 0x433   : > { %v744_v16 = vsel %vm378_vm0, %v719_v10, %v727_v11 }
 0x4a1   : > { %v733_v12 = vpop.permute.xlu1 %732 }
 0x4a2   : > { %v735_v14 = vmul.f32 %v733_v12, %v711_v1 }
 0x4a4   : > { %v746_v17 = vsel %vm745_vm6, %v744_v16, %v735_v14 }
 0x4a5   : > { %v748_v18 = vsel %vm747_vm7, %v746_v17, %v743_v15 }
 0x4a6   : > { %v749_v19 = vpack.c.bf16 %v748_v18, %v748_v18 }
 0x4a8   : > { %750 = vst [vmem:[%s352_s28] sm:$0xf] %v749_v19 }
 0x4a9 PF: > { %s13_s16 = sadd.s32 1, %s1021_s16   ;;  %s1212_s12 = smov %s1009_s13 }
 0x4aa   : > { %p10_p10 = scmp.ge.s32.totalorder %s13_s16, 4   ;;  %s1213_s13 = smov %s1088_s21 }
 0x4ab   : > { %s1214_s14 = smov %s1017_s15  ;;  %s1215_s15 = smov %s1217_s17 }
 0x4ac   :  { %12 = sbr.rel (!%p10_p10) target bundleno = 3 (0x3), region = 174 }

// kernel: decoder_forward.27
= control target key start
LH: loop header
LB: loop body
LE: loop exit
PB: predicated region body
PF: predicated region fallthrough
CT: control target
= control target key end

     0   :  { %11 = vsyncpa [#allocation4], 0  ;;  %s429_s24 = smov [#allocation3]   ;;  %s430_s26 = smov 64   ;;  %s504_s0 = inlined_call_operand.vmem [shape: bf16[16,256], index: 0, kind: input, shape index: {}]   ;;  %s505_s1 = inlined_call_operand.hbm [shape: bf16[256,128], index: 1, kind: input, shape index: {}]   ;;  %s506_s2 = inlined_call_operand.vmem [shape: f32[1,128], index: 2, kind: input, shape index: {}]   ;;  %s507_s3 = inlined_call_operand.vmem [shape: f32[16,128], index: 3, kind: input, shape index: {}]   ;;  %s508_s4 = inlined_call_operand.vmem [shape: f32[1,128], index: 4, kind: input, shape index: {}]   ;;  %s509_s5 = inlined_call_operand.vmem [shape: f32[1,128], index: 5, kind: input, shape index: {}]   ;;  %s510_s6 = inlined_call_operand.vmem [shape: f32[16,128], index: 6, kind: output, shape index: {}]  }
   0x1   :  { %s18_s23 = sshll.u32 %s505_s1, 4  ;;  %s20_s25 = sshll.u32 %s429_s24, 4  ;;  %s19_s23 = int_to_ptr.hbm [resolvable:$true] %s18_s23  ;;  %s21_s25 = int_to_ptr.vmem [resolvable:$true] %s20_s25 }
   0x2   :  { %s431_s27 = smov 4  }
   0x3   :  { %26 = dma.hbm_to_vmem [thread:$0]  %s19_s23, 2048, %s21_s25, [#allocation4], %s430_s26, %s430_s26, %s431_s27  }
   0x4   :  { %427 = dma.done.wait [#allocation4], 2048  }
   0x5   :  { %428 = vsyncadd [#allocation4], 4294965248  ;;  %v381_v0 = vld [vmem:[#allocation3 + $0x38] sm:$0xff]  ;;  %v380_v2 = vld [vmem:[#allocation3 + $0x30] sm:$0xff]  ;;  %v432_v35 = vmov 128.0  }
   0x6   :  { %v389_v1 = vld [vmem:[#allocation3 + $0x78] sm:$0xff]  ;;  %187 = vmatpush.bf16.msra.mxu0 %v381_v0  ;;  %v388_v3 = vld [vmem:[#allocation3 + $0x70] sm:$0xff]  ;;  %v379_v4 = vld [vmem:[#allocation3 + $0x28] sm:$0xff]  ;;  %397 = vrcp.f32 %v432_v35 }
   0x7   :  { %201 = vmatpush.bf16.msra.mxu1 %v389_v1  ;;  %v387_v5 = vld [vmem:[#allocation3 + $0x68] sm:$0xff]  ;;  %v378_v6 = vld [vmem:[#allocation3 + $0x20] sm:$0xff]  ;;  %v377_v8 = vld [vmem:[#allocation3 + $0x18] sm:$0xff] }
   0x8   :  { %v386_v7 = vld [vmem:[#allocation3 + $0x60] sm:$0xff]  ;;  %v385_v9 = vld [vmem:[#allocation3 + $0x58] sm:$0xff]  ;;  %v376_v10 = vld [vmem:[#allocation3 + $0x10] sm:$0xff] }
   0x9   :  { %v384_v11 = vld [vmem:[#allocation3 + $0x50] sm:$0xff]  ;;  %v375_v12 = vld [vmem:[#allocation3 + $0x8] sm:$0xff]  ;;  %v374_v14 = vld [vmem:[#allocation3] sm:$0xff] }
   0xa   :  { %188 = vmatpush.bf16.msra.mxu0 %v380_v2  ;;  %v383_v13 = vld [vmem:[#allocation3 + $0x48] sm:$0xff]  ;;  %v382_v15 = vld [vmem:[#allocation3 + $0x40] sm:$0xff] }
   0xb   :  { %202 = vmatpush.bf16.msra.mxu1 %v388_v3  ;;  %v302_v16 = vld [vmem:[%s504_s0] sm:$0xf]  ;;  %v373_v17 = vld [vmem:[%s504_s0 + $0x4] sm:$0xf0]  ;;  %v372_v18 = vld [vmem:[%s504_s0 + $0x4] sm:$0xf] }
   0xc   :  { %v304_v19 = vld [vmem:[%s504_s0 + $0x8] sm:$0xf0]  ;;  %v303_v20 = vor.u32 %v373_v17, %v302_v16  ;;  %v394_v22 = vld [vmem:[%s506_s2] ss:$0 sm:$0xff]  ;;  %v398_v36 = vpop.eup %397 }
   0xd   :  { %v307_v21 = vor.u32 %v372_v18, %v304_v19  ;;  %v230_v26 = vld [vmem:[%s507_s3] sm:$0xff]  ;;  %v231_v32 = vld [vmem:[%s507_s3 + $0x8] sm:$0xff]  ;;  %v239_v37 = vmul.f32 128.0, %v398_v36  ;;  %vm243_vm0 = vweird.f32 %v398_v36 }
   0xe   :  { %189 = vmatpush.bf16.msra.mxu0 %v379_v4  ;;  %v395_v0 = vld [vmem:[%s508_s4] ss:$0 sm:$0xff] }
   0xf   :  { %203 = vmatpush.bf16.msra.mxu1 %v387_v5  ;;  %v240_v38 = vsub.f32 1.0, %v239_v37  ;;  %v396_v3 = vld [vmem:[%s509_s5] ss:$0 sm:$0xff] }
  0x11   :  { %v241_v39 = vmul.f32 %v398_v36, %v240_v38 }
  0x12   :  { %190 = vmatpush.bf16.msra.mxu0 %v378_v6 }
  0x13   :  { %204 = vmatpush.bf16.msra.mxu1 %v386_v7  ;;  %v242_v40 = vadd.f32 %v398_v36, %v241_v39 }
  0x15   :  { %v244_v41 = vsel %vm243_vm0, %v398_v36, %v242_v40 }
  0x16   :  { %191 = vmatpush.bf16.msra.mxu0 %v377_v8 }
  0x17   :  { %205 = vmatpush.bf16.msra.mxu1 %v385_v9 }
  0x1a   :  { %192 = vmatpush.bf16.msra.mxu0 %v376_v10 }
  0x1b   :  { %206 = vmatpush.bf16.msra.mxu1 %v384_v11 }
  0x1e   :  { %193 = vmatpush.bf16.msra.mxu0 %v375_v12 }
  0x1f   :  { %207 = vmatpush.bf16.msra.mxu1 %v383_v13 }
  0x22   :  { %194 = vmatpush.bf16.msra.mxu0 %v374_v14 }
  0x23   :  { %208 = vmatpush.bf16.msra.mxu1 %v382_v15 }
  0x25   :  { %195 = vmatmul.bf16.vlgmr.msra.gmra.mxu0 %v303_v20 }
  0x26   :  { %209 = vmatmul.bf16.vlgmr.msra.gmra.mxu1 %v307_v21 }
  0xa2   :  { %v196_v23 = vpop.f32.mrf.mxu0 }
  0xa3   :  { %v210_v24 = vpop.f32.mrf.mxu1 }
  0xa4   :  { %v211_v25 = vadd.f32 %v210_v24, %v196_v23 }
  0xa6   :  { %v228_v27 = vadd.f32 %v394_v22, %v211_v25 }
  0xa8   :  { %v232_v28 = vadd.f32 %v230_v26, %v228_v27 }
  0xaa   :  { %234 = vadd.xlane.f32.xlu0 %v232_v28  ;;  %v198_v29 = vpop.f32.mrf.mxu0 }
  0xab   :  { %v212_v30 = vpop.f32.mrf.mxu1 }
  0xac   :  { %v213_v31 = vadd.f32 %v212_v30, %v198_v29 }
  0xae   :  { %v229_v33 = vadd.f32 %v394_v22, %v213_v31 }
  0xb0   :  { %v233_v34 = vadd.f32 %v231_v32, %v229_v33 }
  0xb2   :  { %236 = vadd.xlane.f32.xlu0 %v233_v34 }
 0x11d   :  { %v235_v42 = vpop.xlane.xlu0 %234 }
 0x11e   :  { %v245_v43 = vmul.f32 %v244_v41, %v235_v42 }
 0x120   :  { %v247_v44 = vsub.f32 %v232_v28, %v245_v43 }
 0x122   :  { %v249_v45 = vmul.f32 %v247_v44, %v247_v44 }
 0x124   :  { %251 = vadd.xlane.f32.xlu1 %v249_v45 }
 0x125   :  { %v237_v46 = vpop.xlane.xlu0 %236 }
 0x126   :  { %v246_v47 = vmul.f32 %v244_v41, %v237_v46 }
 0x128   :  { %v248_v48 = vsub.f32 %v233_v34, %v246_v47 }
 0x12a   :  { %v250_v49 = vmul.f32 %v248_v48, %v248_v48 }
 0x12c   :  { %253 = vadd.xlane.f32.xlu1 %v250_v49 }
 0x197   :  { %v252_v50 = vpop.xlane.xlu1 %251 }
 0x198   :  { %v255_v51 = vmul.f32 %v252_v50, %v244_v41 }
 0x19a   :  { %v257_v52 = vadd.f32 1e-05, %v255_v51 }
 0x19c   :  { %399 = vrsqrt.f32 %v257_v52  ;;  %vm265_vm2 = vweird.f32 %v257_v52 }
 0x19f   :  { %v254_v53 = vpop.xlane.xlu1 %253 }
 0x1a0   :  { %v256_v54 = vmul.f32 %v254_v53, %v244_v41 }
 0x1a2   :  { %v400_v55 = vpop.eup %399  ;;  %v258_v56 = vadd.f32 1e-05, %v256_v54 }
 0x1a3   :  { %v260_v57 = vmul.f32 %v400_v55, %v257_v52  ;;  %vm266_vm1 = vweird.f32 %v400_v55 }
 0x1a4   :  { %401 = vrsqrt.f32 %v258_v56  ;;  %vm267_vm3 = vmor %vm265_vm2, %vm266_vm1  ;;  %vm275_vm5 = vweird.f32 %v258_v56 }
 0x1a5   :  { %v261_v58 = vmul.f32 %v400_v55, %v260_v57 }
 0x1a7   :  { %v262_v59 = vmul.f32 0.5, %v261_v58 }
 0x1a9   :  { %v263_v60 = vsub.f32 1.5, %v262_v59 }
 0x1aa   :  { %v402_v61 = vpop.eup %401 }
 0x1ab   :  { %v264_v62 = vmul.f32 %v400_v55, %v263_v60  ;;  %v270_v63 = vmul.f32 %v402_v61, %v258_v56  ;;  %vm276_vm4 = vweird.f32 %v402_v61 }
 0x1ac   :  { %vm277_vm6 = vmor %vm275_vm5, %vm276_vm4 }
 0x1ad   :  { %v268_v1 = vsel %vm267_vm3, %v400_v55, %v264_v62  ;;  %v271_v2 = vmul.f32 %v402_v61, %v270_v63 }
 0x1ae   :  { %v279_v4 = vmul.f32 %v268_v1, %v247_v44 }
 0x1af   :  { %v272_v5 = vmul.f32 0.5, %v271_v2 }
 0x1b0   :  { %v285_v6 = vmul.f32 %v395_v0, %v279_v4 }
 0x1b1   :  { %v273_v7 = vsub.f32 1.5, %v272_v5 }
 0x1b2   :  { %v291_v8 = vadd.f32 %v396_v3, %v285_v6 }
 0x1b3   :  { %v274_v9 = vmul.f32 %v402_v61, %v273_v7 }
 0x1b4   :  { %293 = vst [vmem:[%s510_s6] sm:$0xff] %v291_v8 }
 0x1b5   :  { %v278_v10 = vsel %vm277_vm6, %v402_v61, %v274_v9 }
 0x1b6   :  { %v280_v11 = vmul.f32 %v278_v10, %v248_v48 }
 0x1b8   :  { %v286_v12 = vmul.f32 %v395_v0, %v280_v11 }
 0x1ba   :  { %v292_v13 = vadd.f32 %v396_v3, %v286_v12 }
 0x1bc   :  { %294 = vst [vmem:[%s510_s6 + $0x8] sm:$0xff] %v292_v13 }
 0x1bd   :  { %299 = vsyncpa [#allocation4], 1 }

// kernel: decoder_forward.37
= control target key start
LH: loop header
LB: loop body
LE: loop exit
PB: predicated region body
PF: predicated region fallthrough
CT: control target
= control target key end

     0   :  { %s403_s1 = inlined_call_operand.vmem [shape: bf16[128,256], index: 1, kind: input, shape index: {}]   ;;  %s404_s0 = inlined_call_operand.vmem [shape: f32[16,128], index: 0, kind: input, shape index: {}]   ;;  %s405_s2 = inlined_call_operand.vmem [shape: f32[1,256], index: 2, kind: input, shape index: {}]   ;;  %s406_s3 = inlined_call_operand.vmem [shape: f32[16,256], index: 3, kind: output, shape index: {}]  }
   0x1   :  { %v244_v0 = vld [vmem:[%s403_s1 + $0x70] sm:$0xf]  ;;  %v265_v1 = vld [vmem:[%s403_s1 + $0x74] sm:$0xf0]  ;;  %v264_v2 = vld [vmem:[%s403_s1 + $0x74] sm:$0xf] }
   0x2   :  { %v245_v3 = vor.u32 %v265_v1, %v244_v0  ;;  %v246_v4 = vld [vmem:[%s403_s1 + $0x78] sm:$0xf0]  ;;  %v236_v5 = vld [vmem:[%s403_s1 + $0x60] sm:$0xf]  ;;  %v263_v6 = vld [vmem:[%s403_s1 + $0x64] sm:$0xf0] }
   0x3   :  { %v249_v7 = vor.u32 %v264_v2, %v246_v4  ;;  %v262_v8 = vld [vmem:[%s403_s1 + $0x64] sm:$0xf]  ;;  %v238_v9 = vld [vmem:[%s403_s1 + $0x68] sm:$0xf0]  ;;  %v237_v10 = vor.u32 %v263_v6, %v236_v5  ;;  %v228_v12 = vld [vmem:[%s403_s1 + $0x50] sm:$0xf] }
   0x4   :  { %125 = vmatpush.bf16.msra.mxu0 %v245_v3  ;;  %v241_v11 = vor.u32 %v262_v8, %v238_v9  ;;  %v261_v13 = vld [vmem:[%s403_s1 + $0x54] sm:$0xf0]  ;;  %v260_v14 = vld [vmem:[%s403_s1 + $0x54] sm:$0xf]  ;;  %v230_v15 = vld [vmem:[%s403_s1 + $0x58] sm:$0xf0] }
   0x5   :  { %139 = vmatpush.bf16.msra.mxu1 %v249_v7  ;;  %v229_v16 = vor.u32 %v261_v13, %v228_v12  ;;  %v233_v17 = vor.u32 %v260_v14, %v230_v15  ;;  %v220_v18 = vld [vmem:[%s403_s1 + $0x40] sm:$0xf]  ;;  %v259_v19 = vld [vmem:[%s403_s1 + $0x44] sm:$0xf0]  ;;  %v258_v20 = vld [vmem:[%s403_s1 + $0x44] sm:$0xf] }
   0x6   :  { %v222_v21 = vld [vmem:[%s403_s1 + $0x48] sm:$0xf0]  ;;  %v221_v22 = vor.u32 %v259_v19, %v220_v18  ;;  %v212_v24 = vld [vmem:[%s403_s1 + $0x30] sm:$0xf]  ;;  %v257_v25 = vld [vmem:[%s403_s1 + $0x34] sm:$0xf0] }
   0x7   :  { %v225_v23 = vor.u32 %v258_v20, %v222_v21  ;;  %v256_v26 = vld [vmem:[%s403_s1 + $0x34] sm:$0xf]  ;;  %v214_v27 = vld [vmem:[%s403_s1 + $0x38] sm:$0xf0]  ;;  %v213_v28 = vor.u32 %v257_v25, %v212_v24  ;;  %v204_v30 = vld [vmem:[%s403_s1 + $0x20] sm:$0xf] }
   0x8   :  { %126 = vmatpush.bf16.msra.mxu0 %v237_v10  ;;  %v217_v29 = vor.u32 %v256_v26, %v214_v27  ;;  %v255_v31 = vld [vmem:[%s403_s1 + $0x24] sm:$0xf0]  ;;  %v254_v32 = vld [vmem:[%s403_s1 + $0x24] sm:$0xf]  ;;  %v206_v33 = vld [vmem:[%s403_s1 + $0x28] sm:$0xf0] }
   0x9   :  { %140 = vmatpush.bf16.msra.mxu1 %v241_v11  ;;  %v205_v34 = vor.u32 %v255_v31, %v204_v30  ;;  %v209_v35 = vor.u32 %v254_v32, %v206_v33  ;;  %v196_v36 = vld [vmem:[%s403_s1 + $0x10] sm:$0xf]  ;;  %v253_v37 = vld [vmem:[%s403_s1 + $0x14] sm:$0xf0]  ;;  %v252_v38 = vld [vmem:[%s403_s1 + $0x14] sm:$0xf] }
   0xa   :  { %v198_v39 = vld [vmem:[%s403_s1 + $0x18] sm:$0xf0]  ;;  %v197_v40 = vor.u32 %v253_v37, %v196_v36  ;;  %v188_v42 = vld [vmem:[%s403_s1] sm:$0xf]  ;;  %v251_v43 = vld [vmem:[%s403_s1 + $0x4] sm:$0xf0] }
   0xb   :  { %v201_v41 = vor.u32 %v252_v38, %v198_v39  ;;  %v250_v44 = vld [vmem:[%s403_s1 + $0x4] sm:$0xf]  ;;  %v190_v45 = vld [vmem:[%s403_s1 + $0x8] sm:$0xf0]  ;;  %v189_v46 = vor.u32 %v251_v43, %v188_v42  ;;  %v168_v51 = vld [vmem:[%s405_s2] sm:$0x3] }
   0xc   :  { %127 = vmatpush.bf16.msra.mxu0 %v229_v16  ;;  %v26_v47 = vld [vmem:[%s404_s0] sm:$0xff]  ;;  %v27_v48 = vld [vmem:[%s404_s0 + $0x8] sm:$0xff]  ;;  %v193_v49 = vor.u32 %v250_v44, %v190_v45  ;;  %v170_v52 = vperm.slane %v168_v51, 0  ;;  %v171_v53 = vperm.slane %v168_v51, 1 }
   0xd   :  { %141 = vmatpush.bf16.msra.mxu1 %v233_v17  ;;  %v28_v50 = vpack.c.bf16 %v27_v48, %v26_v47 }
  0x10   :  { %128 = vmatpush.bf16.msra.mxu0 %v221_v22 }
  0x11   :  { %142 = vmatpush.bf16.msra.mxu1 %v225_v23 }
  0x14   :  { %129 = vmatpush.bf16.msra.mxu0 %v213_v28 }
  0x15   :  { %143 = vmatpush.bf16.msra.mxu1 %v217_v29 }
  0x18   :  { %130 = vmatpush.bf16.msra.mxu0 %v205_v34 }
  0x19   :  { %144 = vmatpush.bf16.msra.mxu1 %v209_v35 }
  0x1c   :  { %131 = vmatpush.bf16.msra.mxu0 %v197_v40 }
  0x1d   :  { %145 = vmatpush.bf16.msra.mxu1 %v201_v41 }
  0x20   :  { %132 = vmatpush.bf16.msra.mxu0 %v189_v46 }
  0x21   :  { %146 = vmatpush.bf16.msra.mxu1 %v193_v49 }
  0x23   :  { %133 = vmatmul.bf16.vlgmr.msra.gmra.mxu0 %v28_v50 }
  0x24   :  { %147 = vmatmul.bf16.vlgmr.msra.gmra.mxu1 %v28_v50 }
  0xa0   :  { %v134_v54 = vpop.f32.mrf.mxu0 }
  0xa1   :  { %v174_v55 = vadd.f32 %v170_v52, %v134_v54  ;;  %v148_v56 = vpop.f32.mrf.mxu1 }
  0xa2   :  { %v175_v57 = vadd.f32 %v171_v53, %v148_v56 }
  0xa3   :  { %178 = vst [vmem:[%s406_s3] sm:$0xff] %v174_v55 }
  0xa4   :  { %179 = vst [vmem:[%s406_s3 + $0x8] sm:$0xff] %v175_v57 }
  0xa8   :  { %v136_v58 = vpop.f32.mrf.mxu0 }
  0xa9   :  { %v176_v59 = vadd.f32 %v170_v52, %v136_v58  ;;  %v150_v60 = vpop.f32.mrf.mxu1 }
  0xaa   :  { %v177_v61 = vadd.f32 %v171_v53, %v150_v60 }
  0xab   :  { %180 = vst [vmem:[%s406_s3 + $0x10] sm:$0xff] %v176_v59 }
  0xac   :  { %181 = vst [vmem:[%s406_s3 + $0x18] sm:$0xff] %v177_v61 }

</bundles_post_ra>
